<compile_context>
chip_gen: v6e
topology: v6e:2x2x1
jax: 0.10.0
libtpu: 0.0.40
codegen_flags: <defaults>
</compile_context>

<pallas_src>
import math

import jax
import jax.numpy as jnp
from jax import lax
from jax.experimental import pallas as pl
from jax.experimental.pallas import tpu as pltpu

OBJ_IN_DIM = 1024     # obj_in_dim
II_INNER = 256        # ii_dims_inner
II_DIMS = 1024        # ii_dims
IC_DIMS = 128         # ic_dims
CON_IN_DIM = 128      # con_in_dim
OUT_DIMS = II_DIMS + IC_DIMS

K_BLK = 256                    # streamed slab width over the ii_v / ii_fc 1024 axis
KB = II_DIMS // K_BLK          # 4 pipeline steps

# Packed-bias layout (all offsets are multiples of 128 -> lane-aligned static slices).
_B_IIQ = 0
_B_IIK = _B_IIQ + II_INNER     # 256
_B_IIFC = _B_IIK + II_INNER    # 512
_B_ICQ = _B_IIFC + II_DIMS     # 1536
_B_ICV = _B_ICQ + IC_DIMS      # 1664
_B_ICFC = _B_ICV + IC_DIMS     # 1792
_B_TOTAL = _B_ICFC + IC_DIMS   # 1920 = 15 * 128


def _softmax_last(s):
    # f32 softmax over the last (lane) axis; reciprocal on the EUP.
    s = s - jnp.max(s, axis=-1, keepdims=True)
    e = jnp.exp(s)
    denom = jnp.sum(e, axis=-1, keepdims=True)
    return e * pl.reciprocal(denom, approx=True)


# ---------------------------------------------------------------------------
# Fused kernel: one launch, 4 pipelined steps streaming the two big ii weights.
# ---------------------------------------------------------------------------
def cit_kernel(x_ref, con_ref, bias_ref,
               ii_q_w, ii_k_w, ii_v_wb, ii_v_bb, ii_fc_wb,
               ic_q_w, ic_k_w, ic_v_w, ic_fc_w,
               out_ref, p_sc):
    step = pl.program_id(0)
    x_f32 = x_ref[...]                       # (N, 1024) f32
    x = x_f32.astype(jnp.bfloat16)           # bf16 MXU operand

    @pl.when(step == 0)
    def _():
        # ---------- instance-instance q/k/scores/softmax (computed once) ----------
        q = jnp.dot(x, ii_q_w[...], preferred_element_type=jnp.float32) \
            + bias_ref[:, _B_IIQ:_B_IIQ + II_INNER]
        kk = jnp.dot(x, ii_k_w[...], preferred_element_type=jnp.float32) \
            + bias_ref[:, _B_IIK:_B_IIK + II_INNER]
        scores = lax.dot_general(q, kk, (((1,), (1,)), ((), ())),
                                 preferred_element_type=jnp.float32)
        scores = scores * (1.0 / math.sqrt(II_INNER))
        # TODO(synk): nn.Dropout(p=0.5) on the attention map treated as identity
        #             (eval-mode semantics).
        p_sc[...] = _softmax_last(scores)                       # (N, N) f32
        # Initialize the ii output slice with residual + ii_fc bias; the streamed
        # fc contributions accumulate into it on every step.
        out_ref[:, :II_DIMS] = x_f32 + bias_ref[:, _B_IIFC:_B_IIFC + II_DIMS]

        # ---------- instance-context cross-attention (one shot) ----------
        con_f32 = con_ref[...]                                  # (128, HW) f32
        con = con_f32.astype(jnp.bfloat16)
        hw = con_f32.shape[1]
        qc = jnp.dot(x, ic_q_w[...], preferred_element_type=jnp.float32) \
            + bias_ref[:, _B_ICQ:_B_ICQ + IC_DIMS]
        # ic_k_conv bias omitted: it only adds a per-query-row constant to the
        # scores, which the softmax cancels exactly.
        kT = jnp.dot(ic_k_w[...], con, preferred_element_type=jnp.float32)  # (128, HW)
        vT = jnp.dot(ic_v_w[...], con, preferred_element_type=jnp.float32)  # (128, HW)
        scores_ic = jnp.dot(qc, kT, preferred_element_type=jnp.float32)
        scores_ic = scores_ic * (1.0 / math.sqrt(IC_DIMS))
        # TODO(synk): dropout treated as identity (eval-mode semantics).
        p_ic = _softmax_last(scores_ic)                         # (N, HW) f32
        attn_ic = lax.dot_general(p_ic.astype(jnp.bfloat16), vT.astype(jnp.bfloat16),
                                  (((1,), (1,)), ((), ())),
                                  preferred_element_type=jnp.float32)       # (N, 128)
        # ic_v_conv bias folded past the attention (softmax rows sum to 1).
        attn_ic = attn_ic + bias_ref[:, _B_ICV:_B_ICV + IC_DIMS]
        # Global average pool, computed directly in (1, 128) orientation.
        ones_row = jnp.ones((1, hw), jnp.float32)
        pooled = lax.dot_general(ones_row, con_f32, (((1,), (1,)), ((), ())),
                                 preferred_element_type=jnp.float32) * (1.0 / hw)
        fc_ic = jnp.dot(attn_ic.astype(jnp.bfloat16), ic_fc_w[...],
                        preferred_element_type=jnp.float32)
        out_ref[:, II_DIMS:] = fc_ic + bias_ref[:, _B_ICFC:_B_ICFC + IC_DIMS] + pooled

    # ---------- every step: one 256-wide slab of ii_v_w / ii_fc_w ----------
    v_blk = jnp.dot(x, ii_v_wb[...], preferred_element_type=jnp.float32) + ii_v_bb[...]
    p_bf = p_sc[...].astype(jnp.bfloat16)
    attn_blk = jnp.dot(p_bf, v_blk.astype(jnp.bfloat16),
                       preferred_element_type=jnp.float32)                  # (N, 256)
    fc_contrib = jnp.dot(attn_blk.astype(jnp.bfloat16), ii_fc_wb[...],
                         preferred_element_type=jnp.float32)                # (N, 1024)
    out_ref[:, :II_DIMS] = out_ref[:, :II_DIMS] + fc_contrib


# ---------------------------------------------------------------------------
# Wrapper
# ---------------------------------------------------------------------------
def contextual_instance_transformer(params, instance_feat, con_feat):
    """Forward pass. instance_feat: (num_obj, 1024) f32; con_feat: (1, 128, H, W) f32."""
    num_obj = instance_feat.shape[0]
    n, c, h, w = con_feat.shape
    assert n == 1 and c == CON_IN_DIM
    hw = h * w
    con_cm = con_feat.reshape(c, hw)                            # free view, channels-major

    # Pack the small f32 biases into one lane-aligned (1, 1920) operand.
    bias_pack = jnp.concatenate(
        [params["ii_q_b"], params["ii_k_b"], params["ii_fc_b"],
         params["ic_q_b"], params["ic_v_b"], params["ic_fc_b"]], axis=-1)

    def full(shape):
        return pl.BlockSpec(shape, lambda k: (0, 0))

    grid_spec = pltpu.PrefetchScalarGridSpec(
        num_scalar_prefetch=0,
        grid=(KB,),
        in_specs=[
            full((num_obj, OBJ_IN_DIM)),                              # x
            full((CON_IN_DIM, hw)),                                   # context (channels-major)
            full((1, _B_TOTAL)),                                      # packed biases
            full((OBJ_IN_DIM, II_INNER)),                             # ii_q_w
            full((OBJ_IN_DIM, II_INNER)),                             # ii_k_w
            pl.BlockSpec((OBJ_IN_DIM, K_BLK), lambda k: (0, k)),      # ii_v_w (streamed)
            pl.BlockSpec((1, K_BLK), lambda k: (0, k)),               # ii_v_b (streamed)
            pl.BlockSpec((K_BLK, II_DIMS), lambda k: (k, 0)),         # ii_fc_w (streamed)
            full((OBJ_IN_DIM, IC_DIMS)),                              # ic_q_w
            full((IC_DIMS, CON_IN_DIM)),                              # ic_k_w
            full((IC_DIMS, CON_IN_DIM)),                              # ic_v_w
            full((IC_DIMS, IC_DIMS)),                                 # ic_fc_w
        ],
        out_specs=pl.BlockSpec((num_obj, OUT_DIMS), lambda k: (0, 0)),
        scratch_shapes=[pltpu.VMEM((num_obj, num_obj), jnp.float32)],  # softmax probs
    )

    return pl.pallas_call(
        cit_kernel,
        out_shape=jax.ShapeDtypeStruct((num_obj, OUT_DIMS), jnp.float32),
        grid_spec=grid_spec,
        compiler_params=pltpu.CompilerParams(
            # Single grid axis is the ii_v/ii_fc contraction (a reduction over the
            # resident output block) -> must be "arbitrary".
            dimension_semantics=("arbitrary",)),
    )(instance_feat, con_cm, bias_pack,
      params["ii_q_w"], params["ii_k_w"],
      params["ii_v_w"], params["ii_v_b"], params["ii_fc_w"],
      params["ic_q_w"], params["ic_k_w"], params["ic_v_w"], params["ic_fc_w"])


# ---------------------------------------------------------------------------
# Deterministic parameter initialization (shapes per the module's __init__).
# Weights bf16 (halves weight HBM traffic); biases f32.
# ---------------------------------------------------------------------------
def init_params(key):
    keys = jax.random.split(key, 6)

    def xavier_w(k, d_in, d_out):
        std = math.sqrt(2.0 / (d_in + d_out))
        return (jax.random.normal(k, (d_in, d_out), jnp.float32) * std).astype(jnp.bfloat16)

    def msra_w(k, c_out, c_in):
        std = math.sqrt(2.0 / c_out)  # kaiming_normal, fan_out, k=1
        return (jax.random.normal(k, (c_out, c_in), jnp.float32) * std).astype(jnp.bfloat16)

    p = {}
    # Linears: weight stored (in, out) bf16, bias (1, out) f32.
    p["ii_q_w"] = xavier_w(keys[0], OBJ_IN_DIM, II_INNER)
    p["ii_q_b"] = jnp.zeros((1, II_INNER), jnp.float32)
    p["ii_k_w"] = xavier_w(keys[1], OBJ_IN_DIM, II_INNER)
    p["ii_k_b"] = jnp.zeros((1, II_INNER), jnp.float32)
    p["ii_v_w"] = xavier_w(keys[2], OBJ_IN_DIM, II_DIMS)
    p["ii_v_b"] = jnp.zeros((1, II_DIMS), jnp.float32)
    # ii_fc: nn.init.constant_(weight, 0), constant_(bias, 0)
    p["ii_fc_w"] = jnp.zeros((II_DIMS, II_DIMS), jnp.bfloat16)
    p["ii_fc_b"] = jnp.zeros((1, II_DIMS), jnp.float32)
    p["ic_q_w"] = xavier_w(keys[3], OBJ_IN_DIM, IC_DIMS)
    p["ic_q_b"] = jnp.zeros((1, IC_DIMS), jnp.float32)
    # 1x1 convs: weight stored (C_out, C_in) bf16, bias (1, C_out) f32.
    p["ic_k_w"] = msra_w(keys[4], IC_DIMS, CON_IN_DIM)
    p["ic_k_b"] = jnp.zeros((1, IC_DIMS), jnp.float32)   # unused by the kernel: softmax cancels it exactly
    p["ic_v_w"] = msra_w(keys[5], IC_DIMS, CON_IN_DIM)
    p["ic_v_b"] = jnp.zeros((1, IC_DIMS), jnp.float32)
    # ic_fc: zero-initialized
    p["ic_fc_w"] = jnp.zeros((IC_DIMS, IC_DIMS), jnp.bfloat16)
    p["ic_fc_b"] = jnp.zeros((1, IC_DIMS), jnp.float32)
    return p


# ---------------------------------------------------------------------------
# Pure-JAX reference mirroring the PyTorch module (eval mode) with the same
# bf16-weight / bf16-activation-cast precision choices, exact softmax and the
# module's original bias placement (ic_k_b in k, ic_v_b in v).
# ---------------------------------------------------------------------------
def reference_forward(params, instance_feat, con_feat):
    f32 = jnp.float32
    x = instance_feat
    xb = x.astype(jnp.bfloat16)

    def lin(a_bf, w, b):
        return jnp.dot(a_bf, w, preferred_element_type=f32) + b

    with jax.default_matmul_precision("highest"):
        q = lin(xb, params["ii_q_w"], params["ii_q_b"])
        k = lin(xb, params["ii_k_w"], params["ii_k_b"])
        v = lin(xb, params["ii_v_w"], params["ii_v_b"])
        s = jnp.dot(q, k.T) * (1.0 / math.sqrt(II_INNER))
        p = jax.nn.softmax(s, axis=-1)
        attn = jnp.dot(p.astype(jnp.bfloat16), v.astype(jnp.bfloat16),
                       preferred_element_type=f32)
        ii = jnp.dot(attn.astype(jnp.bfloat16), params["ii_fc_w"],
                     preferred_element_type=f32) + params["ii_fc_b"] + x

        n, c, h, w = con_feat.shape
        con = con_feat.reshape(c, h * w)
        conb = con.astype(jnp.bfloat16)
        qc = lin(xb, params["ic_q_w"], params["ic_q_b"])
        kT = jnp.dot(params["ic_k_w"], conb, preferred_element_type=f32) + params["ic_k_b"].T
        vT = jnp.dot(params["ic_v_w"], conb, preferred_element_type=f32) + params["ic_v_b"].T
        s_ic = jnp.dot(qc, kT) * (1.0 / math.sqrt(IC_DIMS))
        p_ic = jax.nn.softmax(s_ic, axis=-1)
        attn_ic = jnp.dot(p_ic.astype(jnp.bfloat16), vT.astype(jnp.bfloat16).T,
                          preferred_element_type=f32)
        fc_ic = jnp.dot(attn_ic.astype(jnp.bfloat16), params["ic_fc_w"],
                        preferred_element_type=f32) + params["ic_fc_b"]
        pooled = jnp.mean(con, axis=1)[None, :]
        ic = fc_ic + pooled
    return jnp.concatenate([ii, ic], axis=-1)


if __name__ == "__main__":
    key = jax.random.PRNGKey(0)
    k_params, k_inst, k_con, k_w1, k_w2, k_b = jax.random.split(key, 6)

    params = init_params(k_params)

    num_obj = 8
    H = W = 16
    instance_feat = jax.random.normal(k_inst, (num_obj, OBJ_IN_DIM), jnp.float32)
    con_feat = jax.random.normal(k_con, (1, CON_IN_DIM, H, W), jnp.float32)

    fwd = jax.jit(contextual_instance_transformer)

    # ---- Check 1: module-default (zero-initialized fc) weights -> exact structure ----
    out = jax.block_until_ready(fwd(params, instance_feat, con_feat))
    assert out.shape == (num_obj, OUT_DIMS), out.shape
    expected_ii = instance_feat
    expected_ic = jnp.broadcast_to(
        jnp.mean(con_feat.reshape(CON_IN_DIM, H * W), axis=1)[None, :],
        (num_obj, IC_DIMS))
    assert jnp.allclose(out[:, :II_DIMS], expected_ii, atol=1e-3, rtol=1e-3)
    assert jnp.allclose(out[:, II_DIMS:], expected_ic, atol=1e-3, rtol=1e-3)

    # ---- Check 2: nonzero fc weights / biases vs. a full JAX reference ----
    params2 = dict(params)
    bkeys = jax.random.split(k_b, 8)
    params2["ii_fc_w"] = (jax.random.normal(k_w1, (II_DIMS, II_DIMS), jnp.float32)
                          * 0.02).astype(jnp.bfloat16)
    params2["ic_fc_w"] = (jax.random.normal(k_w2, (IC_DIMS, IC_DIMS), jnp.float32)
                          * 0.05).astype(jnp.bfloat16)
    params2["ii_q_b"] = jax.random.normal(bkeys[0], (1, II_INNER), jnp.float32) * 0.1
    params2["ii_k_b"] = jax.random.normal(bkeys[1], (1, II_INNER), jnp.float32) * 0.1
    params2["ii_v_b"] = jax.random.normal(bkeys[2], (1, II_DIMS), jnp.float32) * 0.1
    params2["ii_fc_b"] = jax.random.normal(bkeys[3], (1, II_DIMS), jnp.float32) * 0.1
    params2["ic_q_b"] = jax.random.normal(bkeys[4], (1, IC_DIMS), jnp.float32) * 0.1
    params2["ic_k_b"] = jax.random.normal(bkeys[5], (1, IC_DIMS), jnp.float32) * 0.1
    params2["ic_v_b"] = jax.random.normal(bkeys[6], (1, IC_DIMS), jnp.float32) * 0.1
    params2["ic_fc_b"] = jax.random.normal(bkeys[7], (1, IC_DIMS), jnp.float32) * 0.1

    out2 = jax.block_until_ready(fwd(params2, instance_feat, con_feat))
    ref2 = jax.block_until_ready(reference_forward(params2, instance_feat, con_feat))
    assert jnp.allclose(out2, ref2, atol=5e-2, rtol=5e-2), float(jnp.max(jnp.abs(out2 - ref2)))

    print("KERNEL_OK")
</pallas_src>

<mosaic_0001>
module attributes {stable_mosaic.version = 11 : i64} {
  func.func @cit_kernel(%arg0: i32, %arg1: memref<8x1024xf32, #tpu.memory_space<vmem>>, %arg2: memref<128x256xf32, #tpu.memory_space<vmem>>, %arg3: memref<1x1920xf32, #tpu.memory_space<vmem>>, %arg4: memref<1024x256xbf16, #tpu.memory_space<vmem>>, %arg5: memref<1024x256xbf16, #tpu.memory_space<vmem>>, %arg6: memref<1024x256xbf16, #tpu.memory_space<vmem>>, %arg7: memref<1x256xf32, #tpu.memory_space<vmem>>, %arg8: memref<256x1024xbf16, #tpu.memory_space<vmem>>, %arg9: memref<1024x128xbf16, #tpu.memory_space<vmem>>, %arg10: memref<128x128xbf16, #tpu.memory_space<vmem>>, %arg11: memref<128x128xbf16, #tpu.memory_space<vmem>>, %arg12: memref<128x128xbf16, #tpu.memory_space<vmem>>, %arg13: memref<8x1152xf32, #tpu.memory_space<vmem>>, %arg14: memref<8x8xf32, #tpu.memory_space<vmem>>) attributes {dimension_semantics = [#tpu.dimension_semantics<arbitrary>], iteration_bounds = array<i64: 4>, scalar_prefetch = 0 : i64, scratch_operands = 1 : i64, tpu.core_type = #tpu.core_type<tc>, window_params = [{pipeline_mode = #tpu.pipeline_mode<synchronous>, transform_indices = @transform_0, window_bounds = array<i64: 8, 1024>}, {pipeline_mode = #tpu.pipeline_mode<synchronous>, transform_indices = @transform_1, window_bounds = array<i64: 128, 256>}, {pipeline_mode = #tpu.pipeline_mode<synchronous>, transform_indices = @transform_2, window_bounds = array<i64: 1, 1920>}, {pipeline_mode = #tpu.pipeline_mode<synchronous>, transform_indices = @transform_3, window_bounds = array<i64: 1024, 256>}, {pipeline_mode = #tpu.pipeline_mode<synchronous>, transform_indices = @transform_4, window_bounds = array<i64: 1024, 256>}, {transform_indices = @transform_5, window_bounds = array<i64: 1024, 256>}, {transform_indices = @transform_6, window_bounds = array<i64: 1, 256>}, {transform_indices = @transform_7, window_bounds = array<i64: 256, 1024>}, {pipeline_mode = #tpu.pipeline_mode<synchronous>, transform_indices = @transform_8, window_bounds = array<i64: 1024, 128>}, {pipeline_mode = #tpu.pipeline_mode<synchronous>, transform_indices = @transform_9, window_bounds = array<i64: 128, 128>}, {pipeline_mode = #tpu.pipeline_mode<synchronous>, transform_indices = @transform_10, window_bounds = array<i64: 128, 128>}, {pipeline_mode = #tpu.pipeline_mode<synchronous>, transform_indices = @transform_11, window_bounds = array<i64: 128, 128>}, {pipeline_mode = #tpu.pipeline_mode<synchronous>, transform_indices = @transform_12, window_bounds = array<i64: 8, 1152>}]} {
    %c0 = arith.constant 0 : index
    %c0_0 = arith.constant 0 : index
    %0 = vector.load %arg1[%c0, %c0_0] : memref<8x1024xf32, #tpu.memory_space<vmem>>, vector<8x1024xf32>
    %1 = arith.truncf %0 : vector<8x1024xf32> to vector<8x1024xbf16>
    %c0_i32 = arith.constant 0 : i32
    %2 = arith.cmpi eq, %arg0, %c0_i32 : i32
    %3 = arith.extui %2 : i1 to i32
    %c0_i32_1 = arith.constant 0 : i32
    %4 = arith.cmpi ne, %3, %c0_i32_1 : i32
    scf.if %4 {
      %c0_16 = arith.constant 0 : index
      %c0_17 = arith.constant 0 : index
      %20 = vector.load %arg4[%c0_16, %c0_17] : memref<1024x256xbf16, #tpu.memory_space<vmem>>, vector<1024x256xbf16>
      %cst_18 = arith.constant dense<0.000000e+00> : vector<8x256xf32>
      %21 = tpu.matmul %1, %20, %cst_18 {dimension_numbers = #tpu.dot_dimension_numbers<[1], [0], [0], [1], [0, 0, 1, 1], [], []>} : vector<8x1024xbf16>, vector<1024x256xbf16>, vector<8x256xf32> -> vector<8x256xf32>
      %c0_19 = arith.constant 0 : index
      %c0_20 = arith.constant 0 : index
      %22 = vector.load %arg3[%c0_19, %c0_20] : memref<1x1920xf32, #tpu.memory_space<vmem>>, vector<1x256xf32>
      %23 = vector.broadcast %22 : vector<1x256xf32> to vector<8x256xf32>
      %24 = arith.addf %21, %23 : vector<8x256xf32>
      %c0_21 = arith.constant 0 : index
      %c0_22 = arith.constant 0 : index
      %25 = vector.load %arg5[%c0_21, %c0_22] : memref<1024x256xbf16, #tpu.memory_space<vmem>>, vector<1024x256xbf16>
      %cst_23 = arith.constant dense<0.000000e+00> : vector<8x256xf32>
      %26 = tpu.matmul %1, %25, %cst_23 {dimension_numbers = #tpu.dot_dimension_numbers<[1], [0], [0], [1], [0, 0, 1, 1], [], []>} : vector<8x1024xbf16>, vector<1024x256xbf16>, vector<8x256xf32> -> vector<8x256xf32>
      %c0_24 = arith.constant 0 : index
      %c256 = arith.constant 256 : index
      %27 = vector.load %arg3[%c0_24, %c256] : memref<1x1920xf32, #tpu.memory_space<vmem>>, vector<1x256xf32>
      %28 = vector.broadcast %27 : vector<1x256xf32> to vector<8x256xf32>
      %29 = arith.addf %26, %28 : vector<8x256xf32>
      %cst_25 = arith.constant dense<0.000000e+00> : vector<8x8xf32>
      %30 = tpu.matmul %24, %29, %cst_25 {dimension_numbers = #tpu.dot_dimension_numbers<[1], [1], [0], [0], [0, 0, 1, 0], [], []>} : vector<8x256xf32>, vector<8x256xf32>, vector<8x8xf32> -> vector<8x8xf32>
      %cst_26 = arith.constant 6.250000e-02 : f32
      %31 = vector.broadcast %cst_26 : f32 to vector<8x8xf32>
      %32 = arith.mulf %30, %31 : vector<8x8xf32>
      %cst_27 = arith.constant dense<0xFF800000> : vector<8xf32>
      %33 = vector.multi_reduction <maximumf>, %32, %cst_27 [1] : vector<8x8xf32> to vector<8xf32>
      %34 = vector.shape_cast %33 : vector<8xf32> to vector<8x1xf32>
      %35 = vector.broadcast %34 : vector<8x1xf32> to vector<8x8xf32>
      %36 = arith.subf %32, %35 : vector<8x8xf32>
      %37 = math.exp %36 : vector<8x8xf32>
      %cst_28 = arith.constant dense<0.000000e+00> : vector<8xf32>
      %38 = vector.multi_reduction <add>, %37, %cst_28 [1] : vector<8x8xf32> to vector<8xf32>
      %39 = vector.shape_cast %38 : vector<8xf32> to vector<8x1xf32>
      %40 = tpu.reciprocal %39 {approx = true} : vector<8x1xf32> -> vector<8x1xf32>
      %41 = vector.broadcast %40 : vector<8x1xf32> to vector<8x8xf32>
      %42 = arith.mulf %37, %41 : vector<8x8xf32>
      %c0_29 = arith.constant 0 : index
      %c0_30 = arith.constant 0 : index
      %43 = vector.load %arg14[%c0_29, %c0_30] : memref<8x8xf32, #tpu.memory_space<vmem>>, vector<8x8xf32>
      tpu.vector_store %arg14[%c0_29, %c0_30], %42 {strides = array<i32>} : memref<8x8xf32, #tpu.memory_space<vmem>>, vector<8x8xf32>,
      %c0_31 = arith.constant 0 : index
      %c512 = arith.constant 512 : index
      %44 = vector.load %arg3[%c0_31, %c512] : memref<1x1920xf32, #tpu.memory_space<vmem>>, vector<1x1024xf32>
      %45 = vector.broadcast %44 : vector<1x1024xf32> to vector<8x1024xf32>
      %46 = arith.addf %0, %45 : vector<8x1024xf32>
      %c0_32 = arith.constant 0 : index
      %c0_33 = arith.constant 0 : index
      %47 = vector.load %arg13[%c0_32, %c0_33] : memref<8x1152xf32, #tpu.memory_space<vmem>>, vector<8x1024xf32>
      tpu.vector_store %arg13[%c0_32, %c0_33], %46 {strides = array<i32>} : memref<8x1152xf32, #tpu.memory_space<vmem>>, vector<8x1024xf32>,
      %c0_34 = arith.constant 0 : index
      %c0_35 = arith.constant 0 : index
      %48 = vector.load %arg2[%c0_34, %c0_35] : memref<128x256xf32, #tpu.memory_space<vmem>>, vector<128x256xf32>
      %49 = arith.truncf %48 : vector<128x256xf32> to vector<128x256xbf16>
      %c0_36 = arith.constant 0 : index
      %c0_37 = arith.constant 0 : index
      %50 = vector.load %arg9[%c0_36, %c0_37] : memref<1024x128xbf16, #tpu.memory_space<vmem>>, vector<1024x128xbf16>
      %cst_38 = arith.constant dense<0.000000e+00> : vector<8x128xf32>
      %51 = tpu.matmul %1, %50, %cst_38 {dimension_numbers = #tpu.dot_dimension_numbers<[1], [0], [0], [1], [0, 0, 1, 1], [], []>} : vector<8x1024xbf16>, vector<1024x128xbf16>, vector<8x128xf32> -> vector<8x128xf32>
      %c0_39 = arith.constant 0 : index
      %c1536 = arith.constant 1536 : index
      %52 = vector.load %arg3[%c0_39, %c1536] : memref<1x1920xf32, #tpu.memory_space<vmem>>, vector<1x128xf32>
      %53 = vector.broadcast %52 : vector<1x128xf32> to vector<8x128xf32>
      %54 = arith.addf %51, %53 : vector<8x128xf32>
      %c0_40 = arith.constant 0 : index
      %c0_41 = arith.constant 0 : index
      %55 = vector.load %arg10[%c0_40, %c0_41] : memref<128x128xbf16, #tpu.memory_space<vmem>>, vector<128x128xbf16>
      %cst_42 = arith.constant dense<0.000000e+00> : vector<128x256xf32>
      %56 = tpu.matmul %55, %49, %cst_42 {dimension_numbers = #tpu.dot_dimension_numbers<[1], [0], [0], [1], [0, 0, 1, 1], [], []>} : vector<128x128xbf16>, vector<128x256xbf16>, vector<128x256xf32> -> vector<128x256xf32>
      %c0_43 = arith.constant 0 : index
      %c0_44 = arith.constant 0 : index
      %57 = vector.load %arg11[%c0_43, %c0_44] : memref<128x128xbf16, #tpu.memory_space<vmem>>, vector<128x128xbf16>
      %cst_45 = arith.constant dense<0.000000e+00> : vector<128x256xf32>
      %58 = tpu.matmul %57, %49, %cst_45 {dimension_numbers = #tpu.dot_dimension_numbers<[1], [0], [0], [1], [0, 0, 1, 1], [], []>} : vector<128x128xbf16>, vector<128x256xbf16>, vector<128x256xf32> -> vector<128x256xf32>
      %cst_46 = arith.constant dense<0.000000e+00> : vector<8x256xf32>
      %59 = tpu.matmul %54, %56, %cst_46 {dimension_numbers = #tpu.dot_dimension_numbers<[1], [0], [0], [1], [0, 0, 1, 1], [], []>} : vector<8x128xf32>, vector<128x256xf32>, vector<8x256xf32> -> vector<8x256xf32>
      %cst_47 = arith.constant 0.0883883461 : f32
      %60 = vector.broadcast %cst_47 : f32 to vector<8x256xf32>
      %61 = arith.mulf %59, %60 : vector<8x256xf32>
      %cst_48 = arith.constant dense<0xFF800000> : vector<8xf32>
      %62 = vector.multi_reduction <maximumf>, %61, %cst_48 [1] : vector<8x256xf32> to vector<8xf32>
      %63 = vector.shape_cast %62 : vector<8xf32> to vector<8x1xf32>
      %64 = vector.broadcast %63 : vector<8x1xf32> to vector<8x256xf32>
      %65 = arith.subf %61, %64 : vector<8x256xf32>
      %66 = math.exp %65 : vector<8x256xf32>
      %cst_49 = arith.constant dense<0.000000e+00> : vector<8xf32>
      %67 = vector.multi_reduction <add>, %66, %cst_49 [1] : vector<8x256xf32> to vector<8xf32>
      %68 = vector.shape_cast %67 : vector<8xf32> to vector<8x1xf32>
      %69 = tpu.reciprocal %68 {approx = true} : vector<8x1xf32> -> vector<8x1xf32>
      %70 = vector.broadcast %69 : vector<8x1xf32> to vector<8x256xf32>
      %71 = arith.mulf %66, %70 : vector<8x256xf32>
      %72 = arith.truncf %71 : vector<8x256xf32> to vector<8x256xbf16>
      %73 = arith.truncf %58 : vector<128x256xf32> to vector<128x256xbf16>
      %cst_50 = arith.constant dense<0.000000e+00> : vector<8x128xf32>
      %74 = tpu.matmul %72, %73, %cst_50 {dimension_numbers = #tpu.dot_dimension_numbers<[1], [1], [0], [0], [0, 0, 1, 0], [], []>} : vector<8x256xbf16>, vector<128x256xbf16>, vector<8x128xf32> -> vector<8x128xf32>
      %c0_51 = arith.constant 0 : index
      %c1664 = arith.constant 1664 : index
      %75 = vector.load %arg3[%c0_51, %c1664] : memref<1x1920xf32, #tpu.memory_space<vmem>>, vector<1x128xf32>
      %76 = vector.broadcast %75 : vector<1x128xf32> to vector<8x128xf32>
      %77 = arith.addf %74, %76 : vector<8x128xf32>
      %cst_52 = arith.constant 1.000000e+00 : f32
      %78 = vector.broadcast %cst_52 : f32 to vector<1x256xf32>
      %cst_53 = arith.constant dense<0.000000e+00> : vector<1x128xf32>
      %79 = tpu.matmul %78, %48, %cst_53 {dimension_numbers = #tpu.dot_dimension_numbers<[1], [1], [0], [0], [0, 0, 1, 0], [], []>} : vector<1x256xf32>, vector<128x256xf32>, vector<1x128xf32> -> vector<1x128xf32>
      %cst_54 = arith.constant 3.906250e-03 : f32
      %80 = vector.broadcast %cst_54 : f32 to vector<1x128xf32>
      %81 = arith.mulf %79, %80 : vector<1x128xf32>
      %82 = arith.truncf %77 : vector<8x128xf32> to vector<8x128xbf16>
      %c0_55 = arith.constant 0 : index
      %c0_56 = arith.constant 0 : index
      %83 = vector.load %arg12[%c0_55, %c0_56] : memref<128x128xbf16, #tpu.memory_space<vmem>>, vector<128x128xbf16>
      %cst_57 = arith.constant dense<0.000000e+00> : vector<8x128xf32>
      %84 = tpu.matmul %82, %83, %cst_57 {dimension_numbers = #tpu.dot_dimension_numbers<[1], [0], [0], [1], [0, 0, 1, 1], [], []>} : vector<8x128xbf16>, vector<128x128xbf16>, vector<8x128xf32> -> vector<8x128xf32>
      %c0_58 = arith.constant 0 : index
      %c1792 = arith.constant 1792 : index
      %85 = vector.load %arg3[%c0_58, %c1792] : memref<1x1920xf32, #tpu.memory_space<vmem>>, vector<1x128xf32>
      %86 = vector.broadcast %85 : vector<1x128xf32> to vector<8x128xf32>
      %87 = arith.addf %84, %86 : vector<8x128xf32>
      %88 = vector.broadcast %81 : vector<1x128xf32> to vector<8x128xf32>
      %89 = arith.addf %87, %88 : vector<8x128xf32>
      %c0_59 = arith.constant 0 : index
      %c1024 = arith.constant 1024 : index
      %90 = vector.load %arg13[%c0_59, %c1024] : memref<8x1152xf32, #tpu.memory_space<vmem>>, vector<8x128xf32>
      tpu.vector_store %arg13[%c0_59, %c1024], %89 {strides = array<i32>} : memref<8x1152xf32, #tpu.memory_space<vmem>>, vector<8x128xf32>,
    } else {
    }
    %c0_2 = arith.constant 0 : index
    %c0_3 = arith.constant 0 : index
    %5 = vector.load %arg6[%c0_2, %c0_3] : memref<1024x256xbf16, #tpu.memory_space<vmem>>, vector<1024x256xbf16>
    %cst = arith.constant dense<0.000000e+00> : vector<8x256xf32>
    %6 = tpu.matmul %1, %5, %cst {dimension_numbers = #tpu.dot_dimension_numbers<[1], [0], [0], [1], [0, 0, 1, 1], [], []>} : vector<8x1024xbf16>, vector<1024x256xbf16>, vector<8x256xf32> -> vector<8x256xf32>
    %c0_4 = arith.constant 0 : index
    %c0_5 = arith.constant 0 : index
    %7 = vector.load %arg7[%c0_4, %c0_5] : memref<1x256xf32, #tpu.memory_space<vmem>>, vector<1x256xf32>
    %8 = vector.broadcast %7 : vector<1x256xf32> to vector<8x256xf32>
    %9 = arith.addf %6, %8 : vector<8x256xf32>
    %c0_6 = arith.constant 0 : index
    %c0_7 = arith.constant 0 : index
    %10 = vector.load %arg14[%c0_6, %c0_7] : memref<8x8xf32, #tpu.memory_space<vmem>>, vector<8x8xf32>
    %11 = arith.truncf %10 : vector<8x8xf32> to vector<8x8xbf16>
    %12 = arith.truncf %9 : vector<8x256xf32> to vector<8x256xbf16>
    %cst_8 = arith.constant dense<0.000000e+00> : vector<8x256xf32>
    %13 = tpu.matmul %11, %12, %cst_8 {dimension_numbers = #tpu.dot_dimension_numbers<[1], [0], [0], [1], [0, 0, 1, 1], [], []>} : vector<8x8xbf16>, vector<8x256xbf16>, vector<8x256xf32> -> vector<8x256xf32>
    %14 = arith.truncf %13 : vector<8x256xf32> to vector<8x256xbf16>
    %c0_9 = arith.constant 0 : index
    %c0_10 = arith.constant 0 : index
    %15 = vector.load %arg8[%c0_9, %c0_10] : memref<256x1024xbf16, #tpu.memory_space<vmem>>, vector<256x1024xbf16>
    %cst_11 = arith.constant dense<0.000000e+00> : vector<8x1024xf32>
    %16 = tpu.matmul %14, %15, %cst_11 {dimension_numbers = #tpu.dot_dimension_numbers<[1], [0], [0], [1], [0, 0, 1, 1], [], []>} : vector<8x256xbf16>, vector<256x1024xbf16>, vector<8x1024xf32> -> vector<8x1024xf32>
    %c0_12 = arith.constant 0 : index
    %c0_13 = arith.constant 0 : index
    %17 = vector.load %arg13[%c0_12, %c0_13] : memref<8x1152xf32, #tpu.memory_space<vmem>>, vector<8x1024xf32>
    %18 = arith.addf %17, %16 : vector<8x1024xf32>
    %c0_14 = arith.constant 0 : index
    %c0_15 = arith.constant 0 : index
    %19 = vector.load %arg13[%c0_14, %c0_15] : memref<8x1152xf32, #tpu.memory_space<vmem>>, vector<8x1024xf32>
    tpu.vector_store %arg13[%c0_14, %c0_15], %18 {strides = array<i32>} : memref<8x1152xf32, #tpu.memory_space<vmem>>, vector<8x1024xf32>,
    return
  }
  func.func @transform_0(%arg0: i32) -> (i32, i32) {
    %c0_i32 = arith.constant 0 : i32
    %c0_i32_0 = arith.constant 0 : i32
    %c0_i32_1 = arith.constant 0 : i32
    return %c0_i32, %c0_i32_0 : i32, i32
  }
  func.func @transform_1(%arg0: i32) -> (i32, i32) {
    %c0_i32 = arith.constant 0 : i32
    %c0_i32_0 = arith.constant 0 : i32
    %c0_i32_1 = arith.constant 0 : i32
    return %c0_i32, %c0_i32_0 : i32, i32
  }
  func.func @transform_2(%arg0: i32) -> (i32, i32) {
    %c0_i32 = arith.constant 0 : i32
    %c0_i32_0 = arith.constant 0 : i32
    %c0_i32_1 = arith.constant 0 : i32
    return %c0_i32, %c0_i32_0 : i32, i32
  }
  func.func @transform_3(%arg0: i32) -> (i32, i32) {
    %c0_i32 = arith.constant 0 : i32
    %c0_i32_0 = arith.constant 0 : i32
    %c0_i32_1 = arith.constant 0 : i32
    return %c0_i32, %c0_i32_0 : i32, i32
  }
  func.func @transform_4(%arg0: i32) -> (i32, i32) {
    %c0_i32 = arith.constant 0 : i32
    %c0_i32_0 = arith.constant 0 : i32
    %c0_i32_1 = arith.constant 0 : i32
    return %c0_i32, %c0_i32_0 : i32, i32
  }
  func.func @transform_5(%arg0: i32) -> (i32, i32) {
    %c0_i32 = arith.constant 0 : i32
    %c0_i32_0 = arith.constant 0 : i32
    return %c0_i32, %arg0 : i32, i32
  }
  func.func @transform_6(%arg0: i32) -> (i32, i32) {
    %c0_i32 = arith.constant 0 : i32
    %c0_i32_0 = arith.constant 0 : i32
    return %c0_i32, %arg0 : i32, i32
  }
  func.func @transform_7(%arg0: i32) -> (i32, i32) {
    %c0_i32 = arith.constant 0 : i32
    %c0_i32_0 = arith.constant 0 : i32
    return %arg0, %c0_i32 : i32, i32
  }
  func.func @transform_8(%arg0: i32) -> (i32, i32) {
    %c0_i32 = arith.constant 0 : i32
    %c0_i32_0 = arith.constant 0 : i32
    %c0_i32_1 = arith.constant 0 : i32
    return %c0_i32, %c0_i32_0 : i32, i32
  }
  func.func @transform_9(%arg0: i32) -> (i32, i32) {
    %c0_i32 = arith.constant 0 : i32
    %c0_i32_0 = arith.constant 0 : i32
    %c0_i32_1 = arith.constant 0 : i32
    return %c0_i32, %c0_i32_0 : i32, i32
  }
  func.func @transform_10(%arg0: i32) -> (i32, i32) {
    %c0_i32 = arith.constant 0 : i32
    %c0_i32_0 = arith.constant 0 : i32
    %c0_i32_1 = arith.constant 0 : i32
    return %c0_i32, %c0_i32_0 : i32, i32
  }
  func.func @transform_11(%arg0: i32) -> (i32, i32) {
    %c0_i32 = arith.constant 0 : i32
    %c0_i32_0 = arith.constant 0 : i32
    %c0_i32_1 = arith.constant 0 : i32
    return %c0_i32, %c0_i32_0 : i32, i32
  }
  func.func @transform_12(%arg0: i32) -> (i32, i32) {
    %c0_i32 = arith.constant 0 : i32
    %c0_i32_0 = arith.constant 0 : i32
    %c0_i32_1 = arith.constant 0 : i32
    return %c0_i32, %c0_i32_0 : i32, i32
  }
}

</mosaic_0001>

<bundles_post_ra>
// kernel: contextual_instance_transformer.1
= control target key start
LH: loop header
LB: loop body
LE: loop exit
PB: predicated region body
PF: predicated region fallthrough
CT: control target
= control target key end

     0   :  { %s9296_s0 = inlined_call_operand.hbm [shape: f32[8,1024], index: 0, kind: input, shape index: {}]   ;;  %s9297_s1 = inlined_call_operand.vmem [shape: f32[128,256], index: 1, kind: input, shape index: {}]   ;;  %s9298_s2 = inlined_call_operand.vmem [shape: f32[1,1920], index: 2, kind: input, shape index: {}]   ;;  %s9299_s3 = inlined_call_operand.hbm [shape: bf16[1024,256], index: 3, kind: input, shape index: {}]   ;;  %s9300_s4 = inlined_call_operand.hbm [shape: bf16[1024,256], index: 4, kind: input, shape index: {}]   ;;  %s9301_s5 = inlined_call_operand.hbm [shape: bf16[1024,1024], index: 5, kind: input, shape index: {}]   ;;  %s9302_s6 = inlined_call_operand.hbm [shape: f32[1,1024], index: 6, kind: input, shape index: {}]   ;;  %s9303_s7 = inlined_call_operand.hbm [shape: bf16[1024,1024], index: 7, kind: input, shape index: {}]   ;;  %s9304_s8 = inlined_call_operand.hbm [shape: bf16[1024,128], index: 8, kind: input, shape index: {}]   ;;  %s9305_s9 = inlined_call_operand.hbm [shape: bf16[128,128], index: 9, kind: input, shape index: {}]   ;;  %s9306_s10 = inlined_call_operand.hbm [shape: bf16[128,128], index: 10, kind: input, shape index: {}]   ;;  %s9307_s11 = inlined_call_operand.hbm [shape: bf16[128,128], index: 11, kind: input, shape index: {}]   ;;  %s9308_s12 = inlined_call_operand.hbm [shape: f32[8,1152], index: 12, kind: output, shape index: {}]  }
   0x1   :  { %9355 = sst [smem:[#allocation50_spill]] %s9296_s0 }
   0x2   :  { %9356 = sst [smem:[#allocation51_spill]] %s9297_s1 }
   0x3   :  { %9357 = sst [smem:[#allocation52_spill]] %s9299_s3 }
   0x4   :  { %9358 = sst [smem:[#allocation53_spill]] %s9300_s4 }
   0x5   :  { %9359 = sst [smem:[#allocation54_spill]] %s9301_s5 }
   0x6   :  { %9360 = sst [smem:[#allocation55_spill]] %s9304_s8 }
   0x7   :  { %9361 = sst [smem:[#allocation56_spill]] %s9305_s9 }
   0x8   :  { %9362 = sst [smem:[#allocation57_spill]] %s9308_s12 }
   0x9   :  { %17 = vsyncpa [#allocation4], 0 }
   0xa   :  { %18 = vsyncpa [#allocation7], 0 }
   0xb   :  { %19 = vsyncpa [#allocation10], 0 }
   0xc   :  { %21 = vsyncpa [#allocation10 + $0x1], 0 }
   0xd   :  { %22 = vsyncpa [#allocation13], 0 }
   0xe   :  { %24 = vsyncpa [#allocation13 + $0x1], 0 }
   0xf   :  { %25 = vsyncpa [#allocation16], 0 }
  0x10   :  { %26 = vsyncpa [#allocation19], 0 }
  0x11   :  { %27 = vsyncpa [#allocation5], 0  ;;  %s8215_s21 = smov 0   ;;  %s8217_s22 = smov 0  }
  0x12   :  { %s8219_s23 = smov 0   ;;  %s8221_s24 = smov 0  }
  0x13 LB: > { %s8128_s25 = smov [#allocation6]   ;;  %s8236_s27 = sadd.s32 4294967295, %s8126_s24   ;;  %s8126_s24 = sphi %s8221_s24, %s9442_s24   ;;  %s8122_s23 = sphi %s8219_s23, %s9446_s23   ;;  %s8118_s22 = sphi %s8217_s22, %s9445_s22   ;;  %s8114_s21 = sphi %s8215_s21, %s9444_s21  }
  0x14   : > { %s355_s26 = sshll.u32 %s8128_s25, 4  ;;  %p6201_p0 = scmp.ge.s32.totalorder %s8126_s24, 1  ;;  %s356_s26 = int_to_ptr.vmem [resolvable:$true] %s355_s26 }
  0x15   : > { %p9321_p1 = scmp.eq.s32.totalorder %s8236_s27, 0  ;;  %p326_p2 = scmp.lt.s32.totalorder %s8126_s24, 5 }
  0x16   : > { %s8129_s29 = smov [#allocation14]   ;;  %s8130_s14 = smov [#allocation15]  }
  0x17   : > { %p8242_p4 = pnand %p6201_p0, %p326_p2  ;;  %s381_s30 = sshll.u32 %s8129_s29, 4  ;;  %s8254_s30 = int_to_ptr.vmem [resolvable:$true] %s381_s30 }
  0x18   : > { %s8256_s15 = sshll.u32 %s8130_s14, 4  ;;  %s7785_s17 = scalar_lea.vmem %s356_s26, 16384  ;;  %s395_s15 = int_to_ptr.vmem [resolvable:$true] %s8256_s15 }
  0x19   : > { %s9363_s28 = scalar_select %p8242_p4, 1, 0 }
  0x1a   : > { %p7000_p5 = pneg %p8242_p4  ;;  %p7786_p8 = scmp.ne.s32.totalorder %s356_s26, %s7785_s17 }
  0x1b   : > { %p7793_p11 = scmp.lt.s32.totalorder %s356_s26, %s356_s26  ;;  %p7794_p12 = scmp.lt.s32.totalorder %s7785_s17, %s7785_s17 }
  0x1c   : > { %p8250_p6 = pnand %p7000_p5, %p9321_p1 }
  0x1d   : > { %p7795_p13 = por %p7794_p12, %p7793_p11 }
  0x1e   : > { %s9364_s13 = scalar_select %p8250_p6, 1, 0 }
  0x1f   : > { %p8260_p7 = pneg %p8250_p6 }
  0x21   : > { %s9365_s16 = scalar_select %p8260_p7, 1, 0 }
  0x22   : > { %p7788_p9 = pnand %p7786_p8, %p8260_p7 }
  0x24   : > { %p7789_p10 = pneg %p7788_p9 }
  0x26   : > { %p7796_p0 = pnand %p7795_p13, %p7789_p10 }
  0x28   : > { %7799 = shalt.err (!%p7796_p0)
}
  0x29   : > { %s9309_s18 = smov 128   ;;  %s9315_s19 = smov 8  }
  0x2a   : > { %s9366_s3 = sld [smem:[#allocation52_spill]]  ;;  %s7811_s29 = scalar_lea.vmem %s8254_s30, 8192 }
  0x2b   : > { %p7812_p2 = scmp.ne.s32.totalorder %s8254_s30, %s7811_s29  ;;  %p7819_p9 = scmp.lt.s32.totalorder %s8254_s30, %s8254_s30 }
  0x2c   : > { %p7820_p10 = scmp.lt.s32.totalorder %s7811_s29, %s7811_s29 }
  0x2d   : > { %p7814_p5 = pnand %p7812_p2, %p8260_p7 }
  0x2e   : > { %p7821_p11 = por %p7820_p10, %p7819_p9 }
  0x2f   : > { %p7815_p8 = pneg %p7814_p5 }
  0x30   : > { %7006 = dma.hbm_to_vmem [thread:$0]  (!%p8250_p6), %s9366_s3, 16384, %s356_s26, [#allocation7], %s9309_s18, %s9309_s18, %s9315_s19  }
  0x31   : > { %p7822_p12 = pnand %p7821_p11, %p7815_p8 }
  0x33   : > { %7825 = shalt.err (!%p7822_p12)
}
  0x34   : > { %s9311_s14 = smov 64   ;;  %s9313_s17 = smov 4  }
  0x35   : > { %s9367_s8 = sld [smem:[#allocation55_spill]]  ;;  %s7837_s25 = scalar_lea.vmem %s395_s15, 1024 }
  0x36   : > { %p7838_p13 = scmp.ne.s32.totalorder %s395_s15, %s7837_s25  ;;  %p7845_p5 = scmp.lt.s32.totalorder %s395_s15, %s395_s15 }
  0x37   : > { %p7846_p8 = scmp.lt.s32.totalorder %s7837_s25, %s7837_s25 }
  0x38   : > { %p7840_p0 = pnand %p7838_p13, %p8260_p7 }
  0x39   : > { %p7847_p9 = por %p7846_p8, %p7845_p5 }
  0x3a   : > { %p7841_p2 = pneg %p7840_p0 }
  0x3b   : > { %7012 = dma.hbm_to_vmem [thread:$0]  (!%p8250_p6), %s9367_s8, 8192, %s8254_s30, [#allocation13], %s9311_s14, %s9311_s14, %s9313_s17  }
  0x3c   : > { %p7848_p10 = pnand %p7847_p9, %p7841_p2 }
  0x3e   : > { %7851 = shalt.err (!%p7848_p10)
}
  0x3f   : > { %s9368_s9 = sld [smem:[#allocation56_spill]]  ;;  %s8301_s30 = sadd.s32 1, %s8126_s24  }
  0x40   : > { %9369 = sst [smem:[#allocation29_spill]] %s8301_s30  ;;  %s142_s18 = ssub.s32 %s8126_s24, %s8301_s30 }
  0x41   : > { %s145_s26 = sadd.s32 1, %s8122_s23  ;;  %p143_p11 = scmp.eq.s32.totalorder %s142_s18, 0 }
  0x42   : > { %p152_p12 = scmp.ne.s32.totalorder %s8122_s23, %s8118_s22  ;;  %p153_p13 = scmp.eq.s32.totalorder %s8126_s24, 0 }
  0x43   : > { %p158_p0 = scmp.ne.s32.totalorder %s8118_s22, %s8114_s21  ;;  %p7039_p8 = scmp.lt.s32.totalorder %s8126_s24, 4 }
  0x44   : > { %s8312_s20 = scalar_select %p143_p11, %s8122_s23, %s145_s26  }
  0x45   : > { %7015 = dma.hbm_to_vmem [thread:$0]  (!%p8250_p6), %s9368_s9, 1024, %s395_s15, [#allocation16], %s9311_s14, %s9311_s14, %s9313_s17  }
  0x46   : > { %9370 = sst [smem:[#allocation30_spill]] %s8312_s20  ;;  %p154_p2 = por %p153_p13, %p152_p12 }
  0x47   : > { %p8316_p5 = por %p9321_p1, %p158_p0  ;;  %s9320_s15 = sand.u32 1, %s8126_s24  }
  0x48   : > { %s9317_s29 = sand.u32 1, %s8122_s23   ;;  %s6841_s18 = sshll.u32 %s8126_s24, 7 }
  0x49   : > { %s9371_s25 = scalar_select %p8316_p5, 1, 0 }
  0x4a   : > { %s8325_s14 = sshll.u32 %s9317_s29, 10  ;;  %s9372_s5 = sld [smem:[#allocation54_spill]] }
  0x4b   : > { %s438_s26 = scalar_lea.vmem [#allocation9], %s8325_s14  ;;  %p8334_p9 = pnand %p7039_p8, %p154_p2 }
  0x4c   : > { %s445_s3 = sshll.u32 %s438_s26, 4  ;;  %s8342_s29 = scalar_lea.sflag [#allocation10], %s9320_s15  ;;  %s8338_s3 = int_to_ptr.vmem [resolvable:$true] %s445_s3 }
  0x4d   : > { %s9373_s8 = scalar_select %p8334_p9, 1, 0 }
  0x4e   : > { %p8348_p11 = pneg %p8334_p9 }
  0x50   : > { %s8331_s21 = scalar_lea.hbm %s9372_s5, %s6841_s18  ;;  %s7857_s26 = scalar_lea.hbm %s9372_s5, 65536 }
  0x51   : > { %s7852_s9 = scalar_lea.hbm %s8331_s21, 16384  ;;  %p7858_p0 = scmp.lt.s32.totalorder %s8331_s21, %s9372_s5 }
  0x52   : > { %p7853_p10 = scmp.ne.s32.totalorder %s8331_s21, %s7852_s9  ;;  %p7859_p2 = scmp.lt.s32.totalorder %s7857_s26, %s7852_s9 }
  0x53   : > { %s9374_s19 = scalar_select %p8348_p11, 1, 0 }
  0x54   : > { %p7855_p12 = pnand %p8348_p11, %p7853_p10  ;;  %p7860_p8 = por %p7859_p2, %p7858_p0 }
  0x56   : > { %p7856_p13 = pneg %p7855_p12 }
  0x58   : > { %p7861_p3 = pnand %p7860_p8, %p7856_p13 }
  0x5a   : > { %7864 = shalt.err (!%p7861_p3)
}
  0x5b   : > { %s7865_s15 = scalar_lea.vmem %s8338_s3, 16384  ;;  %s8135_s12 = smov [#allocation9]  }
  0x5c   : > { %p7866_p1 = scmp.ne.s32.totalorder %s8338_s3, %s7865_s15  ;;  %s7870_s17 = sshll.u32 %s8135_s12, 4  ;;  %s7871_s17 = int_to_ptr.vmem [resolvable:$false] %s7870_s17 }
  0x5d   : > { %s7872_s18 = scalar_lea.vmem %s7871_s17, 32768  ;;  %p7873_p5 = scmp.lt.s32.totalorder %s8338_s3, %s7871_s17 }
  0x5e   : > { %p7868_p10 = pnand %p7866_p1, %p8348_p11  ;;  %p7874_p4 = scmp.lt.s32.totalorder %s7872_s18, %s7865_s15 }
  0x60   : > { %p7869_p12 = pneg %p7868_p10  ;;  %p7875_p6 = por %p7874_p4, %p7873_p5 }
  0x62   : > { %p7876_p7 = pnand %p7875_p6, %p7869_p12 }
  0x64   : > { %7879 = shalt.err (!%p7876_p7)
}
  0x65   : > { %s9333_s9 = smov 512   ;;  %s9375_s30 = smov 8  }
  0x66   : > { %s9376_s20 = smov 128   ;;  %s8137_s26 = smov [#allocation3]  }
  0x67   : > { %7025 = dma.hbm_to_vmem [thread:$0]  (!%p8334_p9), %s8331_s21, 16384, %s8338_s3, %s8342_s29, %s9333_s9, %s9376_s20, %s9375_s30  }
  0x68   : > { %s339_s12 = sshll.u32 %s8137_s26, 4  ;;  %s8138_s5 = smov [#allocation8]   ;;  %s340_s12 = int_to_ptr.vmem [resolvable:$true] %s339_s12 }
  0x69   : > { %s368_s17 = sshll.u32 %s8138_s5, 4  ;;  %s7891_s15 = scalar_lea.vmem %s340_s12, 1024  ;;  %s369_s17 = int_to_ptr.vmem [resolvable:$true] %s368_s17 }
  0x6a   : > { %p7892_p1 = scmp.ne.s32.totalorder %s340_s12, %s7891_s15  ;;  %p9377_p3 = scmp.ne.s32.totalorder %s9365_s16, 0 }
  0x6b   : > { %p7899_p7 = scmp.lt.s32.totalorder %s340_s12, %s340_s12  ;;  %p7900_p5 = scmp.lt.s32.totalorder %s7891_s15, %s7891_s15 }
  0x6c   : > { %p7894_p4 = pnand %p7892_p1, %p9377_p3 }
  0x6d   : > { %p7901_p13 = por %p7900_p5, %p7899_p7 }
  0x6e   : > { %p7895_p6 = pneg %p7894_p4 }
  0x70   : > { %p7902_p0 = pnand %p7901_p13, %p7895_p6 }
  0x72   : > { %7905 = shalt.err (!%p7902_p0)
}
  0x73   : > { %p9378_p2 = scmp.ne.s32.totalorder %s9364_s13, 0  ;;  %s9379_s0 = sld [smem:[#allocation50_spill]] }
  0x74   : > { %s7917_s3 = scalar_lea.vmem %s369_s17, 16384  ;;  %p7925_p1 = scmp.lt.s32.totalorder %s369_s17, %s369_s17 }
  0x75   : > { %p7918_p8 = scmp.ne.s32.totalorder %s369_s17, %s7917_s3  ;;  %p7926_p4 = scmp.lt.s32.totalorder %s7917_s3, %s7917_s3 }
  0x77   : > { %p7920_p10 = pnand %p7918_p8, %p9377_p3  ;;  %p7927_p9 = por %p7926_p4, %p7925_p1 }
  0x79   : > { %7003 = dma.hbm_to_vmem [thread:$0]  (!%p9378_p2), %s9379_s0, 1024, %s340_s12, [#allocation4]  }
  0x7a   : > { %p7921_p12 = pneg %p7920_p10 }
  0x7c   : > { %p7928_p11 = pnand %p7927_p9, %p7921_p12 }
  0x7e   : > { %7931 = shalt.err (!%p7928_p11)
}
  0x7f   : > { %s9380_s4 = sld [smem:[#allocation53_spill]]  ;;  %s8139_s21 = smov [#allocation17]  }
  0x80   : > { %s407_s26 = sshll.u32 %s8139_s21, 4  ;;  %s8140_s12 = smov [#allocation18]   ;;  %s408_s26 = int_to_ptr.vmem [resolvable:$true] %s407_s26 }
  0x81   : > { %s420_s15 = sshll.u32 %s8140_s12, 4  ;;  %s7943_s18 = scalar_lea.vmem %s408_s26, 1024  ;;  %s421_s15 = int_to_ptr.vmem [resolvable:$true] %s420_s15 }
  0x82   : > { %p7944_p6 = scmp.ne.s32.totalorder %s408_s26, %s7943_s18  ;;  %p7951_p7 = scmp.lt.s32.totalorder %s408_s26, %s408_s26 }
  0x83   : > { %p7952_p5 = scmp.lt.s32.totalorder %s7943_s18, %s7943_s18 }
  0x84   : > { %p7946_p9 = pnand %p7944_p6, %p9377_p3 }
  0x85   : > { %7009 = dma.hbm_to_vmem [thread:$0]  (!%p9378_p2), %s9380_s4, 16384, %s369_s17, [#allocation7], %s9376_s20, %s9376_s20, %s9375_s30  }
  0x86   : > { %p7947_p11 = pneg %p7946_p9  ;;  %p7953_p13 = por %p7952_p5, %p7951_p7 }
  0x88   : > { %p7954_p0 = pnand %p7953_p13, %p7947_p11 }
  0x8a   : > { %7957 = shalt.err (!%p7954_p0)
}
  0x8b   : > { %s9381_s3 = smov 4   ;;  %s9382_s5 = smov 64  }
  0x8c   : > { %7018 = dma.hbm_to_vmem [thread:$0]  (!%p9378_p2), %s9306_s10, 1024, %s408_s26, [#allocation16], %s9382_s5, %s9382_s5, %s9381_s3  }
  0x8d   : > { %s9383_s17 = sand.u32 1, %s8122_s23   ;;  %s7969_s21 = scalar_lea.vmem %s421_s15, 1024 }
  0x8e   : > { %s6213_s1 = sshll.u32 %s9383_s17, 1  ;;  %p7970_p8 = scmp.ne.s32.totalorder %s421_s15, %s7969_s21 }
  0x8f   : > { %p7977_p1 = scmp.lt.s32.totalorder %s421_s15, %s421_s15  ;;  %p7978_p4 = scmp.lt.s32.totalorder %s7969_s21, %s7969_s21 }
  0x90   : > { %p7972_p10 = pnand %p7970_p8, %p9377_p3 }
  0x91   : > { %p7979_p6 = por %p7978_p4, %p7977_p1 }
  0x92   : > { %p7973_p12 = pneg %p7972_p10 }
  0x94   : > { %p7980_p9 = pnand %p7979_p6, %p7973_p12 }
  0x96   : > { %7983 = shalt.err (!%p7980_p9)
}
  0x97   : > { %7021 = dma.hbm_to_vmem [thread:$0]  (!%p9378_p2), %s9307_s11, 1024, %s421_s15, [#allocation19], %s9382_s5, %s9382_s5, %s9381_s3  }
  0x98   : > { %s6842_s18 = sshll.u32 %s8126_s24, 5  ;;  %s459_s17 = scalar_lea.vmem [#allocation11], %s6213_s1 }
  0x99   : > { %s465_s20 = scalar_lea.hbm %s9302_s6, %s6842_s18  ;;  %s467_s21 = sshll.u32 %s459_s17, 4  ;;  %s468_s21 = int_to_ptr.vmem [resolvable:$true] %s467_s21 }
  0x9a   : > { %s7984_s9 = scalar_lea.hbm %s465_s20, 32  ;;  %p9384_p11 = scmp.ne.s32.totalorder %s9374_s19, 0 }
  0x9b   : > { %p7985_p3 = scmp.ne.s32.totalorder %s465_s20, %s7984_s9  ;;  %s7989_s12 = scalar_lea.hbm %s9302_s6, 128 }
  0x9c   : > { %p7990_p2 = scmp.lt.s32.totalorder %s465_s20, %s9302_s6  ;;  %p7991_p13 = scmp.lt.s32.totalorder %s7989_s12, %s7984_s9 }
  0x9d   : > { %p7987_p7 = pnand %p7985_p3, %p9384_p11 }
  0x9e   : > { %p7992_p0 = por %p7991_p13, %p7990_p2 }
  0x9f   : > { %p7988_p5 = pneg %p7987_p7 }
  0xa1   : > { %p7993_p8 = pnand %p7992_p0, %p7988_p5 }
  0xa3   : > { %7996 = shalt.err (!%p7993_p8)
}
  0xa4   : > { %s7997_s15 = scalar_lea.vmem %s468_s21, 32  ;;  %s8141_s3 = smov [#allocation11]  }
  0xa5   : > { %p7998_p10 = scmp.ne.s32.totalorder %s468_s21, %s7997_s15  ;;  %s8002_s5 = sshll.u32 %s8141_s3, 4  ;;  %s8003_s5 = int_to_ptr.vmem [resolvable:$false] %s8002_s5 }
  0xa6   : > { %s8004_s1 = scalar_lea.vmem %s8003_s5, 64  ;;  %p8005_p4 = scmp.lt.s32.totalorder %s468_s21, %s8003_s5 }
  0xa7   : > { %p8000_p12 = pnand %p7998_p10, %p9384_p11  ;;  %p8006_p6 = scmp.lt.s32.totalorder %s8004_s1, %s7997_s15 }
  0xa9   : > { %p8001_p1 = pneg %p8000_p12  ;;  %p8007_p9 = por %p8006_p6, %p8005_p4 }
  0xab   : > { %p8008_p3 = pnand %p8007_p9, %p8001_p1 }
  0xad   : > { %8011 = shalt.err (!%p8008_p3)
}
  0xae   : > { %p9385_p7 = scmp.ne.s32.totalorder %s9373_s8, 0  ;;  %s6844_s0 = sshll.u32 %s8126_s24, 14 }
  0xaf   : > { %s8434_s18 = scalar_lea.hbm %s9303_s7, %s6844_s0  ;;  %s478_s16 = scalar_lea.vmem [#allocation12], %s8325_s14 }
  0xb0   : > { %7028 = dma.hbm_to_vmem [thread:$0]  (!%p9385_p7), %s465_s20, 32, %s468_s21, %s8342_s29  }
  0xb1   : > { %s486_s30 = sshll.u32 %s478_s16, 4  ;;  %s9386_s17 = sand.u32 1, %s8126_s24   ;;  %s8437_s30 = int_to_ptr.vmem [resolvable:$true] %s486_s30 }
  0xb2   : > { %s8441_s13 = scalar_lea.sflag [#allocation13], %s9386_s17  ;;  %s8012_s12 = scalar_lea.hbm %s8434_s18, 16384 }
  0xb3   : > { %p8013_p5 = scmp.ne.s32.totalorder %s8434_s18, %s8012_s12  ;;  %s8017_s21 = scalar_lea.hbm %s9303_s7, 65536 }
  0xb4   : > { %p8018_p0 = scmp.lt.s32.totalorder %s8434_s18, %s9303_s7  ;;  %p8019_p8 = scmp.lt.s32.totalorder %s8017_s21, %s8012_s12 }
  0xb5   : > { %p8015_p2 = pnand %p8013_p5, %p9384_p11 }
  0xb6   : > { %p8020_p10 = por %p8019_p8, %p8018_p0 }
  0xb7   : > { %p8016_p13 = pneg %p8015_p2 }
  0xb9   : > { %p8021_p12 = pnand %p8020_p10, %p8016_p13 }
  0xbb   : > { %8024 = shalt.err (!%p8021_p12)
}
  0xbc   : > { %s8025_s24 = scalar_lea.vmem %s8437_s30, 16384  ;;  %s8142_s14 = smov [#allocation12]  }
  0xbd   : > { %p8026_p1 = scmp.ne.s32.totalorder %s8437_s30, %s8025_s24  ;;  %s8030_s3 = sshll.u32 %s8142_s14, 4  ;;  %s8031_s3 = int_to_ptr.vmem [resolvable:$false] %s8030_s3 }
  0xbe   : > { %s8032_s5 = scalar_lea.vmem %s8031_s3, 32768  ;;  %p8033_p9 = scmp.lt.s32.totalorder %s8437_s30, %s8031_s3 }
  0xbf   : > { %p8028_p4 = pnand %p8026_p1, %p9384_p11  ;;  %p8034_p3 = scmp.lt.s32.totalorder %s8032_s5, %s8025_s24 }
  0xc1   : > { %p8029_p6 = pneg %p8028_p4  ;;  %p8035_p5 = por %p8034_p3, %p8033_p9 }
  0xc3   : > { %p8036_p2 = pnand %p8035_p5, %p8029_p6 }
  0xc5   : > { %8039 = shalt.err (!%p8036_p2)
}
  0xc6   : > { %s8143_s1 = smov 32   ;;  %s9387_s0 = smov 512  }
  0xc7   : > { %7031 = dma.hbm_to_vmem [thread:$0]  (!%p9385_p7), %s8434_s18, 16384, %s8437_s30, %s8441_s13, %s9387_s0, %s9387_s0, %s8143_s1  }
  0xc8   : > { %p9388_p11 = scmp.ne.s32.totalorder %s9363_s28, 0 }
  0xca   : > { %498 = sbr.rel (%p9388_p11) target bundleno = 2677 (0xa75), region = 68 }
  0xcf   : > { %p9389_p13 = scmp.eq.s32.totalorder %s8236_s27, 0 }
  0xd1   : > { %8081 = dma.done.wait (%p9389_p13), [#allocation4], 1024   ;;  %p9390_p0 = pmov %p9389_p13 }
  0xd3   : > { %8083 = vsyncadd (%p9390_p0), [#allocation4], 4294966272  ;;  %p9391_p8 = pmov %p9390_p0 }
  0xd4   : > { %p9392_p10 = pmov %p9390_p0 }
  0xd5   : > { %8085 = dma.done.wait (%p9391_p8), [#allocation7], 32768  }
  0xd6   : > { %8087 = vsyncadd (%p9392_p10), [#allocation7], 4294934528  ;;  %s512_s8 = sand.u32 1, %s8236_s27   ;;  %s514_s19 = sand.u32 1, %s8118_s22  }
  0xd7   : > { %s6224_s4 = sshll.u32 %s514_s19, 10  ;;  %s513_s28 = scalar_lea.sflag [#allocation10], %s512_s8 }
  0xd8   : > { %s8478_s9 = scalar_lea.vmem [#allocation9], %s6224_s4  ;;  %p9393_p7 = scmp.ne.s32.totalorder %s9371_s25, 0 }
  0xda   : > { %8089 = dma.done.wait (%p9393_p7), %s513_s28, 16416  }
  0xdb   : > { %8091 = vsyncadd (%p9393_p7), %s513_s28, 4294950880  ;;  %s8484_s18 = sshll.u32 %s514_s19, 1  ;;  %s531_s30 = scalar_lea.sflag [#allocation13], %s512_s8 }
  0xdc   : > { %s525_s16 = scalar_lea.vmem [#allocation11], %s8484_s18  ;;  %s8487_s17 = scalar_lea.vmem [#allocation12], %s6224_s4 }
  0xdd   : > { %8093 = dma.done.wait (%p9393_p7), %s531_s30, 16384  }
  0xde   : > { %8095 = vsyncadd (%p9393_p7), %s531_s30, 4294950912  ;;  %p9394_p12 = pmov %p9390_p0 }
  0xdf   : > { %p9395_p1 = pmov %p9390_p0 }
  0xe0   : > { %8097 = dma.done.wait (%p9394_p12), [#allocation13], 8192  }
  0xe1   : > { %8099 = vsyncadd (%p9395_p1), [#allocation13], 4294959104  ;;  %p9396_p4 = pmov %p9390_p0 }
  0xe2   : > { %p9397_p6 = pmov %p9390_p0 }
  0xe3   : > { %8101 = dma.done.wait (%p9396_p4), [#allocation16], 2048  }
  0xe4   : > { %8103 = vsyncadd (%p9397_p6), [#allocation16], 4294965248  ;;  %p9398_p9 = pmov %p9390_p0 }
  0xe5   : > { %p9399_p3 = pmov %p9390_p0 }
  0xe6   : > { %8105 = dma.done.wait (%p9398_p9), [#allocation19], 1024  }
  0xe7   : > { %8107 = vsyncadd (%p9399_p3), [#allocation19], 4294966272  ;;  %v8505_v0 = vld [vmem:[#allocation3] sm:$0xff]  ;;  %v8507_v1 = vld [vmem:[#allocation3 + $0x8] sm:$0xff]  ;;  %p9404_p5 = scmp.ne.s32.totalorder %s8236_s27, 0 }
  0xe8   : > { %v8509_v2 = vld [vmem:[#allocation3 + $0x10] sm:$0xff]  ;;  %v8511_v3 = vld [vmem:[#allocation3 + $0x18] sm:$0xff]  ;;  %v8513_v4 = vld [vmem:[#allocation3 + $0x20] sm:$0xff]  ;;  %v8519_v6 = vpack.c.bf16 %v8505_v0, %v8505_v0  ;;  %v8523_v7 = vpack.c.bf16 %v8507_v1, %v8507_v1 }
  0xe9   : > { %v8515_v5 = vld [vmem:[#allocation3 + $0x28] sm:$0xff]  ;;  %v8527_v8 = vpack.c.bf16 %v8509_v2, %v8509_v2  ;;  %v8529_v9 = vld [vmem:[#allocation3 + $0x30] sm:$0xff]  ;;  %v8531_v10 = vld [vmem:[#allocation3 + $0x38] sm:$0xff]  ;;  %v8535_v11 = vpack.c.bf16 %v8511_v3, %v8511_v3  ;;  %v8539_v12 = vpack.c.bf16 %v8513_v4, %v8513_v4  ;;  %619 = sbr.rel (%p9404_p5) target bundleno = 1872 (0x750), region = 112 }
  0xea   : > { %9400 = vst [vmem:[#allocation31_spill] sm:$0xff] %v8519_v6  ;;  %9401 = vst [vmem:[#allocation32_spill] sm:$0xff] %v8523_v7  ;;  %v8543_v13 = vpack.c.bf16 %v8515_v5, %v8515_v5  ;;  %v8547_v14 = vpack.c.bf16 %v8529_v9, %v8529_v9  ;;  %v8551_v15 = vpack.c.bf16 %v8531_v10, %v8531_v10 }
  0xeb   : > { %9402 = vst [vmem:[#allocation33_spill] sm:$0xff] %v8539_v12 }
  0xec   : > { %9403 = vst [vmem:[#allocation34_spill] sm:$0xff] %v8543_v13 }
  0xee   : > { %v7100_v16 = vld [vmem:[#allocation6 + $0x74] ss:$8 sps:$4 sm:$0xff]   ;;  %1432 = vmatprep.mubr.bf16.mxu0 %v8523_v7  ;;  %1473 = vmatprep.mubr.bf16.mxu1 %v8535_v11  ;;  %v7104_v18 = vld [vmem:[#allocation6 + $0x70] ss:$8 sps:$4 sm:$0xff]   ;;  %v7106_v20 = vld [vmem:[#allocation6 + $0x64] ss:$8 sps:$4 sm:$0xff]  }
  0xef   : > { %v7102_v17 = vld [vmem:[#allocation6 + $0x174] ss:$8 sps:$4 sm:$0xff]   ;;  %1400 = vmatprep.subr.bf16.mxu0 %v7100_v16  ;;  %v7105_v19 = vld [vmem:[#allocation6 + $0x170] ss:$8 sps:$4 sm:$0xff]   ;;  %v7108_v21 = vld [vmem:[#allocation6 + $0x164] ss:$8 sps:$4 sm:$0xff]  }
  0xf0   : > { %1441 = vmatprep.subr.bf16.mxu1 %v7102_v17  ;;  %1401 = vmatpush1.bf16.msra.mxu0 %v7104_v18  ;;  %v7110_v22 = vld [vmem:[#allocation6 + $0x60] ss:$8 sps:$4 sm:$0xff]   ;;  %v7112_v24 = vld [vmem:[#allocation6 + $0x54] ss:$8 sps:$4 sm:$0xff]   ;;  %v7116_v26 = vld [vmem:[#allocation6 + $0x50] ss:$8 sps:$4 sm:$0xff]  }
  0xf1   : > { %1442 = vmatpush1.bf16.msra.mxu1 %v7105_v19  ;;  %1402 = vmatprep.subr.bf16.mxu0 %v7106_v20  ;;  %v7111_v23 = vld [vmem:[#allocation6 + $0x160] ss:$8 sps:$4 sm:$0xff]   ;;  %v7114_v25 = vld [vmem:[#allocation6 + $0x154] ss:$8 sps:$4 sm:$0xff]   ;;  %v7117_v27 = vld [vmem:[#allocation6 + $0x150] ss:$8 sps:$4 sm:$0xff]  }
  0xf2   : > { %1443 = vmatprep.subr.bf16.mxu1 %v7108_v21  ;;  %v7118_v28 = vld [vmem:[#allocation6 + $0x44] ss:$8 sps:$4 sm:$0xff]   ;;  %v7122_v30 = vld [vmem:[#allocation6 + $0x40] ss:$8 sps:$4 sm:$0xff]   ;;  %v7124_v32 = vld [vmem:[#allocation6 + $0x34] ss:$8 sps:$4 sm:$0xff]  }
  0xf3   : > { %v7120_v29 = vld [vmem:[#allocation6 + $0x144] ss:$8 sps:$4 sm:$0xff]   ;;  %v7123_v31 = vld [vmem:[#allocation6 + $0x140] ss:$8 sps:$4 sm:$0xff]   ;;  %v7126_v33 = vld [vmem:[#allocation6 + $0x134] ss:$8 sps:$4 sm:$0xff]  }
  0xf4   : > { %1403 = vmatpush1.bf16.msra.mxu0 %v7110_v22  ;;  %v7128_v34 = vld [vmem:[#allocation6 + $0x30] ss:$8 sps:$4 sm:$0xff]   ;;  %v7130_v36 = vld [vmem:[#allocation6 + $0x24] ss:$8 sps:$4 sm:$0xff]   ;;  %v7134_v38 = vld [vmem:[#allocation6 + $0x20] ss:$8 sps:$4 sm:$0xff]  }
  0xf5   : > { %1444 = vmatpush1.bf16.msra.mxu1 %v7111_v23  ;;  %1404 = vmatprep.subr.bf16.mxu0 %v7112_v24  ;;  %v7129_v35 = vld [vmem:[#allocation6 + $0x130] ss:$8 sps:$4 sm:$0xff]   ;;  %v7132_v37 = vld [vmem:[#allocation6 + $0x124] ss:$8 sps:$4 sm:$0xff]   ;;  %v7135_v39 = vld [vmem:[#allocation6 + $0x120] ss:$8 sps:$4 sm:$0xff]  }
  0xf6   : > { %1445 = vmatprep.subr.bf16.mxu1 %v7114_v25  ;;  %v7136_v40 = vld [vmem:[#allocation6 + $0x14] ss:$8 sps:$4 sm:$0xff]   ;;  %v7140_v42 = vld [vmem:[#allocation6 + $0x10] ss:$8 sps:$4 sm:$0xff]   ;;  %v7142_v44 = vld [vmem:[#allocation6 + $0x4] ss:$8 sps:$4 sm:$0xff]  }
  0xf7   : > { %v7138_v41 = vld [vmem:[#allocation6 + $0x114] ss:$8 sps:$4 sm:$0xff]   ;;  %v7141_v43 = vld [vmem:[#allocation6 + $0x110] ss:$8 sps:$4 sm:$0xff]   ;;  %v7144_v45 = vld [vmem:[#allocation6 + $0x104] ss:$8 sps:$4 sm:$0xff]  }
  0xf8   : > { %1405 = vmatpush1.bf16.msra.mxu0 %v7116_v26  ;;  %v7146_v46 = vld [vmem:[#allocation6] ss:$8 sps:$4 sm:$0xff]   ;;  %v7148_v48 = vld [vmem:[#allocation6 + $0xf4] ss:$8 sps:$4 sm:$0xff]   ;;  %v7152_v50 = vld [vmem:[#allocation6 + $0xf0] ss:$8 sps:$4 sm:$0xff]  }
  0xf9   : > { %1446 = vmatpush1.bf16.msra.mxu1 %v7117_v27  ;;  %1406 = vmatprep.subr.bf16.mxu0 %v7118_v28  ;;  %v7147_v47 = vld [vmem:[#allocation6 + $0x100] ss:$8 sps:$4 sm:$0xff]   ;;  %v7150_v49 = vld [vmem:[#allocation6 + $0x1f4] ss:$8 sps:$4 sm:$0xff]   ;;  %v7153_v51 = vld [vmem:[#allocation6 + $0x1f0] ss:$8 sps:$4 sm:$0xff]  }
  0xfa   : > { %1447 = vmatprep.subr.bf16.mxu1 %v7120_v29  ;;  %v7154_v52 = vld [vmem:[#allocation6 + $0xe4] ss:$8 sps:$4 sm:$0xff]   ;;  %v7158_v54 = vld [vmem:[#allocation6 + $0xe0] ss:$8 sps:$4 sm:$0xff]   ;;  %v7160_v56 = vld [vmem:[#allocation6 + $0xd4] ss:$8 sps:$4 sm:$0xff]  }
  0xfb   : > { %v7156_v53 = vld [vmem:[#allocation6 + $0x1e4] ss:$8 sps:$4 sm:$0xff]   ;;  %v7159_v55 = vld [vmem:[#allocation6 + $0x1e0] ss:$8 sps:$4 sm:$0xff]   ;;  %v7162_v57 = vld [vmem:[#allocation6 + $0x1d4] ss:$8 sps:$4 sm:$0xff]  }
  0xfc   : > { %1407 = vmatpush1.bf16.msra.mxu0 %v7122_v30  ;;  %v7164_v58 = vld [vmem:[#allocation6 + $0xd0] ss:$8 sps:$4 sm:$0xff]   ;;  %v7166_v60 = vld [vmem:[#allocation6 + $0xc4] ss:$8 sps:$4 sm:$0xff]   ;;  %v7170_v62 = vld [vmem:[#allocation6 + $0xc0] ss:$8 sps:$4 sm:$0xff]  }
  0xfd   : > { %1448 = vmatpush1.bf16.msra.mxu1 %v7123_v31  ;;  %1408 = vmatprep.subr.bf16.mxu0 %v7124_v32  ;;  %v7165_v59 = vld [vmem:[#allocation6 + $0x1d0] ss:$8 sps:$4 sm:$0xff]   ;;  %v7168_v61 = vld [vmem:[#allocation6 + $0x1c4] ss:$8 sps:$4 sm:$0xff]   ;;  %v7171_v63 = vld [vmem:[#allocation6 + $0x1c0] ss:$8 sps:$4 sm:$0xff]  }
  0xfe   : > { %1449 = vmatprep.subr.bf16.mxu1 %v7126_v33  ;;  %v7172_v16 = vld [vmem:[#allocation6 + $0xb4] ss:$8 sps:$4 sm:$0xff]   ;;  %v7176_v18 = vld [vmem:[#allocation6 + $0xb0] ss:$8 sps:$4 sm:$0xff]   ;;  %v7178_v20 = vld [vmem:[#allocation6 + $0xa4] ss:$8 sps:$4 sm:$0xff]  }
  0xff   : > { %v7174_v17 = vld [vmem:[#allocation6 + $0x1b4] ss:$8 sps:$4 sm:$0xff]   ;;  %v7177_v19 = vld [vmem:[#allocation6 + $0x1b0] ss:$8 sps:$4 sm:$0xff]   ;;  %v7180_v21 = vld [vmem:[#allocation6 + $0x1a4] ss:$8 sps:$4 sm:$0xff]  }
 0x100   : > { %1409 = vmatpush1.bf16.msra.mxu0 %v7128_v34  ;;  %v7182_v22 = vld [vmem:[#allocation6 + $0xa0] ss:$8 sps:$4 sm:$0xff]   ;;  %v7184_v24 = vld [vmem:[#allocation6 + $0x94] ss:$8 sps:$4 sm:$0xff]   ;;  %v7188_v26 = vld [vmem:[#allocation6 + $0x90] ss:$8 sps:$4 sm:$0xff]  }
 0x101   : > { %1450 = vmatpush1.bf16.msra.mxu1 %v7129_v35  ;;  %1410 = vmatprep.subr.bf16.mxu0 %v7130_v36  ;;  %v7183_v23 = vld [vmem:[#allocation6 + $0x1a0] ss:$8 sps:$4 sm:$0xff]   ;;  %v7186_v25 = vld [vmem:[#allocation6 + $0x194] ss:$8 sps:$4 sm:$0xff]   ;;  %v7189_v27 = vld [vmem:[#allocation6 + $0x190] ss:$8 sps:$4 sm:$0xff]  }
 0x102   : > { %1451 = vmatprep.subr.bf16.mxu1 %v7132_v37  ;;  %v7190_v28 = vld [vmem:[#allocation6 + $0x84] ss:$8 sps:$4 sm:$0xff]   ;;  %v7194_v30 = vld [vmem:[#allocation6 + $0x80] ss:$8 sps:$4 sm:$0xff]   ;;  %v7198_v32 = vld [vmem:[#allocation6 + $0x274] ss:$8 sps:$4 sm:$0xff]  }
 0x103   : > { %v7192_v29 = vld [vmem:[#allocation6 + $0x184] ss:$8 sps:$4 sm:$0xff]   ;;  %v7195_v31 = vld [vmem:[#allocation6 + $0x180] ss:$8 sps:$4 sm:$0xff]   ;;  %v7201_v33 = vld [vmem:[#allocation6 + $0x374] ss:$8 sps:$4 sm:$0xff]  }
 0x104   : > { %1411 = vmatpush1.bf16.msra.mxu0 %v7134_v38  ;;  %v7196_v34 = vld [vmem:[#allocation6 + $0x270] ss:$8 sps:$4 sm:$0xff]   ;;  %v7204_v36 = vld [vmem:[#allocation6 + $0x264] ss:$8 sps:$4 sm:$0xff]   ;;  %v7202_v38 = vld [vmem:[#allocation6 + $0x260] ss:$8 sps:$4 sm:$0xff]  }
 0x105   : > { %1452 = vmatpush1.bf16.msra.mxu1 %v7135_v39  ;;  %1412 = vmatprep.subr.bf16.mxu0 %v7136_v40  ;;  %v7199_v35 = vld [vmem:[#allocation6 + $0x370] ss:$8 sps:$4 sm:$0xff]   ;;  %v7207_v37 = vld [vmem:[#allocation6 + $0x364] ss:$8 sps:$4 sm:$0xff]   ;;  %v7205_v39 = vld [vmem:[#allocation6 + $0x360] ss:$8 sps:$4 sm:$0xff]  }
 0x106   : > { %1453 = vmatprep.subr.bf16.mxu1 %v7138_v41  ;;  %v7210_v40 = vld [vmem:[#allocation6 + $0x254] ss:$8 sps:$4 sm:$0xff]   ;;  %s9405_s26 = sld [smem:[#allocation51_spill]]  ;;  %vm2579_vm0 = vcmask 64512   ;;  %vm8147_vm1 = vmmov 0  }
 0x107   : > { %v7213_v41 = vld [vmem:[#allocation6 + $0x354] ss:$8 sps:$4 sm:$0xff]  }
 0x108   : > { %1413 = vmatpush1.bf16.msra.mxu0 %v7140_v42  ;;  %v7208_v42 = vld [vmem:[#allocation6 + $0x250] ss:$8 sps:$4 sm:$0xff]  }
 0x109   : > { %1454 = vmatpush1.bf16.msra.mxu1 %v7141_v43  ;;  %1414 = vmatprep.subr.bf16.mxu0 %v7142_v44  ;;  %v7211_v43 = vld [vmem:[#allocation6 + $0x350] ss:$8 sps:$4 sm:$0xff]   ;;  %v7216_v44 = vld [vmem:[#allocation6 + $0x244] ss:$8 sps:$4 sm:$0xff]  }
 0x10a   : > { %1455 = vmatprep.subr.bf16.mxu1 %v7144_v45  ;;  %v7219_v45 = vld [vmem:[#allocation6 + $0x344] ss:$8 sps:$4 sm:$0xff]  }
 0x10c   : > { %1415 = vmatpush1.bf16.msra.mxu0 %v7146_v46  ;;  %v7214_v46 = vld [vmem:[#allocation6 + $0x240] ss:$8 sps:$4 sm:$0xff]  }
 0x10d   : > { %1456 = vmatpush1.bf16.msra.mxu1 %v7147_v47  ;;  %1416 = vmatprep.subr.bf16.mxu0 %v7148_v48  ;;  %v7217_v47 = vld [vmem:[#allocation6 + $0x340] ss:$8 sps:$4 sm:$0xff]   ;;  %v7222_v48 = vld [vmem:[#allocation6 + $0x234] ss:$8 sps:$4 sm:$0xff]  }
 0x10e   : > { %1457 = vmatprep.subr.bf16.mxu1 %v7150_v49  ;;  %v7225_v49 = vld [vmem:[#allocation6 + $0x334] ss:$8 sps:$4 sm:$0xff]  }
 0x110   : > { %1417 = vmatpush2.bf16.msra.mxu0 %v7152_v50  ;;  %v7220_v50 = vld [vmem:[#allocation6 + $0x230] ss:$8 sps:$4 sm:$0xff]  }
 0x111   : > { %1458 = vmatpush2.bf16.msra.mxu1 %v7153_v51  ;;  %1418 = vmatprep.subr.bf16.mxu0 %v7154_v52  ;;  %v7223_v51 = vld [vmem:[#allocation6 + $0x330] ss:$8 sps:$4 sm:$0xff]   ;;  %v7228_v52 = vld [vmem:[#allocation6 + $0x224] ss:$8 sps:$4 sm:$0xff]  }
 0x112   : > { %1459 = vmatprep.subr.bf16.mxu1 %v7156_v53  ;;  %v7231_v53 = vld [vmem:[#allocation6 + $0x324] ss:$8 sps:$4 sm:$0xff]  }
 0x114   : > { %1419 = vmatpush2.bf16.msra.mxu0 %v7158_v54  ;;  %v7226_v54 = vld [vmem:[#allocation6 + $0x220] ss:$8 sps:$4 sm:$0xff]  }
 0x115   : > { %1460 = vmatpush2.bf16.msra.mxu1 %v7159_v55  ;;  %1420 = vmatprep.subr.bf16.mxu0 %v7160_v56  ;;  %v7229_v55 = vld [vmem:[#allocation6 + $0x320] ss:$8 sps:$4 sm:$0xff]   ;;  %v7234_v56 = vld [vmem:[#allocation6 + $0x214] ss:$8 sps:$4 sm:$0xff]  }
 0x116   : > { %1461 = vmatprep.subr.bf16.mxu1 %v7162_v57  ;;  %v7237_v57 = vld [vmem:[#allocation6 + $0x314] ss:$8 sps:$4 sm:$0xff]  }
 0x118   : > { %1421 = vmatpush2.bf16.msra.mxu0 %v7164_v58  ;;  %v7232_v58 = vld [vmem:[#allocation6 + $0x210] ss:$8 sps:$4 sm:$0xff]  }
 0x119   : > { %1462 = vmatpush2.bf16.msra.mxu1 %v7165_v59  ;;  %1422 = vmatprep.subr.bf16.mxu0 %v7166_v60  ;;  %v7235_v59 = vld [vmem:[#allocation6 + $0x310] ss:$8 sps:$4 sm:$0xff]   ;;  %v7240_v60 = vld [vmem:[#allocation6 + $0x204] ss:$8 sps:$4 sm:$0xff]  }
 0x11a   : > { %1463 = vmatprep.subr.bf16.mxu1 %v7168_v61  ;;  %v7243_v61 = vld [vmem:[#allocation6 + $0x304] ss:$8 sps:$4 sm:$0xff]  }
 0x11c   : > { %1423 = vmatpush2.bf16.msra.mxu0 %v7170_v62  ;;  %v7238_v62 = vld [vmem:[#allocation6 + $0x200] ss:$8 sps:$4 sm:$0xff]  }
 0x11d   : > { %1464 = vmatpush2.bf16.msra.mxu1 %v7171_v63  ;;  %1424 = vmatprep.subr.bf16.mxu0 %v7172_v16  ;;  %v7241_v63 = vld [vmem:[#allocation6 + $0x300] ss:$8 sps:$4 sm:$0xff]   ;;  %v7246_v16 = vld [vmem:[#allocation6 + $0x2f4] ss:$8 sps:$4 sm:$0xff]  }
 0x11e   : > { %1465 = vmatprep.subr.bf16.mxu1 %v7174_v17  ;;  %v7249_v17 = vld [vmem:[#allocation6 + $0x3f4] ss:$8 sps:$4 sm:$0xff]  }
 0x120   : > { %1425 = vmatpush2.bf16.msra.mxu0 %v7176_v18  ;;  %v7244_v18 = vld [vmem:[#allocation6 + $0x2f0] ss:$8 sps:$4 sm:$0xff]  }
 0x121   : > { %1466 = vmatpush2.bf16.msra.mxu1 %v7177_v19  ;;  %1426 = vmatprep.subr.bf16.mxu0 %v7178_v20  ;;  %v7247_v19 = vld [vmem:[#allocation6 + $0x3f0] ss:$8 sps:$4 sm:$0xff]   ;;  %v7252_v20 = vld [vmem:[#allocation6 + $0x2e4] ss:$8 sps:$4 sm:$0xff]  }
 0x122   : > { %1467 = vmatprep.subr.bf16.mxu1 %v7180_v21  ;;  %v7255_v21 = vld [vmem:[#allocation6 + $0x3e4] ss:$8 sps:$4 sm:$0xff]  }
 0x124   : > { %1427 = vmatpush2.bf16.msra.mxu0 %v7182_v22  ;;  %v7250_v22 = vld [vmem:[#allocation6 + $0x2e0] ss:$8 sps:$4 sm:$0xff]  }
 0x125   : > { %1468 = vmatpush2.bf16.msra.mxu1 %v7183_v23  ;;  %1428 = vmatprep.subr.bf16.mxu0 %v7184_v24  ;;  %v7253_v23 = vld [vmem:[#allocation6 + $0x3e0] ss:$8 sps:$4 sm:$0xff]   ;;  %v7258_v24 = vld [vmem:[#allocation6 + $0x2d4] ss:$8 sps:$4 sm:$0xff]  }
 0x126   : > { %1469 = vmatprep.subr.bf16.mxu1 %v7186_v25  ;;  %v7261_v25 = vld [vmem:[#allocation6 + $0x3d4] ss:$8 sps:$4 sm:$0xff]  }
 0x128   : > { %1429 = vmatpush2.bf16.msra.mxu0 %v7188_v26  ;;  %v7256_v26 = vld [vmem:[#allocation6 + $0x2d0] ss:$8 sps:$4 sm:$0xff]  }
 0x129   : > { %1470 = vmatpush2.bf16.msra.mxu1 %v7189_v27  ;;  %1430 = vmatprep.subr.bf16.mxu0 %v7190_v28  ;;  %v7259_v27 = vld [vmem:[#allocation6 + $0x3d0] ss:$8 sps:$4 sm:$0xff]   ;;  %v7264_v28 = vld [vmem:[#allocation6 + $0x2c4] ss:$8 sps:$4 sm:$0xff]  }
 0x12a   : > { %1471 = vmatprep.subr.bf16.mxu1 %v7192_v29  ;;  %v7267_v29 = vld [vmem:[#allocation6 + $0x3c4] ss:$8 sps:$4 sm:$0xff]  }
 0x12c   : > { %1431 = vmatpush2.bf16.msra.mxu0 %v7194_v30  ;;  %v7262_v30 = vld [vmem:[#allocation6 + $0x2c0] ss:$8 sps:$4 sm:$0xff]  }
 0x12d   : > { %1472 = vmatpush2.bf16.msra.mxu1 %v7195_v31  ;;  %1482 = vmatprep.subr.bf16.mxu0 %v7198_v32  ;;  %v7265_v31 = vld [vmem:[#allocation6 + $0x3c0] ss:$8 sps:$4 sm:$0xff]   ;;  %v7270_v32 = vld [vmem:[#allocation6 + $0x2b4] ss:$8 sps:$4 sm:$0xff]  }
 0x12e   : > { %1523 = vmatprep.subr.bf16.mxu1 %v7201_v33  ;;  %v7273_v33 = vld [vmem:[#allocation6 + $0x3b4] ss:$8 sps:$4 sm:$0xff]  }
 0x12f   : > { %1433 = vmatmul.mubr.bf16.vlgmr.msra.gmra.mxu0 %v8519_v6 }
 0x130   : > { %1474 = vmatmul.mubr.bf16.vlgmr.msra.gmra.mxu1 %v8527_v8  ;;  %1483 = vmatpush1.bf16.msra.mxu0 %v7196_v34  ;;  %v7268_v34 = vld [vmem:[#allocation6 + $0x2b0] ss:$8 sps:$4 sm:$0xff]  }
 0x131   : > { %1524 = vmatpush1.bf16.msra.mxu1 %v7199_v35  ;;  %1484 = vmatprep.subr.bf16.mxu0 %v7204_v36  ;;  %v7271_v35 = vld [vmem:[#allocation6 + $0x3b0] ss:$8 sps:$4 sm:$0xff]   ;;  %v7276_v36 = vld [vmem:[#allocation6 + $0x2a4] ss:$8 sps:$4 sm:$0xff]  }
 0x132   : > { %1525 = vmatprep.subr.bf16.mxu1 %v7207_v37  ;;  %1514 = vmatprep.mubr.bf16.mxu0 %v8543_v13  ;;  %v7279_v37 = vld [vmem:[#allocation6 + $0x3a4] ss:$8 sps:$4 sm:$0xff]  }
 0x133   : > { %1555 = vmatprep.mubr.bf16.mxu1 %v8551_v15 }
 0x134   : > { %1485 = vmatpush1.bf16.msra.mxu0 %v7202_v38  ;;  %v7274_v38 = vld [vmem:[#allocation6 + $0x2a0] ss:$8 sps:$4 sm:$0xff]  }
 0x135   : > { %1526 = vmatpush1.bf16.msra.mxu1 %v7205_v39  ;;  %1486 = vmatprep.subr.bf16.mxu0 %v7210_v40  ;;  %v7277_v39 = vld [vmem:[#allocation6 + $0x3a0] ss:$8 sps:$4 sm:$0xff]   ;;  %v7282_v40 = vld [vmem:[#allocation6 + $0x294] ss:$8 sps:$4 sm:$0xff]  }
 0x136   : > { %1527 = vmatprep.subr.bf16.mxu1 %v7213_v41  ;;  %v7285_v41 = vld [vmem:[#allocation6 + $0x394] ss:$8 sps:$4 sm:$0xff]  }
 0x138   : > { %1487 = vmatpush1.bf16.msra.mxu0 %v7208_v42  ;;  %v7280_v42 = vld [vmem:[#allocation6 + $0x290] ss:$8 sps:$4 sm:$0xff]  }
 0x139   : > { %1528 = vmatpush1.bf16.msra.mxu1 %v7211_v43  ;;  %1488 = vmatprep.subr.bf16.mxu0 %v7216_v44  ;;  %v7283_v43 = vld [vmem:[#allocation6 + $0x390] ss:$8 sps:$4 sm:$0xff]   ;;  %v7288_v44 = vld [vmem:[#allocation6 + $0x284] ss:$8 sps:$4 sm:$0xff]  }
 0x13a   : > { %1529 = vmatprep.subr.bf16.mxu1 %v7219_v45  ;;  %v7291_v45 = vld [vmem:[#allocation6 + $0x384] ss:$8 sps:$4 sm:$0xff]  }
 0x13c   : > { %1489 = vmatpush1.bf16.msra.mxu0 %v7214_v46  ;;  %v7286_v46 = vld [vmem:[#allocation6 + $0x280] ss:$8 sps:$4 sm:$0xff]  }
 0x13d   : > { %1530 = vmatpush1.bf16.msra.mxu1 %v7217_v47  ;;  %1490 = vmatprep.subr.bf16.mxu0 %v7222_v48  ;;  %v7289_v47 = vld [vmem:[#allocation6 + $0x380] ss:$8 sps:$4 sm:$0xff]   ;;  %v7294_v48 = vld [vmem:[#allocation8 + $0x74] ss:$8 sps:$4 sm:$0xff]  }
 0x13e   : > { %1531 = vmatprep.subr.bf16.mxu1 %v7225_v49  ;;  %v7297_v49 = vld [vmem:[#allocation8 + $0x174] ss:$8 sps:$4 sm:$0xff]  }
 0x140   : > { %1491 = vmatpush1.bf16.msra.mxu0 %v7220_v50  ;;  %v7292_v50 = vld [vmem:[#allocation8 + $0x70] ss:$8 sps:$4 sm:$0xff]  }
 0x141   : > { %1532 = vmatpush1.bf16.msra.mxu1 %v7223_v51  ;;  %1492 = vmatprep.subr.bf16.mxu0 %v7228_v52  ;;  %v7295_v51 = vld [vmem:[#allocation8 + $0x170] ss:$8 sps:$4 sm:$0xff]   ;;  %v7300_v52 = vld [vmem:[#allocation8 + $0x64] ss:$8 sps:$4 sm:$0xff]  }
 0x142   : > { %1533 = vmatprep.subr.bf16.mxu1 %v7231_v53  ;;  %v7303_v53 = vld [vmem:[#allocation8 + $0x164] ss:$8 sps:$4 sm:$0xff]  }
 0x144   : > { %1493 = vmatpush1.bf16.msra.mxu0 %v7226_v54  ;;  %v7298_v54 = vld [vmem:[#allocation8 + $0x60] ss:$8 sps:$4 sm:$0xff]  }
 0x145   : > { %1534 = vmatpush1.bf16.msra.mxu1 %v7229_v55  ;;  %1494 = vmatprep.subr.bf16.mxu0 %v7234_v56  ;;  %v7301_v55 = vld [vmem:[#allocation8 + $0x160] ss:$8 sps:$4 sm:$0xff]   ;;  %v7306_v56 = vld [vmem:[#allocation8 + $0x54] ss:$8 sps:$4 sm:$0xff]  }
 0x146   : > { %1535 = vmatprep.subr.bf16.mxu1 %v7237_v57  ;;  %v7309_v57 = vld [vmem:[#allocation8 + $0x154] ss:$8 sps:$4 sm:$0xff]  }
 0x148   : > { %1495 = vmatpush1.bf16.msra.mxu0 %v7232_v58  ;;  %v7304_v58 = vld [vmem:[#allocation8 + $0x50] ss:$8 sps:$4 sm:$0xff]  }
 0x149   : > { %1536 = vmatpush1.bf16.msra.mxu1 %v7235_v59  ;;  %1496 = vmatprep.subr.bf16.mxu0 %v7240_v60  ;;  %v7307_v59 = vld [vmem:[#allocation8 + $0x150] ss:$8 sps:$4 sm:$0xff]   ;;  %v7312_v60 = vld [vmem:[#allocation8 + $0x44] ss:$8 sps:$4 sm:$0xff]  }
 0x14a   : > { %1537 = vmatprep.subr.bf16.mxu1 %v7243_v61  ;;  %v7315_v61 = vld [vmem:[#allocation8 + $0x144] ss:$8 sps:$4 sm:$0xff]  }
 0x14c   : > { %1497 = vmatpush1.bf16.msra.mxu0 %v7238_v62  ;;  %v7310_v62 = vld [vmem:[#allocation8 + $0x40] ss:$8 sps:$4 sm:$0xff]  }
 0x14d   : > { %1538 = vmatpush1.bf16.msra.mxu1 %v7241_v63  ;;  %1498 = vmatprep.subr.bf16.mxu0 %v7246_v16  ;;  %v7313_v63 = vld [vmem:[#allocation8 + $0x140] ss:$8 sps:$4 sm:$0xff]   ;;  %v7318_v16 = vld [vmem:[#allocation8 + $0x34] ss:$8 sps:$4 sm:$0xff]  }
 0x14e   : > { %1539 = vmatprep.subr.bf16.mxu1 %v7249_v17  ;;  %v7321_v17 = vld [vmem:[#allocation8 + $0x134] ss:$8 sps:$4 sm:$0xff]  }
 0x150   : > { %1499 = vmatpush2.bf16.msra.mxu0 %v7244_v18  ;;  %v7316_v18 = vld [vmem:[#allocation8 + $0x30] ss:$8 sps:$4 sm:$0xff]  }
 0x151   : > { %1540 = vmatpush2.bf16.msra.mxu1 %v7247_v19  ;;  %1500 = vmatprep.subr.bf16.mxu0 %v7252_v20  ;;  %v7319_v19 = vld [vmem:[#allocation8 + $0x130] ss:$8 sps:$4 sm:$0xff]   ;;  %v7324_v20 = vld [vmem:[#allocation8 + $0x24] ss:$8 sps:$4 sm:$0xff]  }
 0x152   : > { %1541 = vmatprep.subr.bf16.mxu1 %v7255_v21  ;;  %v7327_v21 = vld [vmem:[#allocation8 + $0x124] ss:$8 sps:$4 sm:$0xff]  }
 0x154   : > { %1501 = vmatpush2.bf16.msra.mxu0 %v7250_v22  ;;  %v7322_v22 = vld [vmem:[#allocation8 + $0x20] ss:$8 sps:$4 sm:$0xff]  }
 0x155   : > { %1542 = vmatpush2.bf16.msra.mxu1 %v7253_v23  ;;  %1502 = vmatprep.subr.bf16.mxu0 %v7258_v24  ;;  %v7325_v23 = vld [vmem:[#allocation8 + $0x120] ss:$8 sps:$4 sm:$0xff]   ;;  %v7330_v24 = vld [vmem:[#allocation8 + $0x14] ss:$8 sps:$4 sm:$0xff]  }
 0x156   : > { %1543 = vmatprep.subr.bf16.mxu1 %v7261_v25  ;;  %v7333_v25 = vld [vmem:[#allocation8 + $0x114] ss:$8 sps:$4 sm:$0xff]  }
 0x158   : > { %1503 = vmatpush2.bf16.msra.mxu0 %v7256_v26  ;;  %v7328_v26 = vld [vmem:[#allocation8 + $0x10] ss:$8 sps:$4 sm:$0xff]  }
 0x159   : > { %1544 = vmatpush2.bf16.msra.mxu1 %v7259_v27  ;;  %1504 = vmatprep.subr.bf16.mxu0 %v7264_v28  ;;  %v7331_v27 = vld [vmem:[#allocation8 + $0x110] ss:$8 sps:$4 sm:$0xff]   ;;  %v7336_v28 = vld [vmem:[#allocation8 + $0x4] ss:$8 sps:$4 sm:$0xff]  }
 0x15a   : > { %1545 = vmatprep.subr.bf16.mxu1 %v7267_v29  ;;  %v7339_v29 = vld [vmem:[#allocation8 + $0x104] ss:$8 sps:$4 sm:$0xff]  }
 0x15c   : > { %1505 = vmatpush2.bf16.msra.mxu0 %v7262_v30  ;;  %v7334_v30 = vld [vmem:[#allocation8] ss:$8 sps:$4 sm:$0xff]  }
 0x15d   : > { %1546 = vmatpush2.bf16.msra.mxu1 %v7265_v31  ;;  %1506 = vmatprep.subr.bf16.mxu0 %v7270_v32  ;;  %v7337_v31 = vld [vmem:[#allocation8 + $0x100] ss:$8 sps:$4 sm:$0xff]   ;;  %v7342_v32 = vld [vmem:[#allocation8 + $0xf4] ss:$8 sps:$4 sm:$0xff]  }
 0x15e   : > { %1547 = vmatprep.subr.bf16.mxu1 %v7273_v33  ;;  %v7345_v33 = vld [vmem:[#allocation8 + $0x1f4] ss:$8 sps:$4 sm:$0xff]  }
 0x160   : > { %1507 = vmatpush2.bf16.msra.mxu0 %v7268_v34  ;;  %v7340_v34 = vld [vmem:[#allocation8 + $0xf0] ss:$8 sps:$4 sm:$0xff]  }
 0x161   : > { %1548 = vmatpush2.bf16.msra.mxu1 %v7271_v35  ;;  %1508 = vmatprep.subr.bf16.mxu0 %v7276_v36  ;;  %v7343_v35 = vld [vmem:[#allocation8 + $0x1f0] ss:$8 sps:$4 sm:$0xff]   ;;  %v7348_v36 = vld [vmem:[#allocation8 + $0xe4] ss:$8 sps:$4 sm:$0xff]  }
 0x162   : > { %1549 = vmatprep.subr.bf16.mxu1 %v7279_v37  ;;  %v7351_v37 = vld [vmem:[#allocation8 + $0x1e4] ss:$8 sps:$4 sm:$0xff]  }
 0x164   : > { %1509 = vmatpush2.bf16.msra.mxu0 %v7274_v38  ;;  %v750_v38 = vlaneseq }
 0x165   : > { %1550 = vmatpush2.bf16.msra.mxu1 %v7277_v39  ;;  %1510 = vmatprep.subr.bf16.mxu0 %v7282_v40  ;;  %v7346_v39 = vld [vmem:[#allocation8 + $0xe0] ss:$8 sps:$4 sm:$0xff]  }
 0x166   : > { %1551 = vmatprep.subr.bf16.mxu1 %v7285_v41  ;;  %v7349_v40 = vld [vmem:[#allocation8 + $0x1e0] ss:$8 sps:$4 sm:$0xff]   ;;  %v7354_v41 = vld [vmem:[#allocation8 + $0xd4] ss:$8 sps:$4 sm:$0xff]  }
 0x168   : > { %1511 = vmatpush2.bf16.msra.mxu0 %v7280_v42  ;;  %v7357_v42 = vld [vmem:[#allocation8 + $0x1d4] ss:$8 sps:$4 sm:$0xff]  }
 0x169   : > { %1552 = vmatpush2.bf16.msra.mxu1 %v7283_v43  ;;  %1512 = vmatprep.subr.bf16.mxu0 %v7288_v44  ;;  %v7352_v43 = vld [vmem:[#allocation8 + $0xd0] ss:$8 sps:$4 sm:$0xff]   ;;  %v751_v44 = vshrl.u32 %v750_v38, 7 }
 0x16a   : > { %1553 = vmatprep.subr.bf16.mxu1 %v7291_v45  ;;  %v7355_v45 = vld [vmem:[#allocation8 + $0x1d0] ss:$8 sps:$4 sm:$0xff]  }
 0x16b   : > { %v7391_v38 = vld [vmem:[#allocation8 + $0x370] ss:$8 sps:$4 sm:$0xff]  }
 0x16c   : > { %1513 = vmatpush2.bf16.msra.mxu0 %v7286_v46  ;;  %v7360_v46 = vld [vmem:[#allocation8 + $0xc4] ss:$8 sps:$4 sm:$0xff]  }
 0x16d   : > { %1554 = vmatpush2.bf16.msra.mxu1 %v7289_v47  ;;  %2344 = vmatprep.subr.bf16.mxu0 %v7294_v48  ;;  %v7363_v47 = vld [vmem:[#allocation8 + $0x1c4] ss:$8 sps:$4 sm:$0xff]   ;;  %v2604_v48 = vsub.s32 2, %v751_v44 }
 0x16e   : > { %2385 = vmatprep.subr.bf16.mxu1 %v7297_v49  ;;  %v2608_v49 = vsub.s32 3, %v751_v44 }
 0x16f   : > { %1515 = vmatmul.mubr.bf16.vlgmr.msra.gmra.mxu0 %v8539_v12 }
 0x170   : > { %1556 = vmatmul.mubr.bf16.vlgmr.msra.gmra.mxu1 %v8547_v14  ;;  %2345 = vmatpush1.bf16.msra.mxu0 %v7292_v50  ;;  %v2612_v50 = vsub.s32 4, %v751_v44 }
 0x171   : > { %2386 = vmatpush1.bf16.msra.mxu1 %v7295_v51  ;;  %2346 = vmatprep.subr.bf16.mxu0 %v7300_v52  ;;  %v2616_v51 = vsub.s32 5, %v751_v44  ;;  %v2620_v52 = vsub.s32 6, %v751_v44 }
 0x172   : > { %2387 = vmatprep.subr.bf16.mxu1 %v7303_v53  ;;  %2376 = vmatprep.mubr.bf16.mxu0 %v8523_v7  ;;  %v7358_v53 = vld [vmem:[#allocation8 + $0xc0] ss:$8 sps:$4 sm:$0xff]  }
 0x173   : > { %2417 = vmatprep.mubr.bf16.mxu1 %v8535_v11 }
 0x174   : > { %2347 = vmatpush1.bf16.msra.mxu0 %v7298_v54  ;;  %v7361_v54 = vld [vmem:[#allocation8 + $0x1c0] ss:$8 sps:$4 sm:$0xff]  }
 0x175   : > { %2388 = vmatpush1.bf16.msra.mxu1 %v7301_v55  ;;  %2348 = vmatprep.subr.bf16.mxu0 %v7306_v56  ;;  %v8565_v55 = vsub.s32 0, %v751_v44  ;;  %v2624_v56 = vsub.s32 7, %v751_v44 }
 0x176   : > { %2389 = vmatprep.subr.bf16.mxu1 %v7309_v57  ;;  %v7366_v57 = vld [vmem:[#allocation8 + $0xb4] ss:$8 sps:$4 sm:$0xff]  }
 0x178   : > { %2349 = vmatpush1.bf16.msra.mxu0 %v7304_v58  ;;  %v2592_v58 = vld [vmem:[%s9298_s2 + $0x4] sm:$0xff] }
 0x179   : > { %2390 = vmatpush1.bf16.msra.mxu1 %v7307_v59  ;;  %2350 = vmatprep.subr.bf16.mxu0 %v7312_v60  ;;  %v7369_v59 = vld [vmem:[#allocation8 + $0x1b4] ss:$8 sps:$4 sm:$0xff]   ;;  %v2597_v60 = vrot.slane %v2592_v58, %v8565_v55 }
 0x17a   : > { %2391 = vmatprep.subr.bf16.mxu1 %v7315_v61  ;;  %v2605_v61 = vrot.slane %v2592_v58, %v2604_v48  ;;  %v7411_v48 = vld [vmem:[#allocation8 + $0x344] ss:$8 sps:$4 sm:$0xff]  }
 0x17c   : > { %2351 = vmatpush1.bf16.msra.mxu0 %v7310_v62  ;;  %v2609_v62 = vrot.slane %v2592_v58, %v2608_v49  ;;  %v7406_v49 = vld [vmem:[#allocation8 + $0x240] ss:$8 sps:$4 sm:$0xff]  }
 0x17d   : > { %2392 = vmatpush1.bf16.msra.mxu1 %v7313_v63  ;;  %2352 = vmatprep.subr.bf16.mxu0 %v7318_v16  ;;  %v2613_v63 = vrot.slane %v2592_v58, %v2612_v50  ;;  %v2617_v16 = vrot.slane %v2592_v58, %v2616_v51  ;;  %v7409_v50 = vld [vmem:[#allocation8 + $0x340] ss:$8 sps:$4 sm:$0xff]   ;;  %v7414_v51 = vld [vmem:[#allocation8 + $0x234] ss:$8 sps:$4 sm:$0xff]  }
 0x17e   : > { %2393 = vmatprep.subr.bf16.mxu1 %v7321_v17  ;;  %v2621_v17 = vrot.slane %v2592_v58, %v2620_v52  ;;  %v7417_v52 = vld [vmem:[#allocation8 + $0x334] ss:$8 sps:$4 sm:$0xff]  }
 0x180   : > { %2353 = vmatpush1.bf16.msra.mxu0 %v7316_v18  ;;  %v8571_v18 = vsub.s32 1, %v751_v44  ;;  %v7405_v44 = vld [vmem:[#allocation8 + $0x354] ss:$8 sps:$4 sm:$0xff]  }
 0x181   : > { %2394 = vmatpush1.bf16.msra.mxu1 %v7319_v19  ;;  %2354 = vmatprep.subr.bf16.mxu0 %v7324_v20  ;;  %v7364_v19 = vld [vmem:[#allocation8 + $0xb0] ss:$8 sps:$4 sm:$0xff]   ;;  %v2625_v20 = vrot.slane %v2592_v58, %v2624_v56  ;;  %v7420_v56 = vld [vmem:[#allocation8 + $0x224] ss:$8 sps:$4 sm:$0xff]  }
 0x182   : > { %2395 = vmatprep.subr.bf16.mxu1 %v7327_v21  ;;  %v2634_v21 = vadd.f32 %v2597_v60, %v8505_v0  ;;  %v7375_v0 = vld [vmem:[#allocation8 + $0x1a4] ss:$8 sps:$4 sm:$0xff]   ;;  %v7426_v60 = vld [vmem:[#allocation8 + $0x214] ss:$8 sps:$4 sm:$0xff]  }
 0x184   : > { %2355 = vmatpush1.bf16.msra.mxu0 %v7322_v22  ;;  %v2636_v22 = vadd.f32 %v2605_v61, %v8509_v2  ;;  %2642 = vst [vmem:[#allocation20] sm:$0xff] %v2634_v21  ;;  %v7429_v61 = vld [vmem:[#allocation8 + $0x314] ss:$8 sps:$4 sm:$0xff]  }
 0x185   : > { %2396 = vmatpush1.bf16.msra.mxu1 %v7325_v23  ;;  %2356 = vmatprep.subr.bf16.mxu0 %v7330_v24  ;;  %v2637_v23 = vadd.f32 %v2609_v62, %v8511_v3  ;;  %v7367_v24 = vld [vmem:[#allocation8 + $0x1b0] ss:$8 sps:$4 sm:$0xff]   ;;  %v7370_v3 = vld [vmem:[#allocation8 + $0xa0] ss:$8 sps:$4 sm:$0xff]   ;;  %v7438_v21 = vld [vmem:[#allocation8 + $0x2f4] ss:$8 sps:$4 sm:$0xff]  }
 0x186   : > { %2397 = vmatprep.subr.bf16.mxu1 %v7333_v25  ;;  %v2638_v25 = vadd.f32 %v2613_v63, %v8513_v4  ;;  %2644 = vst [vmem:[#allocation20 + $0x10] sm:$0xff] %v2636_v22  ;;  %v7373_v4 = vld [vmem:[#allocation8 + $0x1a0] ss:$8 sps:$4 sm:$0xff]   ;;  %v7424_v62 = vld [vmem:[#allocation8 + $0x210] ss:$8 sps:$4 sm:$0xff]  }
 0x187   : > { %2645 = vst [vmem:[#allocation20 + $0x18] sm:$0xff] %v2637_v23  ;;  %v7427_v63 = vld [vmem:[#allocation8 + $0x310] ss:$8 sps:$4 sm:$0xff]   ;;  %v7441_v22 = vld [vmem:[#allocation8 + $0x3f4] ss:$8 sps:$4 sm:$0xff]  }
 0x188   : > { %2357 = vmatpush1.bf16.msra.mxu0 %v7328_v26  ;;  %v2639_v26 = vadd.f32 %v2617_v16, %v8515_v5  ;;  %2646 = vst [vmem:[#allocation20 + $0x20] sm:$0xff] %v2638_v25  ;;  %v7378_v5 = vld [vmem:[#allocation8 + $0x94] ss:$8 sps:$4 sm:$0xff]   ;;  %v7432_v16 = vld [vmem:[#allocation8 + $0x204] ss:$8 sps:$4 sm:$0xff]  }
 0x189   : > { %2398 = vmatpush1.bf16.msra.mxu1 %v7331_v27  ;;  %2358 = vmatprep.subr.bf16.mxu0 %v7336_v28  ;;  %v2640_v27 = vadd.f32 %v2621_v17, %v8529_v9  ;;  %v2601_v28 = vrot.slane %v2592_v58, %v8571_v18  ;;  %v7381_v9 = vld [vmem:[#allocation8 + $0x194] ss:$8 sps:$4 sm:$0xff]   ;;  %v7418_v58 = vld [vmem:[#allocation8 + $0x220] ss:$8 sps:$4 sm:$0xff]   ;;  %v7435_v17 = vld [vmem:[#allocation8 + $0x304] ss:$8 sps:$4 sm:$0xff]  }
 0x18a   : > { %2399 = vmatprep.subr.bf16.mxu1 %v7339_v29  ;;  %v7372_v29 = vld [vmem:[#allocation8 + $0xa4] ss:$8 sps:$4 sm:$0xff]   ;;  %2647 = vst [vmem:[#allocation20 + $0x28] sm:$0xff] %v2639_v26  ;;  %v7436_v23 = vld [vmem:[#allocation8 + $0x2f0] ss:$8 sps:$4 sm:$0xff]  }
 0x18b   : > { %2648 = vst [vmem:[#allocation20 + $0x30] sm:$0xff] %v2640_v27  ;;  %v2635_v2 = vadd.f32 %v2601_v28, %v8507_v1  ;;  %v7385_v1 = vld [vmem:[#allocation8 + $0x180] ss:$8 sps:$4 sm:$0xff]   ;;  %v7444_v25 = vld [vmem:[#allocation8 + $0x2e4] ss:$8 sps:$4 sm:$0xff]  }
 0x18c   : > { %2359 = vmatpush1.bf16.msra.mxu0 %v7334_v30  ;;  %v2641_v30 = vadd.f32 %v2625_v20, %v8531_v10  ;;  %v7376_v10 = vld [vmem:[#allocation8 + $0x90] ss:$8 sps:$4 sm:$0xff]   ;;  %v7433_v20 = vld [vmem:[#allocation8 + $0x300] ss:$8 sps:$4 sm:$0xff]   ;;  %v7447_v26 = vld [vmem:[#allocation8 + $0x3e4] ss:$8 sps:$4 sm:$0xff]  }
 0x18d   : > { %2400 = vmatpush1.bf16.msra.mxu1 %v7337_v31  ;;  %2360 = vmatprep.subr.bf16.mxu0 %v7342_v32  ;;  %2643 = vst [vmem:[#allocation20 + $0x8] sm:$0xff] %v2635_v2  ;;  %v7379_v31 = vld [vmem:[#allocation8 + $0x190] ss:$8 sps:$4 sm:$0xff]   ;;  %v7384_v32 = vld [vmem:[#allocation8 + $0x84] ss:$8 sps:$4 sm:$0xff]  }
 0x18e   : > { %2401 = vmatprep.subr.bf16.mxu1 %v7345_v33  ;;  %2649 = vst [vmem:[#allocation20 + $0x38] sm:$0xff] %v2641_v30  ;;  %v7387_v33 = vld [vmem:[#allocation8 + $0x184] ss:$8 sps:$4 sm:$0xff]   ;;  %v7442_v27 = vld [vmem:[#allocation8 + $0x2e0] ss:$8 sps:$4 sm:$0xff]  }
 0x18f   : > { %v7445_v28 = vld [vmem:[#allocation8 + $0x3e0] ss:$8 sps:$4 sm:$0xff]   ;;  %v7453_v30 = vld [vmem:[#allocation8 + $0x3d4] ss:$8 sps:$4 sm:$0xff]   ;;  %v7451_v2 = vld [vmem:[#allocation8 + $0x3d0] ss:$8 sps:$4 sm:$0xff]  }
 0x190   : > { %2361 = vmatpush2.bf16.msra.mxu0 %v7340_v34  ;;  %v7382_v34 = vld [vmem:[#allocation8 + $0x80] ss:$8 sps:$4 sm:$0xff]  }
 0x191   : > { %2402 = vmatpush2.bf16.msra.mxu1 %v7343_v35  ;;  %2362 = vmatprep.subr.bf16.mxu0 %v7348_v36  ;;  %v7390_v35 = vld [vmem:[#allocation8 + $0x274] ss:$8 sps:$4 sm:$0xff]  }
 0x192   : > { %2403 = vmatprep.subr.bf16.mxu1 %v7351_v37  ;;  %v7393_v36 = vld [vmem:[#allocation8 + $0x374] ss:$8 sps:$4 sm:$0xff]   ;;  %v7388_v37 = vld [vmem:[#allocation8 + $0x270] ss:$8 sps:$4 sm:$0xff]  }
 0x194   : > { %2363 = vmatpush2.bf16.msra.mxu0 %v7346_v39  ;;  %v7396_v39 = vld [vmem:[#allocation8 + $0x264] ss:$8 sps:$4 sm:$0xff]  }
 0x195   : > { %2404 = vmatpush2.bf16.msra.mxu1 %v7349_v40  ;;  %2364 = vmatprep.subr.bf16.mxu0 %v7354_v41  ;;  %v7399_v40 = vld [vmem:[#allocation8 + $0x364] ss:$8 sps:$4 sm:$0xff]   ;;  %v7394_v41 = vld [vmem:[#allocation8 + $0x260] ss:$8 sps:$4 sm:$0xff]  }
 0x196   : > { %2405 = vmatprep.subr.bf16.mxu1 %v7357_v42  ;;  %v7397_v42 = vld [vmem:[#allocation8 + $0x360] ss:$8 sps:$4 sm:$0xff]  }
 0x198   : > { %2365 = vmatpush2.bf16.msra.mxu0 %v7352_v43  ;;  %v7402_v43 = vld [vmem:[#allocation8 + $0x254] ss:$8 sps:$4 sm:$0xff]  }
 0x199   : > { %2406 = vmatpush2.bf16.msra.mxu1 %v7355_v45  ;;  %2366 = vmatprep.subr.bf16.mxu0 %v7360_v46  ;;  %v7400_v45 = vld [vmem:[#allocation8 + $0x250] ss:$8 sps:$4 sm:$0xff]  }
 0x19a   : > { %2407 = vmatprep.subr.bf16.mxu1 %v7363_v47  ;;  %v7403_v46 = vld [vmem:[#allocation8 + $0x350] ss:$8 sps:$4 sm:$0xff]   ;;  %v7408_v47 = vld [vmem:[#allocation8 + $0x244] ss:$8 sps:$4 sm:$0xff]  }
 0x19c   : > { %2367 = vmatpush2.bf16.msra.mxu0 %v7358_v53  ;;  %v7412_v53 = vld [vmem:[#allocation8 + $0x230] ss:$8 sps:$4 sm:$0xff]  }
 0x19d   : > { %2408 = vmatpush2.bf16.msra.mxu1 %v7361_v54  ;;  %2368 = vmatprep.subr.bf16.mxu0 %v7366_v57  ;;  %v7415_v54 = vld [vmem:[#allocation8 + $0x330] ss:$8 sps:$4 sm:$0xff]   ;;  %v7423_v57 = vld [vmem:[#allocation8 + $0x324] ss:$8 sps:$4 sm:$0xff]  }
 0x19e   : > { %2409 = vmatprep.subr.bf16.mxu1 %v7369_v59  ;;  %v7421_v59 = vld [vmem:[#allocation8 + $0x320] ss:$8 sps:$4 sm:$0xff]  }
 0x1a0   : > { %2369 = vmatpush2.bf16.msra.mxu0 %v7364_v19  ;;  %v7430_v19 = vld [vmem:[#allocation8 + $0x200] ss:$8 sps:$4 sm:$0xff]  }
 0x1a1   : > { %2410 = vmatpush2.bf16.msra.mxu1 %v7367_v24  ;;  %2370 = vmatprep.subr.bf16.mxu0 %v7372_v29  ;;  %v7439_v24 = vld [vmem:[#allocation8 + $0x3f0] ss:$8 sps:$4 sm:$0xff]   ;;  %v7450_v29 = vld [vmem:[#allocation8 + $0x2d4] ss:$8 sps:$4 sm:$0xff]  }
 0x1a2   : > { %2411 = vmatprep.subr.bf16.mxu1 %v7375_v0  ;;  %v7448_v0 = vld [vmem:[#allocation8 + $0x2d0] ss:$8 sps:$4 sm:$0xff]  }
 0x1a4   : > { %2371 = vmatpush2.bf16.msra.mxu0 %v7370_v3  ;;  %v7456_v3 = vld [vmem:[#allocation8 + $0x2c4] ss:$8 sps:$4 sm:$0xff]  }
 0x1a5   : > { %2412 = vmatpush2.bf16.msra.mxu1 %v7373_v4  ;;  %2372 = vmatprep.subr.bf16.mxu0 %v7378_v5  ;;  %v7459_v4 = vld [vmem:[#allocation8 + $0x3c4] ss:$8 sps:$4 sm:$0xff]   ;;  %v7454_v5 = vld [vmem:[#allocation8 + $0x2c0] ss:$8 sps:$4 sm:$0xff]  }
 0x1a6   : > { %2413 = vmatprep.subr.bf16.mxu1 %v7381_v9  ;;  %v7457_v9 = vld [vmem:[#allocation8 + $0x3c0] ss:$8 sps:$4 sm:$0xff]  }
 0x1a8   : > { %2373 = vmatpush2.bf16.msra.mxu0 %v7376_v10  ;;  %v7462_v10 = vld [vmem:[#allocation8 + $0x2b4] ss:$8 sps:$4 sm:$0xff]  }
 0x1a9   : > { %2414 = vmatpush2.bf16.msra.mxu1 %v7379_v31  ;;  %2374 = vmatprep.subr.bf16.mxu0 %v7384_v32  ;;  %v7465_v31 = vld [vmem:[#allocation8 + $0x3b4] ss:$8 sps:$4 sm:$0xff]   ;;  %v7460_v32 = vld [vmem:[#allocation8 + $0x2b0] ss:$8 sps:$4 sm:$0xff]  }
 0x1aa   : > { %2415 = vmatprep.subr.bf16.mxu1 %v7387_v33  ;;  %v7463_v33 = vld [vmem:[#allocation8 + $0x3b0] ss:$8 sps:$4 sm:$0xff]  }
 0x1ac   : > { %2375 = vmatpush2.bf16.msra.mxu0 %v7382_v34  ;;  %v7468_v34 = vld [vmem:[#allocation8 + $0x2a4] ss:$8 sps:$4 sm:$0xff]  }
 0x1ad   : > { %2416 = vmatpush2.bf16.msra.mxu1 %v7385_v1  ;;  %2426 = vmatprep.subr.bf16.mxu0 %v7390_v35  ;;  %v7471_v1 = vld [vmem:[#allocation8 + $0x3a4] ss:$8 sps:$4 sm:$0xff]   ;;  %v7466_v35 = vld [vmem:[#allocation8 + $0x2a0] ss:$8 sps:$4 sm:$0xff]  }
 0x1ae   : > { %2467 = vmatprep.subr.bf16.mxu1 %v7393_v36  ;;  %v7469_v36 = vld [vmem:[#allocation8 + $0x3a0] ss:$8 sps:$4 sm:$0xff]  }
 0x1af   : > { %2377 = vmatmul.mubr.bf16.vlgmr.msra.gmra.mxu0 %v8519_v6 }
 0x1b0   : > { %2418 = vmatmul.mubr.bf16.vlgmr.msra.gmra.mxu1 %v8527_v8  ;;  %2427 = vmatpush1.bf16.msra.mxu0 %v7388_v37  ;;  %v7474_v37 = vld [vmem:[#allocation8 + $0x294] ss:$8 sps:$4 sm:$0xff]  }
 0x1b1   : > { %2468 = vmatpush1.bf16.msra.mxu1 %v7391_v38  ;;  %2428 = vmatprep.subr.bf16.mxu0 %v7396_v39  ;;  %v7477_v38 = vld [vmem:[#allocation8 + $0x394] ss:$8 sps:$4 sm:$0xff]   ;;  %v7472_v39 = vld [vmem:[#allocation8 + $0x290] ss:$8 sps:$4 sm:$0xff]  }
 0x1b2   : > { %2469 = vmatprep.subr.bf16.mxu1 %v7399_v40  ;;  %2458 = vmatprep.mubr.bf16.mxu0 %v8543_v13  ;;  %v7475_v40 = vld [vmem:[#allocation8 + $0x390] ss:$8 sps:$4 sm:$0xff]  }
 0x1b3   : > { %2499 = vmatprep.mubr.bf16.mxu1 %v8551_v15 }
 0x1b4   : > { %2429 = vmatpush1.bf16.msra.mxu0 %v7394_v41  ;;  %v7480_v41 = vld [vmem:[#allocation8 + $0x284] ss:$8 sps:$4 sm:$0xff]  }
 0x1b5   : > { %2470 = vmatpush1.bf16.msra.mxu1 %v7397_v42  ;;  %2430 = vmatprep.subr.bf16.mxu0 %v7402_v43  ;;  %v7483_v42 = vld [vmem:[#allocation8 + $0x384] ss:$8 sps:$4 sm:$0xff]   ;;  %v7478_v43 = vld [vmem:[#allocation8 + $0x280] ss:$8 sps:$4 sm:$0xff]  }
 0x1b6   : > { %2471 = vmatprep.subr.bf16.mxu1 %v7405_v44  ;;  %v7481_v44 = vld [vmem:[#allocation8 + $0x380] ss:$8 sps:$4 sm:$0xff]  }
 0x1b8   : > { %2431 = vmatpush1.bf16.msra.mxu0 %v7400_v45  ;;  %v8589_v45 = vld [vmem:[%s9298_s2] sm:$0x3] }
 0x1b9   : > { %2472 = vmatpush1.bf16.msra.mxu1 %v7403_v46  ;;  %2432 = vmatprep.subr.bf16.mxu0 %v7408_v47  ;;  %v7484_v46 = vld [vmem:[#allocation14 + $0x78] sm:$0xff]   ;;  %v753_v47 = vrot.slane %v8589_v45, %v8565_v55 }
 0x1ba   : > { %2473 = vmatprep.subr.bf16.mxu1 %v7411_v48  ;;  %v7485_v48 = vld [vmem:[#allocation14 + $0x38] sm:$0xff]  }
 0x1bc   : > { %2433 = vmatpush1.bf16.msra.mxu0 %v7406_v49  ;;  %v7486_v49 = vld [vmem:[#allocation14 + $0x70] sm:$0xff]  }
 0x1bd   : > { %2474 = vmatpush1.bf16.msra.mxu1 %v7409_v50  ;;  %2434 = vmatprep.subr.bf16.mxu0 %v7414_v51 }
 0x1be   : > { %2475 = vmatprep.subr.bf16.mxu1 %v7417_v52 }
 0x1c0   : > { %2435 = vmatpush1.bf16.msra.mxu0 %v7412_v53  ;;  %v7487_v53 = vld [vmem:[#allocation14 + $0x30] sm:$0xff]  }
 0x1c1   : > { %2476 = vmatpush1.bf16.msra.mxu1 %v7415_v54  ;;  %2436 = vmatprep.subr.bf16.mxu0 %v7420_v56 }
 0x1c2   : > { %2477 = vmatprep.subr.bf16.mxu1 %v7423_v57  ;;  %v7488_v57 = vld [vmem:[#allocation14 + $0x68] sm:$0xff]  }
 0x1c4   : > { %2437 = vmatpush1.bf16.msra.mxu0 %v7418_v58 }
 0x1c5   : > { %2478 = vmatpush1.bf16.msra.mxu1 %v7421_v59  ;;  %2438 = vmatprep.subr.bf16.mxu0 %v7426_v60 }
 0x1c6   : > { %2479 = vmatprep.subr.bf16.mxu1 %v7429_v61  ;;  %v7489_v61 = vld [vmem:[#allocation14 + $0x28] sm:$0xff]  }
 0x1c8   : > { %2439 = vmatpush1.bf16.msra.mxu0 %v7424_v62 }
 0x1c9   : > { %2480 = vmatpush1.bf16.msra.mxu1 %v7427_v63  ;;  %2440 = vmatprep.subr.bf16.mxu0 %v7432_v16  ;;  %v7490_v16 = vld [vmem:[#allocation14 + $0x60] sm:$0xff]  }
 0x1ca   : > { %2481 = vmatprep.subr.bf16.mxu1 %v7435_v17  ;;  %v7491_v17 = vld [vmem:[#allocation14 + $0x20] sm:$0xff]  }
 0x1cc   : > { %2441 = vmatpush1.bf16.msra.mxu0 %v7430_v19  ;;  %v7492_v19 = vld [vmem:[#allocation14 + $0x58] sm:$0xff]  }
 0x1cd   : > { %2482 = vmatpush1.bf16.msra.mxu1 %v7433_v20  ;;  %2442 = vmatprep.subr.bf16.mxu0 %v7438_v21  ;;  %v7493_v20 = vld [vmem:[#allocation14 + $0x18] sm:$0xff]   ;;  %v7494_v21 = vld [vmem:[#allocation14 + $0x50] sm:$0xff]  }
 0x1ce   : > { %2483 = vmatprep.subr.bf16.mxu1 %v7441_v22  ;;  %v7495_v22 = vld [vmem:[#allocation14 + $0x10] sm:$0xff]  }
 0x1d0   : > { %2443 = vmatpush2.bf16.msra.mxu0 %v7436_v23  ;;  %v7496_v23 = vld [vmem:[#allocation14 + $0x48] sm:$0xff]  }
 0x1d1   : > { %2484 = vmatpush2.bf16.msra.mxu1 %v7439_v24  ;;  %2444 = vmatprep.subr.bf16.mxu0 %v7444_v25  ;;  %v7497_v24 = vld [vmem:[#allocation14 + $0x8] sm:$0xff]   ;;  %v7498_v25 = vld [vmem:[#allocation14 + $0x40] sm:$0xff]  }
 0x1d2   : > { %2485 = vmatprep.subr.bf16.mxu1 %v7447_v26  ;;  %v7499_v26 = vld [vmem:[#allocation14] sm:$0xff]  }
 0x1d4   : > { %2445 = vmatpush2.bf16.msra.mxu0 %v7442_v27  ;;  %v7500_v27 = vld [vmem:[#allocation14 + $0x178] sm:$0xff]  }
 0x1d5   : > { %2486 = vmatpush2.bf16.msra.mxu1 %v7445_v28  ;;  %2446 = vmatprep.subr.bf16.mxu0 %v7450_v29  ;;  %v7501_v28 = vld [vmem:[#allocation14 + $0x138] sm:$0xff]   ;;  %v7502_v29 = vld [vmem:[#allocation14 + $0x170] sm:$0xff]  }
 0x1d6   : > { %2487 = vmatprep.subr.bf16.mxu1 %v7453_v30  ;;  %v7503_v30 = vld [vmem:[#allocation14 + $0x130] sm:$0xff]  }
 0x1d8   : > { %2447 = vmatpush2.bf16.msra.mxu0 %v7448_v0  ;;  %v7504_v0 = vld [vmem:[#allocation14 + $0x168] sm:$0xff]  }
 0x1d9   : > { %2488 = vmatpush2.bf16.msra.mxu1 %v7451_v2  ;;  %2448 = vmatprep.subr.bf16.mxu0 %v7456_v3  ;;  %v7505_v2 = vld [vmem:[#allocation14 + $0x128] sm:$0xff]   ;;  %v7506_v3 = vld [vmem:[#allocation14 + $0x160] sm:$0xff]  }
 0x1da   : > { %2489 = vmatprep.subr.bf16.mxu1 %v7459_v4  ;;  %v7507_v4 = vld [vmem:[#allocation14 + $0x120] sm:$0xff]  }
 0x1dc   : > { %2449 = vmatpush2.bf16.msra.mxu0 %v7454_v5  ;;  %v7508_v5 = vld [vmem:[#allocation14 + $0x158] sm:$0xff]  }
 0x1dd   : > { %2490 = vmatpush2.bf16.msra.mxu1 %v7457_v9  ;;  %2450 = vmatprep.subr.bf16.mxu0 %v7462_v10  ;;  %v7509_v9 = vld [vmem:[#allocation14 + $0x118] sm:$0xff]   ;;  %v7510_v10 = vld [vmem:[#allocation14 + $0x150] sm:$0xff]  }
 0x1de   : > { %2491 = vmatprep.subr.bf16.mxu1 %v7465_v31  ;;  %v7511_v31 = vld [vmem:[#allocation14 + $0x110] sm:$0xff]  }
 0x1e0   : > { %2451 = vmatpush2.bf16.msra.mxu0 %v7460_v32  ;;  %v7512_v32 = vld [vmem:[#allocation14 + $0x148] sm:$0xff]  }
 0x1e1   : > { %2492 = vmatpush2.bf16.msra.mxu1 %v7463_v33  ;;  %2452 = vmatprep.subr.bf16.mxu0 %v7468_v34  ;;  %v7513_v33 = vld [vmem:[#allocation14 + $0x108] sm:$0xff]   ;;  %v7514_v34 = vld [vmem:[#allocation14 + $0x140] sm:$0xff]  }
 0x1e2   : > { %2493 = vmatprep.subr.bf16.mxu1 %v7471_v1  ;;  %v8607_v1 = vld [vmem:[%s9405_s26 + $0xe8] sm:$0xff] }
 0x1e4   : > { %2453 = vmatpush2.bf16.msra.mxu0 %v7466_v35  ;;  %v8612_v35 = vld [vmem:[%s9405_s26 + $0xf8] sm:$0xff] }
 0x1e5   : > { %2494 = vmatpush2.bf16.msra.mxu1 %v7469_v36  ;;  %2454 = vmatprep.subr.bf16.mxu0 %v7474_v37  ;;  %v757_v36 = vrot.slane %v8589_v45, %v8571_v18  ;;  %v7515_v37 = vld [vmem:[#allocation14 + $0x100] sm:$0xff]  }
 0x1e6   : > { %2495 = vmatprep.subr.bf16.mxu1 %v7477_v38  ;;  %v8618_v38 = vpack.c.bf16 %v8612_v35, %v8607_v1 }
 0x1e8   : > { %2455 = vmatpush2.bf16.msra.mxu0 %v7472_v39  ;;  %v8623_v39 = vld [vmem:[%s9405_s26 + $0xe0] sm:$0xff] }
 0x1e9   : > { %2496 = vmatpush2.bf16.msra.mxu1 %v7475_v40  ;;  %2456 = vmatprep.subr.bf16.mxu0 %v7480_v41  ;;  %v8628_v40 = vld [vmem:[%s9405_s26 + $0xf0] sm:$0xff]  ;;  %v8633_v41 = vld [vmem:[%s9405_s26 + $0xc8] sm:$0xff] }
 0x1ea   : > { %2497 = vmatprep.subr.bf16.mxu1 %v7483_v42  ;;  %v8638_v42 = vld [vmem:[%s9405_s26 + $0xd8] sm:$0xff] }
 0x1eb   : > { %v8648_v45 = vpack.c.bf16 %v8638_v42, %v8633_v41 }
 0x1ec   : > { %2457 = vmatpush2.bf16.msra.mxu0 %v7478_v43 }
 0x1ed   : > { %2498 = vmatpush2.bf16.msra.mxu1 %v7481_v44  ;;  %v8643_v44 = vpack.c.bf16 %v8628_v40, %v8623_v39 }
 0x1ee   : > { %6845 = vmatprep.subr.bf16.mxu1 %v7484_v46  ;;  %v8653_v46 = vld [vmem:[%s9405_s26 + $0xc0] sm:$0xff] }
 0x1ef   : > { %v1434_v50 = vpop.f32.mrf.mxu0  ;;  %2459 = vmatmul.mubr.bf16.vlgmr.msra.gmra.mxu0 %v8539_v12 }
 0x1f0   : > { %v1475_v51 = vpop.f32.mrf.mxu1  ;;  %2500 = vmatmul.mubr.bf16.vlgmr.msra.gmra.mxu1 %v8547_v14  ;;  %v1435_v52 = vadd.f32 %v1434_v50, %v753_v47  ;;  %v8658_v47 = vld [vmem:[%s9405_s26 + $0xd0] sm:$0xff] }
 0x1f1   : > { %6846 = vmatpush3.bf16.msra.mxu1 %v7485_v48  ;;  %3249 = vmatprep.mubr.bf16.mxu1 %v8523_v7  ;;  %v8596_v54 = vpop.f32.mrf.mxu0  ;;  %v8663_v48 = vld [vmem:[%s9405_s26 + $0xa8] sm:$0xff] }
 0x1f2   : > { %v8598_v56 = vpop.f32.mrf.mxu1  ;;  %6847 = vmatprep.subr.bf16.mxu1 %v7486_v49  ;;  %v8600_v58 = vadd.f32 %v1475_v51, %v1435_v52  ;;  %v1437_v43 = vadd.f32 %v8596_v54, %v757_v36  ;;  %v8668_v49 = vld [vmem:[%s9405_s26 + $0xb8] sm:$0xff]  ;;  %v8676_v54 = vpack.c.bf16 %v8658_v47, %v8653_v46 }
 0x1f3   : > { %v1438_v59 = vpop.f32.mrf.mxu0 }
 0x1f4   : > { %v1479_v60 = vpop.f32.mrf.mxu1  ;;  %v1478_v52 = vadd.f32 %v8598_v56, %v1437_v43  ;;  %v8687_v56 = vld [vmem:[%s9405_s26 + $0xa0] sm:$0xff] }
 0x1f5   : > { %6848 = vmatpush3.bf16.msra.mxu1 %v7487_v53  ;;  %v1439_v62 = vpop.f32.mrf.mxu0  ;;  %v8809_v43 = vld [vmem:[%s9405_s26 + $0x20] sm:$0xff] }
 0x1f6   : > { %v1480_v63 = vpop.f32.mrf.mxu1  ;;  %6849 = vmatprep.subr.bf16.mxu1 %v7488_v57  ;;  %v9347_v57 = vmov 0   ;;  %9415 = vst [vmem:[#allocation44_spill] sm:$0xff] %v8809_v43 }
 0x1f9   : > { %6850 = vmatpush3.bf16.msra.mxu1 %v7489_v61  ;;  %v8682_v61 = vpack.c.bf16 %v8668_v49, %v8663_v48 }
 0x1fa   : > { %6851 = vmatprep.subr.bf16.mxu1 %v7490_v16  ;;  %v8699_v16 = vld [vmem:[%s9405_s26 + $0x88] sm:$0xff] }
 0x1fd   : > { %6852 = vmatpush3.bf16.msra.mxu1 %v7491_v17  ;;  %v8704_v17 = vld [vmem:[%s9405_s26 + $0x98] sm:$0xff] }
 0x1fe   : > { %6853 = vmatprep.subr.bf16.mxu1 %v7492_v19 }
 0x201   : > { %6854 = vmatpush3.bf16.msra.mxu1 %v7493_v20 }
 0x202   : > { %6855 = vmatprep.subr.bf16.mxu1 %v7494_v21 }
 0x205   : > { %6856 = vmatpush3.bf16.msra.mxu1 %v7495_v22 }
 0x206   : > { %6857 = vmatprep.subr.bf16.mxu1 %v7496_v23 }
 0x209   : > { %6858 = vmatpush3.bf16.msra.mxu1 %v7497_v24 }
 0x20a   : > { %6859 = vmatprep.subr.bf16.mxu1 %v7498_v25  ;;  %v8714_v25 = vpack.c.bf16 %v8704_v17, %v8699_v16 }
 0x20d   : > { %6860 = vmatpush3.bf16.msra.mxu1 %v7499_v26  ;;  %v8719_v26 = vld [vmem:[%s9405_s26 + $0x80] sm:$0xff] }
 0x20e   : > { %6889 = vmatprep.subr.bf16.mxu1 %v7500_v27  ;;  %v8724_v27 = vld [vmem:[%s9405_s26 + $0x90] sm:$0xff] }
 0x210   : > { %3250 = vmatmul.mubr.bf16.vlgmr.msra.gmra.mxu1 %v8519_v6 }
 0x211   : > { %6890 = vmatpush3.bf16.msra.mxu1 %v7501_v28  ;;  %3329 = vmatprep.mubr.bf16.mxu1 %v8543_v13  ;;  %v8729_v28 = vld [vmem:[%s9405_s26 + $0x68] sm:$0xff] }
 0x212   : > { %6891 = vmatprep.subr.bf16.mxu1 %v7502_v29  ;;  %9406 = vst [vmem:[#allocation35_spill] sm:$0xff] %v8729_v28  ;;  %v8734_v29 = vld [vmem:[%s9405_s26 + $0x78] sm:$0xff] }
 0x215   : > { %6892 = vmatpush3.bf16.msra.mxu1 %v7503_v30  ;;  %v8739_v30 = vpack.c.bf16 %v8724_v27, %v8719_v26 }
 0x216   : > { %6893 = vmatprep.subr.bf16.mxu1 %v7504_v0  ;;  %v8744_v0 = vpack.c.bf16 %v8734_v29, %v8729_v28 }
 0x219   : > { %6894 = vmatpush3.bf16.msra.mxu1 %v7505_v2  ;;  %v8749_v2 = vld [vmem:[%s9405_s26 + $0x60] sm:$0xff] }
 0x21a   : > { %6895 = vmatprep.subr.bf16.mxu1 %v7506_v3  ;;  %9407 = vst [vmem:[#allocation36_spill] sm:$0xff] %v8749_v2  ;;  %v8754_v3 = vld [vmem:[%s9405_s26 + $0x70] sm:$0xff] }
 0x21b   : > { %9408 = vst [vmem:[#allocation37_spill] sm:$0xff] %v8754_v3 }
 0x21d   : > { %6896 = vmatpush3.bf16.msra.mxu1 %v7507_v4  ;;  %v8759_v4 = vld [vmem:[%s9405_s26 + $0x48] sm:$0xff] }
 0x21e   : > { %6897 = vmatprep.subr.bf16.mxu1 %v7508_v5  ;;  %9409 = vst [vmem:[#allocation38_spill] sm:$0xff] %v8759_v4  ;;  %v8764_v5 = vld [vmem:[%s9405_s26 + $0x58] sm:$0xff] }
 0x21f   : > { %9410 = vst [vmem:[#allocation39_spill] sm:$0xff] %v8764_v5 }
 0x221   : > { %6898 = vmatpush3.bf16.msra.mxu1 %v7509_v9  ;;  %v8769_v9 = vpack.c.bf16 %v8754_v3, %v8749_v2 }
 0x222   : > { %6899 = vmatprep.subr.bf16.mxu1 %v7510_v10  ;;  %v8774_v10 = vpack.c.bf16 %v8764_v5, %v8759_v4  ;;  %v7524_v5 = vld [vmem:[#allocation14 + $0xf8] sm:$0xff]  }
 0x225   : > { %6900 = vmatpush3.bf16.msra.mxu1 %v7511_v31  ;;  %v8779_v31 = vld [vmem:[%s9405_s26 + $0x40] sm:$0xff] }
 0x226   : > { %6901 = vmatprep.subr.bf16.mxu1 %v7512_v32  ;;  %9411 = vst [vmem:[#allocation40_spill] sm:$0xff] %v8779_v31  ;;  %v8784_v32 = vld [vmem:[%s9405_s26 + $0x50] sm:$0xff] }
 0x227   : > { %9412 = vst [vmem:[#allocation41_spill] sm:$0xff] %v8784_v32  ;;  %v8799_v36 = vpack.c.bf16 %v8784_v32, %v8779_v31 }
 0x229   : > { %6902 = vmatpush3.bf16.msra.mxu1 %v7513_v33  ;;  %v8789_v33 = vld [vmem:[%s9405_s26 + $0x28] sm:$0xff] }
 0x22a   : > { %6903 = vmatprep.subr.bf16.mxu1 %v7514_v34  ;;  %9413 = vst [vmem:[#allocation42_spill] sm:$0xff] %v8789_v33  ;;  %v8794_v34 = vld [vmem:[%s9405_s26 + $0x38] sm:$0xff] }
 0x22b   : > { %9414 = vst [vmem:[#allocation43_spill] sm:$0xff] %v8794_v34 }
 0x22d   : > { %6904 = vmatpush3.bf16.msra.mxu1 %v7515_v37  ;;  %v8804_v37 = vpack.c.bf16 %v8794_v34, %v8789_v33 }
 0x22e   : > { %3441 = vmatprep.subr.bf16.mxu1 %v8618_v38 }
 0x22f   : > { %v1516_v50 = vpop.f32.mrf.mxu0 }
 0x230   : > { %v1557_v51 = vpop.f32.mrf.mxu1  ;;  %3330 = vmatmul.mubr.bf16.vlgmr.msra.gmra.mxu1 %v8539_v12  ;;  %v1517_v53 = vadd.f32 %v1516_v50, %v8600_v58  ;;  %v8692_v58 = vld [vmem:[%s9405_s26 + $0xb0] sm:$0xff] }
 0x231   : > { %3442 = vmatpush1.bf16.msra.mxu1 %v8643_v44  ;;  %3473 = vmatprep.mubr.bf16.mxu1 %v9347_v57  ;;  %v1518_v59 = vpop.f32.mrf.mxu0  ;;  %v8709_v22 = vpack.c.bf16 %v8692_v58, %v8687_v56  ;;  %v8814_v50 = vld [vmem:[%s9405_s26 + $0x30] sm:$0xff] }
 0x232   : > { %v1559_v60 = vpop.f32.mrf.mxu1  ;;  %3443 = vmatprep.subr.bf16.mxu1 %v8648_v45  ;;  %v8694_v62 = vadd.f32 %v1557_v51, %v1517_v53  ;;  %v1519_v63 = vadd.f32 %v1518_v59, %v1478_v52  ;;  %9416 = vst [vmem:[#allocation45_spill] sm:$0xff] %v8814_v50  ;;  %v8819_v51 = vld [vmem:[%s9405_s26 + $0x8] sm:$0xff]  ;;  %v8824_v52 = vld [vmem:[%s9405_s26 + $0x18] sm:$0xff]  ;;  %v8829_v53 = vpack.c.bf16 %v8814_v50, %v8809_v43 }
 0x233   : > { %v1520_v19 = vpop.f32.mrf.mxu0  ;;  %9417 = vst [vmem:[#allocation46_spill] sm:$0xff] %v8819_v51  ;;  %9418 = vst [vmem:[#allocation47_spill] sm:$0xff] %v8824_v52  ;;  %v8834_v59 = vpack.c.bf16 %v8824_v52, %v8819_v51  ;;  %v7520_v12 = vld [vmem:[#allocation15 + $0x20] sm:$0xff]   ;;  %v7521_v51 = vld [vmem:[#allocation15 + $0x28] sm:$0xff]  }
 0x234   : > { %v1561_v20 = vpop.f32.mrf.mxu1  ;;  %v1560_v21 = vadd.f32 %v1559_v60, %v1519_v63  ;;  %v8839_v60 = vld [vmem:[%s9405_s26] sm:$0xff]  ;;  %v8844_v63 = vld [vmem:[%s9405_s26 + $0x10] sm:$0xff] }
 0x235   : > { %3444 = vmatpush1.bf16.msra.mxu1 %v8676_v54  ;;  %v1521_v23 = vpop.f32.mrf.mxu0  ;;  %9419 = vst [vmem:[#allocation48_spill] sm:$0xff] %v8839_v60  ;;  %9420 = vst [vmem:[#allocation49_spill] sm:$0xff] %v8844_v63  ;;  %v8849_v19 = vpack.c.bf16 %v8844_v63, %v8839_v60  ;;  %v7516_v20 = vld [vmem:[#allocation15] sm:$0xff]  }
 0x236   : > { %v1562_v24 = vpop.f32.mrf.mxu1  ;;  %3445 = vmatprep.subr.bf16.mxu1 %v8682_v61  ;;  %2572 = vmatprep.mubr.f32.mxu0 %v1560_v21  ;;  %v7517_v21 = vld [vmem:[#allocation15 + $0x8] sm:$0xff]   ;;  %v7518_v23 = vld [vmem:[#allocation15 + $0x10] sm:$0xff]  }
 0x237   : > { %v7519_v24 = vld [vmem:[#allocation15 + $0x18] sm:$0xff]  }
 0x239   : > { %3446 = vmatpush1.bf16.msra.mxu1 %v8709_v22 }
 0x23a   : > { %3447 = vmatprep.subr.bf16.mxu1 %v8714_v25 }
 0x23d   : > { %3448 = vmatpush1.bf16.msra.mxu1 %v8739_v30 }
 0x23e   : > { %3449 = vmatprep.subr.bf16.mxu1 %v8744_v0 }
 0x241   : > { %3450 = vmatpush1.bf16.msra.mxu1 %v8769_v9 }
 0x242   : > { %3451 = vmatprep.subr.bf16.mxu1 %v8774_v10 }
 0x245   : > { %3452 = vmatpush1.bf16.msra.mxu1 %v8799_v36 }
 0x246   : > { %3453 = vmatprep.subr.bf16.mxu1 %v8804_v37 }
 0x249   : > { %3454 = vmatpush1.bf16.msra.mxu1 %v8829_v53 }
 0x24a   : > { %3455 = vmatprep.subr.bf16.mxu1 %v8834_v59 }
 0x24d   : > { %3456 = vmatpush1.bf16.msra.mxu1 %v8849_v19 }
 0x250   : > { %3474 = vmatmul.mubr.bf16.vlgmr.msra.gmra.mxu1 %v7516_v20 }
 0x251   : > { %3483 = vmatprep.mubr.bf16.mxu1 %v9347_v57 }
 0x258   : > { %3484 = vmatmul.mubr.bf16.gmra.mxu1 %v7517_v21 }
 0x259   : > { %3493 = vmatprep.mubr.bf16.mxu1 %v9347_v57 }
 0x260   : > { %3494 = vmatmul.mubr.bf16.gmra.mxu1 %v7518_v23  ;;  %v7522_v23 = vld [vmem:[#allocation15 + $0x30] sm:$0xff]  }
 0x261   : > { %3503 = vmatprep.mubr.bf16.mxu1 %v9347_v57 }
 0x268   : > { %3504 = vmatmul.mubr.bf16.gmra.mxu1 %v7519_v24  ;;  %v7523_v24 = vld [vmem:[#allocation15 + $0x38] sm:$0xff]  }
 0x269   : > { %3513 = vmatprep.mubr.bf16.mxu1 %v9347_v57 }
 0x26f   : > { %v2378_v13 = vpop.f32.mrf.mxu0 }
 0x270   : > { %v2419_v6 = vpop.f32.mrf.mxu1  ;;  %3514 = vmatmul.mubr.bf16.gmra.mxu1 %v7520_v12  ;;  %v1692_v12 = vld [vmem:[%s9298_s2 + $0x2] sm:$0x3] }
 0x271   : > { %3523 = vmatprep.mubr.bf16.mxu1 %v9347_v57  ;;  %v2380_v20 = vpop.f32.mrf.mxu0  ;;  %v1697_v43 = vrot.slane %v1692_v12, %v8565_v55 }
 0x272   : > { %v2421_v7 = vpop.f32.mrf.mxu1 }
 0x273   : > { %v2382_v60 = vpop.f32.mrf.mxu0 }
 0x274   : > { %v2423_v21 = vpop.f32.mrf.mxu1  ;;  %v1701_v60 = vrot.slane %v1692_v12, %v8571_v18  ;;  %v7525_v18 = vld [vmem:[#allocation14 + $0xb8] sm:$0xff]  }
 0x275   : > { %v2383_v63 = vpop.f32.mrf.mxu0  ;;  %v2379_v21 = vadd.f32 %v2378_v13, %v1697_v43  ;;  %v7526_v13 = vld [vmem:[#allocation14 + $0xf0] sm:$0xff]  }
 0x276   : > { %v2424_v52 = vpop.f32.mrf.mxu1  ;;  %v2381_v63 = vadd.f32 %v2380_v20, %v1701_v60  ;;  %v7539_v20 = vld [vmem:[#allocation14 + $0x80] sm:$0xff]   ;;  %v7540_v60 = vld [vmem:[#allocation14 + $0x1f8] sm:$0xff]  }
 0x277   : > { %v2420_v52 = vadd.f32 %v2419_v6, %v2379_v21  ;;  %v7527_v6 = vld [vmem:[#allocation14 + $0xb0] sm:$0xff]  }
 0x278   : > { %3524 = vmatmul.mubr.bf16.gmra.mxu1 %v7521_v51  ;;  %v2422_v50 = vadd.f32 %v2421_v7, %v2381_v63  ;;  %v7528_v7 = vld [vmem:[#allocation14 + $0xe8] sm:$0xff]   ;;  %v7541_v63 = vld [vmem:[#allocation14 + $0x1b8] sm:$0xff]  }
 0x279   : > { %3533 = vmatprep.mubr.bf16.mxu1 %v9347_v57 }
 0x280   : > { %3534 = vmatmul.mubr.bf16.gmra.mxu1 %v7522_v23 }
 0x281   : > { %3543 = vmatprep.mubr.bf16.mxu1 %v9347_v57 }
 0x288   : > { %3544 = vmatmul.mubr.bf16.gmra.mxu1 %v7523_v24 }
 0x2af   : > { %v2460_v51 = vpop.f32.mrf.mxu0 }
 0x2b0   : > { %v2501_v33 = vpop.f32.mrf.mxu1  ;;  %v2461_v34 = vadd.f32 %v2460_v51, %v2420_v52  ;;  %v7542_v52 = vld [vmem:[#allocation14 + $0x1f0] sm:$0xff]  }
 0x2b1   : > { %v2462_v23 = vpop.f32.mrf.mxu0  ;;  %v7543_v51 = vld [vmem:[#allocation14 + $0x1b0] sm:$0xff]  }
 0x2b2   : > { %v2503_v31 = vpop.f32.mrf.mxu1  ;;  %v2463_v57 = vadd.f32 %v2462_v23, %v2422_v50  ;;  %v2502_v2 = vadd.f32 %v2501_v33, %v2461_v34  ;;  %v7538_v34 = vld [vmem:[#allocation14 + $0xc0] sm:$0xff]   ;;  %v7544_v23 = vld [vmem:[#allocation14 + $0x1e8] sm:$0xff]  }
 0x2b3   : > { %v2464_v4 = vpop.f32.mrf.mxu0 }
 0x2b4   : > { %v2505_v24 = vpop.f32.mrf.mxu1  ;;  %v2504_v32 = vadd.f32 %v2503_v31, %v2463_v57  ;;  %v7529_v4 = vld [vmem:[#allocation14 + $0xa8] sm:$0xff]   ;;  %v7530_v57 = vld [vmem:[#allocation14 + $0xe0] sm:$0xff]  }
 0x2b5   : > { %v2465_v28 = vpop.f32.mrf.mxu0  ;;  %v7536_v31 = vld [vmem:[#allocation14 + $0xc8] sm:$0xff]  }
 0x2b6   : > { %v2506_v3 = vpop.f32.mrf.mxu1  ;;  %2538 = vmatprep.subr.mxu0 %v2504_v32  ;;  %v7531_v28 = vld [vmem:[#allocation14 + $0xa0] sm:$0xff]   ;;  %v7537_v32 = vld [vmem:[#allocation14 + $0x88] sm:$0xff]  }
 0x2b7   : > { %2539 = vmatpush1.xpose.msra.mxu0 %v2502_v2  ;;  %v7532_v3 = vld [vmem:[#allocation14 + $0xd8] sm:$0xff]   ;;  %v7545_v24 = vld [vmem:[#allocation14 + $0x1a8] sm:$0xff]  }
 0x2b8   : > { %6867 = vmatprep.subr.bf16.mxu0 %v7524_v5  ;;  %v7533_v2 = vld [vmem:[#allocation14 + $0x98] sm:$0xff]   ;;  %v7534_v5 = vld [vmem:[#allocation14 + $0xd0] sm:$0xff]  }
 0x2ba   : > { %2573 = vmatmul.mubr.f32.vlgmr.msra.gmra.mxu0 %v8694_v62  ;;  %v7535_v62 = vld [vmem:[#allocation14 + $0x90] sm:$0xff]  }
 0x2bb   : > { %6868 = vmatpush3.bf16.msra.mxu0 %v7525_v18  ;;  %3289 = vmatprep.mubr.bf16.mxu0 %v8535_v11  ;;  %v7546_v18 = vld [vmem:[#allocation14 + $0x1e0] sm:$0xff]  }
 0x2bc   : > { %6869 = vmatprep.subr.bf16.mxu0 %v7526_v13  ;;  %v7547_v13 = vld [vmem:[#allocation14 + $0x1a0] sm:$0xff]  }
 0x2bf   : > { %6870 = vmatpush3.bf16.msra.mxu0 %v7527_v6  ;;  %v7548_v6 = vld [vmem:[#allocation14 + $0x1d8] sm:$0xff]  }
 0x2c0   : > { %6871 = vmatprep.subr.bf16.mxu0 %v7528_v7  ;;  %v7549_v7 = vld [vmem:[#allocation14 + $0x198] sm:$0xff]  }
 0x2c3   : > { %6872 = vmatpush3.bf16.msra.mxu0 %v7529_v4  ;;  %v7550_v4 = vld [vmem:[#allocation14 + $0x1d0] sm:$0xff]  }
 0x2c4   : > { %6873 = vmatprep.subr.bf16.mxu0 %v7530_v57  ;;  %v7551_v57 = vld [vmem:[#allocation14 + $0x190] sm:$0xff]  }
 0x2c7   : > { %6874 = vmatpush3.bf16.msra.mxu0 %v7531_v28  ;;  %v7552_v28 = vld [vmem:[#allocation14 + $0x1c8] sm:$0xff]  }
 0x2c8   : > { %6875 = vmatprep.subr.bf16.mxu0 %v7532_v3  ;;  %v7553_v3 = vld [vmem:[#allocation14 + $0x188] sm:$0xff]  }
 0x2cb   : > { %6876 = vmatpush3.bf16.msra.mxu0 %v7533_v2 }
 0x2cc   : > { %6877 = vmatprep.subr.bf16.mxu0 %v7534_v5  ;;  %v7554_v5 = vld [vmem:[#allocation14 + $0x1c0] sm:$0xff]  }
 0x2cf   : > { %6878 = vmatpush3.bf16.msra.mxu0 %v7535_v62 }
 0x2d0   : > { %v6861_v33 = vpop.f32.mrf.mxu1  ;;  %6879 = vmatprep.subr.bf16.mxu0 %v7536_v31 }
 0x2d2   : > { %v6862_v43 = vpop.f32.mrf.mxu1 }
 0x2d3   : > { %v8867_v50 = vadd.f32 %v6862_v43, %v6861_v33  ;;  %6880 = vmatpush3.bf16.msra.mxu0 %v7537_v32  ;;  %v7555_v32 = vld [vmem:[#allocation14 + $0x180] sm:$0xff]   ;;  %v9421_v43 = vmov 0  }
 0x2d4   : > { %v6864_v12 = vpop.f32.mrf.mxu1  ;;  %6881 = vmatprep.subr.bf16.mxu0 %v7538_v34 }
 0x2d6   : > { %v6865_v21 = vpop.f32.mrf.mxu1 }
 0x2d7   : > { %6882 = vmatpush3.bf16.msra.mxu0 %v7539_v20 }
 0x2d8   : > { %6911 = vmatprep.subr.bf16.mxu0 %v7540_v60 }
 0x2da   : > { %3290 = vmatmul.mubr.bf16.vlgmr.msra.gmra.mxu0 %v8527_v8 }
 0x2db   : > { %6912 = vmatpush3.bf16.msra.mxu0 %v7541_v63  ;;  %3369 = vmatprep.mubr.bf16.mxu0 %v8551_v15 }
 0x2dc   : > { %6913 = vmatprep.subr.bf16.mxu0 %v7542_v52 }
 0x2df   : > { %6914 = vmatpush3.bf16.msra.mxu0 %v7543_v51 }
 0x2e0   : > { %6915 = vmatprep.subr.bf16.mxu0 %v7544_v23 }
 0x2e3   : > { %6916 = vmatpush3.bf16.msra.mxu0 %v7545_v24 }
 0x2e4   : > { %6917 = vmatprep.subr.bf16.mxu0 %v7546_v18  ;;  %v8145_v18 = vmov 0.0  }
 0x2e5   : > { %3795 = vmatprep.mubr.f32.mxu1 %v8145_v18 }
 0x2e7   : > { %6918 = vmatpush3.bf16.msra.mxu0 %v7547_v13 }
 0x2e8   : > { %6919 = vmatprep.subr.bf16.mxu0 %v7548_v6 }
 0x2eb   : > { %6920 = vmatpush3.bf16.msra.mxu0 %v7549_v7 }
 0x2ec   : > { %6921 = vmatprep.subr.bf16.mxu0 %v7550_v4 }
 0x2ef   : > { %6922 = vmatpush3.bf16.msra.mxu0 %v7551_v57 }
 0x2f0   : > { %v6905_v2 = vpop.f32.mrf.mxu1  ;;  %6923 = vmatprep.subr.bf16.mxu0 %v7552_v28 }
 0x2f2   : > { %v6906_v62 = vpop.f32.mrf.mxu1 }
 0x2f3   : > { %v8871_v31 = vadd.f32 %v6906_v62, %v6905_v2  ;;  %6924 = vmatpush3.bf16.msra.mxu0 %v7553_v3 }
 0x2f4   : > { %v6908_v33 = vpop.f32.mrf.mxu1  ;;  %6925 = vmatprep.subr.bf16.mxu0 %v7554_v5 }
 0x2f5   : > { %v7556_v33 = vld [vmem:[#allocation17] sm:$0xff]  }
 0x2f6   : > { %v6909_v34 = vpop.f32.mrf.mxu1 }
 0x2f7   : > { %6926 = vmatpush3.bf16.msra.mxu0 %v7555_v32  ;;  %v7557_v34 = vld [vmem:[#allocation17 + $0x8] sm:$0xff]  }
 0x2f8   : > { %3618 = vmatprep.subr.bf16.mxu0 %v8618_v38 }
 0x2fa   : > { %3370 = vmatmul.mubr.bf16.vlgmr.msra.gmra.mxu0 %v8547_v14 }
 0x2fb   : > { %3619 = vmatpush1.bf16.msra.mxu0 %v8643_v44  ;;  %3650 = vmatprep.mubr.bf16.mxu0 %v9421_v43 }
 0x2fc   : > { %3620 = vmatprep.subr.bf16.mxu0 %v8648_v45 }
 0x2ff   : > { %3621 = vmatpush1.bf16.msra.mxu0 %v8676_v54 }
 0x300   : > { %3622 = vmatprep.subr.bf16.mxu0 %v8682_v61 }
 0x303   : > { %3623 = vmatpush1.bf16.msra.mxu0 %v8709_v22 }
 0x304   : > { %3624 = vmatprep.subr.bf16.mxu0 %v8714_v25 }
 0x307   : > { %3625 = vmatpush1.bf16.msra.mxu0 %v8739_v30 }
 0x308   : > { %3626 = vmatprep.subr.bf16.mxu0 %v8744_v0 }
 0x30b   : > { %3627 = vmatpush1.bf16.msra.mxu0 %v8769_v9 }
 0x30c   : > { %3628 = vmatprep.subr.bf16.mxu0 %v8774_v10 }
 0x30f   : > { %3629 = vmatpush1.bf16.msra.mxu0 %v8799_v36 }
 0x310   : > { %v8886_v38 = vpop.f32.mrf.mxu1  ;;  %3630 = vmatprep.subr.bf16.mxu0 %v8804_v37 }
 0x312   : > { %v8890_v44 = vpop.f32.mrf.mxu1 }
 0x313   : > { %3631 = vmatpush1.bf16.msra.mxu0 %v8829_v53 }
 0x314   : > { %v8892_v45 = vpop.f32.mrf.mxu1  ;;  %3632 = vmatprep.subr.bf16.mxu0 %v8834_v59 }
 0x316   : > { %v3481_v54 = vpop.f32.mrf.mxu1 }
 0x317   : > { %3633 = vmatpush1.bf16.msra.mxu0 %v8849_v19 }
 0x318   : > { %v3485_v61 = vpop.f32.mrf.mxu1 }
 0x31a   : > { %v3487_v22 = vpop.f32.mrf.mxu1  ;;  %3651 = vmatmul.mubr.bf16.vlgmr.msra.gmra.mxu0 %v7556_v33 }
 0x31b   : > { %3660 = vmatprep.mubr.bf16.mxu0 %v9421_v43 }
 0x31c   : > { %v3489_v25 = vpop.f32.mrf.mxu1 }
 0x31e   : > { %v3491_v30 = vpop.f32.mrf.mxu1 }
 0x320   : > { %v3495_v0 = vpop.f32.mrf.mxu1 }
 0x322   : > { %v3497_v9 = vpop.f32.mrf.mxu1  ;;  %3661 = vmatmul.mubr.bf16.gmra.mxu0 %v7557_v34 }
 0x323   : > { %3670 = vmatprep.mubr.bf16.mxu0 %v9421_v43 }
 0x324   : > { %v3499_v10 = vpop.f32.mrf.mxu1 }
 0x326   : > { %v3501_v36 = vpop.f32.mrf.mxu1 }
 0x328   : > { %v3505_v37 = vpop.f32.mrf.mxu1 }
 0x32a   : > { %v3507_v20 = vpop.f32.mrf.mxu1 }
 0x32c   : > { %v3509_v12 = vpop.f32.mrf.mxu1 }
 0x32e   : > { %v3511_v60 = vpop.f32.mrf.mxu1 }
 0x330   : > { %v3515_v21 = vpop.f32.mrf.mxu1 }
 0x332   : > { %v3517_v63 = vpop.f32.mrf.mxu1 }
 0x334   : > { %v3519_v53 = vpop.f32.mrf.mxu1 }
 0x336   : > { %v3521_v52 = vpop.f32.mrf.mxu1 }
 0x338   : > { %v3525_v59 = vpop.f32.mrf.mxu1 }
 0x33a   : > { %v3527_v51 = vpop.f32.mrf.mxu1 }
 0x33c   : > { %v3529_v23 = vpop.f32.mrf.mxu1 }
 0x33e   : > { %v3531_v24 = vpop.f32.mrf.mxu1 }
 0x340   : > { %v3535_v19 = vpop.f32.mrf.mxu1 }
 0x342   : > { %v3537_v13 = vpop.f32.mrf.mxu1 }
 0x344   : > { %v3539_v6 = vpop.f32.mrf.mxu1 }
 0x346   : > { %v3541_v7 = vpop.f32.mrf.mxu1 }
 0x348   : > { %v3545_v4 = vpop.f32.mrf.mxu1 }
 0x34a   : > { %v3547_v57 = vpop.f32.mrf.mxu1 }
 0x34c   : > { %v3549_v28 = vpop.f32.mrf.mxu1 }
 0x34e   : > { %v3551_v3 = vpop.f32.mrf.mxu1 }
 0x34f   : > { %3731 = vmatprep.subr.mxu1 %v3551_v3 }
 0x350   : > { %3732 = vmatpush1.msra.mxu1 %v3549_v28 }
 0x351   : > { %3733 = vmatprep.subr.mxu1 %v3547_v57 }
 0x352   : > { %3734 = vmatpush1.msra.mxu1 %v3545_v4 }
 0x353   : > { %3735 = vmatprep.subr.mxu1 %v3541_v7 }
 0x354   : > { %3736 = vmatpush1.msra.mxu1 %v3539_v6 }
 0x355   : > { %3737 = vmatprep.subr.mxu1 %v3537_v13 }
 0x356   : > { %3738 = vmatpush1.msra.mxu1 %v3535_v19 }
 0x357   : > { %3739 = vmatprep.subr.mxu1 %v3531_v24 }
 0x358   : > { %3740 = vmatpush1.msra.mxu1 %v3529_v23 }
 0x359   : > { %3741 = vmatprep.subr.mxu1 %v3527_v51 }
 0x35a   : > { %3742 = vmatpush1.msra.mxu1 %v3525_v59 }
 0x35b   : > { %3743 = vmatprep.subr.mxu1 %v3521_v52 }
 0x35c   : > { %3744 = vmatpush1.msra.mxu1 %v3519_v53 }
 0x35d   : > { %3745 = vmatprep.subr.mxu1 %v3517_v63 }
 0x35e   : > { %3746 = vmatpush1.msra.mxu1 %v3515_v21  ;;  %v7563_v21 = vld [vmem:[#allocation17 + $0x38] sm:$0xff]  }
 0x35f   : > { %3747 = vmatprep.subr.mxu1 %v3511_v60 }
 0x360   : > { %3748 = vmatpush1.msra.mxu1 %v3509_v12 }
 0x361   : > { %3749 = vmatprep.subr.mxu1 %v3507_v20 }
 0x362   : > { %3750 = vmatpush1.msra.mxu1 %v3505_v37  ;;  %v7562_v37 = vld [vmem:[#allocation17 + $0x30] sm:$0xff]  }
 0x363   : > { %3751 = vmatprep.subr.mxu1 %v3501_v36  ;;  %v7561_v36 = vld [vmem:[#allocation17 + $0x28] sm:$0xff]  }
 0x364   : > { %3752 = vmatpush1.msra.mxu1 %v3499_v10  ;;  %v7560_v10 = vld [vmem:[#allocation17 + $0x20] sm:$0xff]  }
 0x365   : > { %3753 = vmatprep.subr.mxu1 %v3497_v9 }
 0x366   : > { %3754 = vmatpush1.msra.mxu1 %v3495_v0 }
 0x367   : > { %3755 = vmatprep.subr.mxu1 %v3491_v30  ;;  %v7559_v30 = vld [vmem:[#allocation17 + $0x18] sm:$0xff]  }
 0x368   : > { %3756 = vmatpush1.msra.mxu1 %v3489_v25 }
 0x369   : > { %3757 = vmatprep.subr.mxu1 %v3487_v22 }
 0x36a   : > { %3758 = vmatpush1.msra.mxu1 %v3485_v61 }
 0x36b   : > { %3759 = vmatprep.subr.mxu1 %v3481_v54 }
 0x36c   : > { %3760 = vmatpush1.msra.mxu1 %v8892_v45 }
 0x36d   : > { %3761 = vmatprep.subr.mxu1 %v8890_v44 }
 0x36e   : > { %3762 = vmatpush1.msra.mxu1 %v8886_v38  ;;  %v7558_v38 = vld [vmem:[#allocation17 + $0x10] sm:$0xff]  }
 0x36f   : > { %3884 = vmatprep.subr.mxu1 %v8612_v35  ;;  %v6488_v35 = vld [vmem:[%s9298_s2 + $0xc] ss:$0 sm:$0xff]  ;;  %3671 = vmatmul.mubr.bf16.gmra.mxu0 %v7558_v38 }
 0x370   : > { %3680 = vmatprep.mubr.bf16.mxu0 %v9421_v43  ;;  %v3252_v54 = vadd.f32 %v8867_v50, %v6488_v35 }
 0x377   : > { %3681 = vmatmul.mubr.bf16.gmra.mxu0 %v7559_v30 }
 0x378   : > { %3690 = vmatprep.mubr.bf16.mxu0 %v9421_v43 }
 0x37a   : > { %v2574_v2 = vpop.f32.mrf.mxu0 }
 0x37b   : > { %v8902_v5 = vmul.f32 0.0625, %v2574_v2 }
 0x37c   : > { %v2576_v62 = vpop.f32.mrf.mxu0 }
 0x37d   : > { %v2580_v32 = vsel %vm2579_vm0, %v8902_v5, -inf }
 0x37e   : > { %2581 = vmax.xlane.f32.xlu1 %v2580_v32 }
 0x37f   : > { %3691 = vmatmul.mubr.bf16.gmra.mxu0 %v7560_v10 }
 0x380   : > { %3700 = vmatprep.mubr.bf16.mxu0 %v9421_v43 }
 0x387   : > { %3701 = vmatmul.mubr.bf16.gmra.mxu0 %v7561_v36 }
 0x388   : > { %3710 = vmatprep.mubr.bf16.mxu0 %v9421_v43 }
 0x38f   : > { %3711 = vmatmul.mubr.bf16.gmra.mxu0 %v7562_v37 }
 0x390   : > { %3720 = vmatprep.mubr.bf16.mxu0 %v9421_v43 }
 0x397   : > { %3721 = vmatmul.mubr.bf16.gmra.mxu0 %v7563_v21 }
 0x39a   : > { %v6883_v44 = vpop.f32.mrf.mxu0 }
 0x39c   : > { %v6884_v45 = vpop.f32.mrf.mxu0 }
 0x39d   : > { %v6885_v61 = vadd.f32 %v6884_v45, %v6883_v44 }
 0x39e   : > { %v6886_v22 = vpop.f32.mrf.mxu0 }
 0x39f   : > { %v3292_v25 = vadd.f32 %v6885_v61, %v3252_v54 }
 0x3a0   : > { %v6887_v0 = vpop.f32.mrf.mxu0 }
 0x3a1   : > { %v3332_v9 = vadd.f32 %v8871_v31, %v3292_v25 }
 0x3ba   : > { %v6927_v50 = vpop.f32.mrf.mxu0 }
 0x3bc   : > { %v6928_v20 = vpop.f32.mrf.mxu0 }
 0x3bd   : > { %v6929_v12 = vadd.f32 %v6928_v20, %v6927_v50 }
 0x3be   : > { %v6930_v60 = vpop.f32.mrf.mxu0 }
 0x3bf   : > { %v3372_v31 = vadd.f32 %v6929_v12, %v3332_v9 }
 0x3c0   : > { %v6931_v63 = vpop.f32.mrf.mxu0 }
 0x3c1   : > { %3796 = vmatmul.mubr.f32.vlgmr.msra.gmra.mxu1 %v3372_v31 }
 0x3c2   : > { %3885 = vmatpush1.xpose.msra.mxu1 %v8628_v40  ;;  %v9424_v40 = vld [vmem:[#allocation36_spill] sm:$0xff] }
 0x3c3   : > { %3886 = vmatprep.subr.mxu1 %v8607_v1  ;;  %v9422_v1 = vld [vmem:[#allocation37_spill] sm:$0xff] }
 0x3c6   : > { %3887 = vmatpush1.xpose.msra.mxu1 %v8623_v39  ;;  %v9423_v39 = vld [vmem:[#allocation35_spill] sm:$0xff] }
 0x3c7   : > { %3888 = vmatprep.subr.mxu1 %v8638_v42  ;;  %v9426_v42 = vld [vmem:[#allocation41_spill] sm:$0xff] }
 0x3ca   : > { %3889 = vmatpush1.xpose.msra.mxu1 %v8658_v47  ;;  %v9428_v47 = vld [vmem:[#allocation40_spill] sm:$0xff] }
 0x3cb   : > { %3890 = vmatprep.subr.mxu1 %v8633_v41  ;;  %v9425_v41 = vld [vmem:[#allocation39_spill] sm:$0xff] }
 0x3ce   : > { %3891 = vmatpush1.xpose.msra.mxu1 %v8653_v46  ;;  %v9427_v46 = vld [vmem:[#allocation38_spill] sm:$0xff] }
 0x3cf   : > { %3892 = vmatprep.subr.mxu1 %v8668_v49  ;;  %v9430_v49 = vld [vmem:[#allocation45_spill] sm:$0xff] }
 0x3d2   : > { %3893 = vmatpush1.xpose.msra.mxu1 %v8692_v58  ;;  %v9432_v58 = vld [vmem:[#allocation44_spill] sm:$0xff] }
 0x3d3   : > { %3894 = vmatprep.subr.mxu1 %v8663_v48  ;;  %v9429_v48 = vld [vmem:[#allocation43_spill] sm:$0xff] }
 0x3d6   : > { %3895 = vmatpush1.xpose.msra.mxu1 %v8687_v56  ;;  %v9431_v56 = vld [vmem:[#allocation42_spill] sm:$0xff] }
 0x3d7   : > { %3896 = vmatprep.subr.mxu1 %v8704_v17  ;;  %v9434_v17 = vld [vmem:[#allocation49_spill] sm:$0xff] }
 0x3da   : > { %3897 = vmatpush1.xpose.msra.mxu1 %v8724_v27  ;;  %v9436_v27 = vld [vmem:[#allocation48_spill] sm:$0xff]  ;;  %v8954_v51 = vpop.f32.mrf.mxu0 }
 0x3db   : > { %3898 = vmatprep.subr.mxu1 %v8699_v16  ;;  %v9433_v16 = vld [vmem:[#allocation47_spill] sm:$0xff] }
 0x3dc   : > { %v8956_v23 = vpop.f32.mrf.mxu0 }
 0x3de   : > { %3899 = vmatpush1.xpose.msra.mxu1 %v8719_v26  ;;  %v9435_v26 = vld [vmem:[#allocation46_spill] sm:$0xff]  ;;  %v8958_v24 = vpop.f32.mrf.mxu0 }
 0x3df   : > { %3900 = vmatprep.subr.mxu1 %v8734_v29  ;;  %v3821_v19 = vpack.c.bf16 %v8958_v24, %v8954_v51 }
 0x3e0   : > { %v8962_v13 = vpop.f32.mrf.mxu0 }
 0x3e1   : > { %v3822_v6 = vpack.c.bf16 %v8962_v13, %v8956_v23 }
 0x3e2   : > { %3901 = vmatpush1.xpose.msra.mxu1 %v9422_v1  ;;  %v8966_v7 = vpop.f32.mrf.mxu0 }
 0x3e3   : > { %3902 = vmatprep.subr.mxu1 %v9423_v39 }
 0x3e4   : > { %v8968_v4 = vpop.f32.mrf.mxu0 }
 0x3e6   : > { %3903 = vmatpush1.xpose.msra.mxu1 %v9424_v40  ;;  %v8970_v57 = vpop.f32.mrf.mxu0 }
 0x3e7   : > { %3904 = vmatprep.subr.mxu1 %v9425_v41  ;;  %v3823_v28 = vpack.c.bf16 %v8970_v57, %v8966_v7 }
 0x3e8   : > { %v3668_v3 = vpop.f32.mrf.mxu0 }
 0x3e9   : > { %v3824_v2 = vpack.c.bf16 %v3668_v3, %v8968_v4 }
 0x3ea   : > { %3905 = vmatpush1.xpose.msra.mxu1 %v9426_v42 }
 0x3eb   : > { %3906 = vmatprep.subr.mxu1 %v9427_v46 }
 0x3ee   : > { %3907 = vmatpush1.xpose.msra.mxu1 %v9428_v47 }
 0x3ef   : > { %3908 = vmatprep.subr.mxu1 %v9429_v48 }
 0x3f2   : > { %3909 = vmatpush1.xpose.msra.mxu1 %v9430_v49 }
 0x3f3   : > { %3910 = vmatprep.subr.mxu1 %v9431_v56 }
 0x3f6   : > { %3911 = vmatpush1.xpose.msra.mxu1 %v9432_v58 }
 0x3f7   : > { %3912 = vmatprep.subr.mxu1 %v9433_v16 }
 0x3fa   : > { %3913 = vmatpush1.xpose.msra.mxu1 %v9434_v17 }
 0x3fb   : > { %3914 = vmatprep.subr.mxu1 %v9435_v26 }
 0x3fe   : > { %3915 = vmatpush1.xpose.msra.mxu1 %v9436_v27 }
 0x407   : > { %v2582_v29 = vpop.xlane.xlu1 %2581 }
 0x408   : > { %v2583_v43 = vsub.f32 %v8902_v5, %v2582_v29 }
 0x40a   : > { %v2584_v53 = vmul.f32 1.442695, %v2583_v43 }
 0x40c   : > { %7572 = vpow2.f32 %v2584_v53 }
 0x419   : > { %v8950_v52 = vpop.eup %7572 }
 0x41a   : > { %v2586_v59 = vsel %vm2579_vm0, %v8950_v52, 0.0 }
 0x41b   : > { %2587 = vadd.xlane.f32.xlu1 %v2586_v59 }
 0x42f   : > { %v3672_v5 = vpop.f32.mrf.mxu0 }
 0x431   : > { %v3674_v62 = vpop.f32.mrf.mxu0 }
 0x433   : > { %v3676_v32 = vpop.f32.mrf.mxu0 }
 0x434   : > { %v3825_v33 = vpack.c.bf16 %v3676_v32, %v3672_v5  ;;  %v7566_v32 = vld [vmem:[#allocation18 + $0x28] sm:$0xff]  }
 0x435   : > { %v3678_v34 = vpop.f32.mrf.mxu0 }
 0x436   : > { %v3826_v38 = vpack.c.bf16 %v3678_v34, %v3674_v62  ;;  %v7565_v62 = vld [vmem:[#allocation18 + $0x30] sm:$0xff]   ;;  %v7568_v34 = vld [vmem:[#allocation18 + $0x18] sm:$0xff]  }
 0x437   : > { %v3682_v35 = vpop.f32.mrf.mxu0 }
 0x439   : > { %v3684_v44 = vpop.f32.mrf.mxu0 }
 0x43b   : > { %v3686_v45 = vpop.f32.mrf.mxu0 }
 0x43c   : > { %v3827_v54 = vpack.c.bf16 %v3686_v45, %v3682_v35  ;;  %v7570_v35 = vld [vmem:[#allocation18 + $0x8] sm:$0xff]   ;;  %v8146_v45 = vmov 1.0  }
 0x43d   : > { %v3688_v61 = vpop.f32.mrf.mxu0  ;;  %3948 = vmatprep.mubr.f32.mxu1 %v8146_v45 }
 0x43e   : > { %v3828_v27 = vpack.c.bf16 %v3688_v61, %v3684_v44  ;;  %v7571_v44 = vld [vmem:[#allocation18] sm:$0xff]   ;;  %3949 = vmatmul.mubr.f32.vlgmr.msra.gmra.mxu1 %v8146_v45 }
 0x43f   : > { %v3692_v22 = vpop.f32.mrf.mxu0 }
 0x441   : > { %v3694_v25 = vpop.f32.mrf.mxu0 }
 0x443   : > { %v3696_v30 = vpop.f32.mrf.mxu0 }
 0x444   : > { %v3829_v26 = vpack.c.bf16 %v3696_v30, %v3692_v22 }
 0x445   : > { %v3698_v0 = vpop.f32.mrf.mxu0 }
 0x446   : > { %v3830_v17 = vpack.c.bf16 %v3698_v0, %v3694_v25 }
 0x447   : > { %v3702_v9 = vpop.f32.mrf.mxu0 }
 0x449   : > { %v3704_v10 = vpop.f32.mrf.mxu0 }
 0x44b   : > { %v3706_v36 = vpop.f32.mrf.mxu0 }
 0x44c   : > { %v3831_v16 = vpack.c.bf16 %v3706_v36, %v3702_v9 }
 0x44d   : > { %v3708_v37 = vpop.f32.mrf.mxu0 }
 0x44e   : > { %v3832_v58 = vpack.c.bf16 %v3708_v37, %v3704_v10 }
 0x44f   : > { %v3712_v50 = vpop.f32.mrf.mxu0 }
 0x451   : > { %v3714_v20 = vpop.f32.mrf.mxu0 }
 0x453   : > { %v3716_v12 = vpop.f32.mrf.mxu0 }
 0x454   : > { %v3833_v56 = vpack.c.bf16 %v3716_v12, %v3712_v50  ;;  %v6570_v50 = vld [vmem:[%s9298_s2 + $0xe] ss:$0 sm:$0xff] }
 0x455   : > { %v3718_v31 = vpop.f32.mrf.mxu0 }
 0x456   : > { %v3834_v48 = vpack.c.bf16 %v3718_v31, %v3714_v20 }
 0x457   : > { %v3722_v63 = vpop.f32.mrf.mxu0 }
 0x459   : > { %v3724_v40 = vpop.f32.mrf.mxu0 }
 0x45b   : > { %v3726_v42 = vpop.f32.mrf.mxu0 }
 0x45c   : > { %v3835_v46 = vpack.c.bf16 %v3726_v42, %v3722_v63 }
 0x45d   : > { %v3728_v47 = vpop.f32.mrf.mxu0 }
 0x45e   : > { %v3836_v49 = vpack.c.bf16 %v3728_v47, %v3724_v40 }
 0x460   : > { %3844 = vmatprep.subr.bf16.mxu0 %v3836_v49 }
 0x461   : > { %3845 = vmatpush1.bf16.xpose.msra.mxu0 %v3835_v46 }
 0x462   : > { %3846 = vmatprep.subr.bf16.mxu0 %v3834_v48 }
 0x469   : > { %3847 = vmatpush1.bf16.xpose.msra.mxu0 %v3833_v56 }
 0x46a   : > { %3848 = vmatprep.subr.bf16.mxu0 %v3832_v58 }
 0x471   : > { %3849 = vmatpush1.bf16.xpose.msra.mxu0 %v3831_v16 }
 0x472   : > { %3850 = vmatprep.subr.bf16.mxu0 %v3830_v17 }
 0x479   : > { %3851 = vmatpush1.bf16.xpose.msra.mxu0 %v3829_v26 }
 0x47a   : > { %3852 = vmatprep.subr.bf16.mxu0 %v3828_v27 }
 0x481   : > { %v3797_v60 = vpop.f32.mrf.mxu1  ;;  %3853 = vmatpush1.bf16.xpose.msra.mxu0 %v3827_v54  ;;  %v6569_v54 = vld [vmem:[%s9298_s2 + $0xd] ss:$0 sm:$0xff] }
 0x482   : > { %v3802_v1 = vmul.f32 0.088388346, %v3797_v60  ;;  %3854 = vmatprep.subr.bf16.mxu0 %v3826_v38  ;;  %v7569_v38 = vld [vmem:[#allocation18 + $0x10] sm:$0xff]  }
 0x483   : > { %v3799_v21 = vpop.f32.mrf.mxu1 }
 0x484   : > { %v3803_v39 = vmul.f32 0.088388346, %v3799_v21 }
 0x486   : > { %v3804_v41 = vmax.f32 %v3802_v1, %v3803_v39 }
 0x488   : > { %3805 = vmax.xlane.f32.xlu0 %v3804_v41 }
 0x489   : > { %3855 = vmatpush1.bf16.xpose.msra.mxu0 %v3825_v33  ;;  %v7567_v33 = vld [vmem:[#allocation18 + $0x20] sm:$0xff]  }
 0x48a   : > { %3856 = vmatprep.subr.bf16.mxu0 %v3824_v2 }
 0x491   : > { %3857 = vmatpush1.bf16.xpose.msra.mxu0 %v3823_v28 }
 0x492   : > { %3858 = vmatprep.subr.bf16.mxu0 %v3822_v6 }
 0x499   : > { %3859 = vmatpush1.bf16.xpose.msra.mxu0 %v3821_v19  ;;  %v7564_v19 = vld [vmem:[#allocation18 + $0x38] sm:$0xff]  }
 0x49a   : > { %6942 = vmatprep.subr.bf16.mxu0 %v8145_v18 }
 0x4a4   : > { %v2588_v29 = vpop.xlane.xlu1 %2587 }
 0x4a5   : > { %7574 = vrcp.f32 %v2588_v29 }
 0x4b2   : > { %v7575_v43 = vpop.eup %7574 }
 0x4b3   : > { %v2590_v53 = vmul.f32 %v7575_v43, %v8950_v52 }
 0x4b5   : > { %2591 = vst.msk [vmem:[#allocation2] sm:$0xff] %vm2579_vm0, %v2590_v53 }
 0x4fe   : > { %v3950_v10 = vpop.f32.mrf.mxu1 }
 0x4ff   : > { %v3954_v37 = vmul.f32 0.00390625, %v3950_v10 }
 0x500   : > { %v3952_v36 = vpop.f32.mrf.mxu1 }
 0x511   : > { %v3806_v59 = vpop.xlane.xlu0 %3805 }
 0x512   : > { %v3807_v7 = vsub.f32 %v3802_v1, %v3806_v59  ;;  %v3808_v4 = vsub.f32 %v3803_v39, %v3806_v59 }
 0x514   : > { %v3809_v57 = vmul.f32 1.442695, %v3807_v7  ;;  %v3811_v52 = vmul.f32 1.442695, %v3808_v4 }
 0x516   : > { %7576 = vpow2.f32 %v3809_v57 }
 0x517   : > { %7578 = vpow2.f32 %v3811_v52 }
 0x523   : > { %v7577_v3 = vpop.eup %7576 }
 0x524   : > { %v7579_v2 = vpop.eup %7578 }
 0x525   : > { %v3813_v28 = vadd.f32 %v7579_v2, %v7577_v3 }
 0x527   : > { %3814 = vadd.xlane.f32.xlu0 %v3813_v28 }
 0x5b0   : > { %v3815_v5 = vpop.xlane.xlu0 %3814 }
 0x5b1   : > { %7580 = vrcp.f32 %v3815_v5 }
 0x5be   : > { %v7581_v23 = vpop.eup %7580 }
 0x5bf   : > { %v3818_v13 = vmul.f32 %v7581_v23, %v7579_v2  ;;  %v3817_v6 = vmul.f32 %v7581_v23, %v7577_v3 }
 0x5c1   : > { %v3820_v51 = vpack.c.bf16 %v3818_v13, %v3818_v13  ;;  %v3819_v24 = vpack.c.bf16 %v3817_v6, %v3817_v6 }
 0x5c3   : > { %3876 = vmatprep.mubr.bf16.mxu0 %v3820_v51 }
 0x5c4   : > { %3877 = vmatmul.mubr.bf16.vlgmr.msra.gmra.mxu0 %v3819_v24 }
 0x5c5   : > { %6943 = vmatpush3.bf16.msra.mxu0 %v7564_v19  ;;  %6958 = vmatprep.mubr.msk.bf16.mxu0 %vm8147_vm1, %v8145_v18 }
 0x5c6   : > { %6944 = vmatprep.subr.bf16.mxu0 %v8145_v18 }
 0x5c9   : > { %6945 = vmatpush3.bf16.msra.mxu0 %v7565_v62 }
 0x5ca   : > { %6946 = vmatprep.subr.bf16.mxu0 %v8145_v18 }
 0x5cd   : > { %6947 = vmatpush3.bf16.msra.mxu0 %v7566_v32 }
 0x5ce   : > { %6948 = vmatprep.subr.bf16.mxu0 %v8145_v18 }
 0x5d1   : > { %6949 = vmatpush3.bf16.msra.mxu0 %v7567_v33 }
 0x5d2   : > { %6950 = vmatprep.subr.bf16.mxu0 %v8145_v18 }
 0x5d5   : > { %6951 = vmatpush3.bf16.msra.mxu0 %v7568_v34 }
 0x5d6   : > { %6952 = vmatprep.subr.bf16.mxu0 %v8145_v18 }
 0x5d9   : > { %6953 = vmatpush3.bf16.msra.mxu0 %v7569_v38 }
 0x5da   : > { %6954 = vmatprep.subr.bf16.mxu0 %v8145_v18 }
 0x5dd   : > { %6955 = vmatpush3.bf16.msra.mxu0 %v7570_v35 }
 0x5de   : > { %6956 = vmatprep.subr.bf16.mxu0 %v8145_v18  ;;  %v4070_v18 = vrot.slane %v3954_v37, %v8565_v55 }
 0x5e1   : > { %6957 = vmatpush3.bf16.msra.mxu0 %v7571_v44 }
 0x684   : > { %v3878_v61 = vpop.f32.mrf.mxu0 }
 0x685   : > { %v3879_v22 = vadd.f32 %v6569_v54, %v3878_v61 }
 0x686   : > { %v3880_v25 = vpop.f32.mrf.mxu0 }
 0x687   : > { %v3955_v30 = vpack.c.bf16 %v3879_v22, %v3879_v22 }
 0x688   : > { %v3881_v0 = vpop.f32.mrf.mxu0 }
 0x689   : > { %6959 = vmatmul.mubr.bf16.vlgmr.msra.gmra.mxu0 %v3955_v30 }
 0x68a   : > { %v3882_v9 = vpop.f32.mrf.mxu0 }
 0x749   : > { %v4061_v20 = vpop.f32.mrf.mxu0 }
 0x74a   : > { %v4062_v12 = vadd.f32 %v6570_v50, %v4061_v20 }
 0x74b   : > { %v6960_v60 = vpop.f32.mrf.mxu0 }
 0x74c   : > { %v4071_v31 = vadd.f32 %v4070_v18, %v4062_v12 }
 0x74d   : > { %v4064_v21 = vpop.f32.mrf.mxu0 }
 0x74e   : > { %4072 = vst [vmem:[#allocation20 + $0x40] sm:$0xff] %v4071_v31 }
 0x74f   : > { %v6961_v63 = vpop.f32.mrf.mxu0 }
 0x750 PF: > { %v7582_v1 = vld [vmem:[%s8478_s9 + $0x74] ss:$8 sps:$4 sm:$0xff]   ;;  %4926 = vmatprep.mubr.bf16.mxu1 %v8535_v11  ;;  %v7586_v40 = vld [vmem:[%s8478_s9 + $0x70] ss:$8 sps:$4 sm:$0xff]   ;;  %v7588_v42 = vld [vmem:[%s8478_s9 + $0x64] ss:$8 sps:$4 sm:$0xff]  }
 0x751   : > { %v7584_v55 = vld [vmem:[%s8478_s9 + $0x174] ss:$8 sps:$4 sm:$0xff]   ;;  %4853 = vmatprep.subr.bf16.mxu0 %v7582_v1  ;;  %v7587_v41 = vld [vmem:[%s8478_s9 + $0x170] ss:$8 sps:$4 sm:$0xff]   ;;  %v7590_v46 = vld [vmem:[%s8478_s9 + $0x164] ss:$8 sps:$4 sm:$0xff]  }
 0x752   : > { %4894 = vmatprep.subr.bf16.mxu1 %v7584_v55  ;;  %4854 = vmatpush1.bf16.msra.mxu0 %v7586_v40  ;;  %v7592_v47 = vld [vmem:[%s8478_s9 + $0x60] ss:$8 sps:$4 sm:$0xff]   ;;  %v7594_v11 = vld [vmem:[%s8478_s9 + $0x54] ss:$8 sps:$4 sm:$0xff]   ;;  %v7598_v56 = vld [vmem:[%s8478_s9 + $0x50] ss:$8 sps:$4 sm:$0xff]  }
 0x753   : > { %v9437_v39 = vld [vmem:[#allocation32_spill] sm:$0xff]  ;;  %4895 = vmatpush1.bf16.msra.mxu1 %v7587_v41  ;;  %4855 = vmatprep.subr.bf16.mxu0 %v7588_v42  ;;  %v7593_v48 = vld [vmem:[%s8478_s9 + $0x160] ss:$8 sps:$4 sm:$0xff]   ;;  %v7600_v16 = vld [vmem:[%s8478_s9 + $0x44] ss:$8 sps:$4 sm:$0xff]   ;;  %vm5025_vm2 = vcmask 1043456  }
 0x754   : > { %4885 = vmatprep.mubr.bf16.mxu0 %v9437_v39  ;;  %4896 = vmatprep.subr.bf16.mxu1 %v7590_v46  ;;  %v7596_v49 = vld [vmem:[%s8478_s9 + $0x154] ss:$8 sps:$4 sm:$0xff]   ;;  %v7599_v58 = vld [vmem:[%s8478_s9 + $0x150] ss:$8 sps:$4 sm:$0xff]   ;;  %v7602_v17 = vld [vmem:[%s8478_s9 + $0x144] ss:$8 sps:$4 sm:$0xff]  }
 0x755   : > { %v7604_v26 = vld [vmem:[%s8478_s9 + $0x40] ss:$8 sps:$4 sm:$0xff]   ;;  %v7606_v29 = vld [vmem:[%s8478_s9 + $0x34] ss:$8 sps:$4 sm:$0xff]   ;;  %v7610_v53 = vld [vmem:[%s8478_s9 + $0x30] ss:$8 sps:$4 sm:$0xff]  }
 0x756   : > { %4856 = vmatpush1.bf16.msra.mxu0 %v7592_v47  ;;  %v7605_v27 = vld [vmem:[%s8478_s9 + $0x140] ss:$8 sps:$4 sm:$0xff]   ;;  %v7608_v43 = vld [vmem:[%s8478_s9 + $0x134] ss:$8 sps:$4 sm:$0xff]   ;;  %v7611_v59 = vld [vmem:[%s8478_s9 + $0x130] ss:$8 sps:$4 sm:$0xff]  }
 0x757   : > { %4897 = vmatpush1.bf16.msra.mxu1 %v7593_v48  ;;  %4857 = vmatprep.subr.bf16.mxu0 %v7594_v11  ;;  %v7612_v7 = vld [vmem:[%s8478_s9 + $0x24] ss:$8 sps:$4 sm:$0xff]   ;;  %v7616_v57 = vld [vmem:[%s8478_s9 + $0x20] ss:$8 sps:$4 sm:$0xff]   ;;  %v7618_v3 = vld [vmem:[%s8478_s9 + $0x14] ss:$8 sps:$4 sm:$0xff]  }
 0x758   : > { %4898 = vmatprep.subr.bf16.mxu1 %v7596_v49  ;;  %v7614_v4 = vld [vmem:[%s8478_s9 + $0x124] ss:$8 sps:$4 sm:$0xff]   ;;  %v7617_v52 = vld [vmem:[%s8478_s9 + $0x120] ss:$8 sps:$4 sm:$0xff]   ;;  %v7620_v2 = vld [vmem:[%s8478_s9 + $0x114] ss:$8 sps:$4 sm:$0xff]  }
 0x759   : > { %v7622_v28 = vld [vmem:[%s8478_s9 + $0x10] ss:$8 sps:$4 sm:$0xff]   ;;  %v7624_v23 = vld [vmem:[%s8478_s9 + $0x4] ss:$8 sps:$4 sm:$0xff]   ;;  %v7628_v6 = vld [vmem:[%s8478_s9] ss:$8 sps:$4 sm:$0xff]  }
 0x75a   : > { %4858 = vmatpush1.bf16.msra.mxu0 %v7598_v56  ;;  %v7623_v5 = vld [vmem:[%s8478_s9 + $0x110] ss:$8 sps:$4 sm:$0xff]   ;;  %v7626_v13 = vld [vmem:[%s8478_s9 + $0x104] ss:$8 sps:$4 sm:$0xff]   ;;  %v7629_v51 = vld [vmem:[%s8478_s9 + $0x100] ss:$8 sps:$4 sm:$0xff]  }
 0x75b   : > { %4899 = vmatpush1.bf16.msra.mxu1 %v7599_v58  ;;  %4859 = vmatprep.subr.bf16.mxu0 %v7600_v16  ;;  %v7630_v24 = vld [vmem:[%s8478_s9 + $0xf4] ss:$8 sps:$4 sm:$0xff]   ;;  %v7634_v62 = vld [vmem:[%s8478_s9 + $0xf0] ss:$8 sps:$4 sm:$0xff]   ;;  %v7636_v33 = vld [vmem:[%s8478_s9 + $0xe4] ss:$8 sps:$4 sm:$0xff]  }
 0x75c   : > { %4900 = vmatprep.subr.bf16.mxu1 %v7602_v17  ;;  %v7632_v19 = vld [vmem:[%s8478_s9 + $0x1f4] ss:$8 sps:$4 sm:$0xff]   ;;  %v7635_v32 = vld [vmem:[%s8478_s9 + $0x1f0] ss:$8 sps:$4 sm:$0xff]   ;;  %v7638_v34 = vld [vmem:[%s8478_s9 + $0x1e4] ss:$8 sps:$4 sm:$0xff]  }
 0x75d   : > { %v7640_v38 = vld [vmem:[%s8478_s9 + $0xe0] ss:$8 sps:$4 sm:$0xff]   ;;  %v7642_v44 = vld [vmem:[%s8478_s9 + $0xd4] ss:$8 sps:$4 sm:$0xff]   ;;  %v7646_v54 = vld [vmem:[%s8478_s9 + $0xd0] ss:$8 sps:$4 sm:$0xff]  }
 0x75e   : > { %4860 = vmatpush1.bf16.msra.mxu0 %v7604_v26  ;;  %v7641_v35 = vld [vmem:[%s8478_s9 + $0x1e0] ss:$8 sps:$4 sm:$0xff]   ;;  %v7644_v45 = vld [vmem:[%s8478_s9 + $0x1d4] ss:$8 sps:$4 sm:$0xff]   ;;  %v7647_v61 = vld [vmem:[%s8478_s9 + $0x1d0] ss:$8 sps:$4 sm:$0xff]  }
 0x75f   : > { %4901 = vmatpush1.bf16.msra.mxu1 %v7605_v27  ;;  %4861 = vmatprep.subr.bf16.mxu0 %v7606_v29  ;;  %v7648_v22 = vld [vmem:[%s8478_s9 + $0xc4] ss:$8 sps:$4 sm:$0xff]   ;;  %v7652_v30 = vld [vmem:[%s8478_s9 + $0xc0] ss:$8 sps:$4 sm:$0xff]   ;;  %v7654_v9 = vld [vmem:[%s8478_s9 + $0xb4] ss:$8 sps:$4 sm:$0xff]  }
 0x760   : > { %4902 = vmatprep.subr.bf16.mxu1 %v7608_v43  ;;  %v7650_v25 = vld [vmem:[%s8478_s9 + $0x1c4] ss:$8 sps:$4 sm:$0xff]   ;;  %v7653_v0 = vld [vmem:[%s8478_s9 + $0x1c0] ss:$8 sps:$4 sm:$0xff]   ;;  %v7656_v10 = vld [vmem:[%s8478_s9 + $0x1b4] ss:$8 sps:$4 sm:$0xff]  }
 0x761   : > { %v7658_v36 = vld [vmem:[%s8478_s9 + $0xb0] ss:$8 sps:$4 sm:$0xff]   ;;  %v7660_v50 = vld [vmem:[%s8478_s9 + $0xa4] ss:$8 sps:$4 sm:$0xff]   ;;  %v7664_v20 = vld [vmem:[%s8478_s9 + $0xa0] ss:$8 sps:$4 sm:$0xff]  }
 0x762   : > { %4862 = vmatpush1.bf16.msra.mxu0 %v7610_v53  ;;  %v7659_v37 = vld [vmem:[%s8478_s9 + $0x1b0] ss:$8 sps:$4 sm:$0xff]   ;;  %v7662_v18 = vld [vmem:[%s8478_s9 + $0x1a4] ss:$8 sps:$4 sm:$0xff]   ;;  %v7665_v12 = vld [vmem:[%s8478_s9 + $0x1a0] ss:$8 sps:$4 sm:$0xff]  }
 0x763   : > { %4903 = vmatpush1.bf16.msra.mxu1 %v7611_v59  ;;  %4863 = vmatprep.subr.bf16.mxu0 %v7612_v7  ;;  %v7666_v60 = vld [vmem:[%s8478_s9 + $0x94] ss:$8 sps:$4 sm:$0xff]   ;;  %v7670_v21 = vld [vmem:[%s8478_s9 + $0x90] ss:$8 sps:$4 sm:$0xff]   ;;  %v7672_v1 = vld [vmem:[%s8478_s9 + $0x84] ss:$8 sps:$4 sm:$0xff]  }
 0x764   : > { %4904 = vmatprep.subr.bf16.mxu1 %v7614_v4  ;;  %v7668_v31 = vld [vmem:[%s8478_s9 + $0x194] ss:$8 sps:$4 sm:$0xff]   ;;  %v7671_v63 = vld [vmem:[%s8478_s9 + $0x190] ss:$8 sps:$4 sm:$0xff]   ;;  %v7674_v39 = vld [vmem:[%s8478_s9 + $0x184] ss:$8 sps:$4 sm:$0xff]  }
 0x765   : > { %v7676_v55 = vld [vmem:[%s8478_s9 + $0x80] ss:$8 sps:$4 sm:$0xff]   ;;  %v7680_v41 = vld [vmem:[%s8478_s9 + $0x274] ss:$8 sps:$4 sm:$0xff]   ;;  %v7678_v46 = vld [vmem:[%s8478_s9 + $0x270] ss:$8 sps:$4 sm:$0xff]  }
 0x766   : > { %4864 = vmatpush1.bf16.msra.mxu0 %v7616_v57  ;;  %v7677_v40 = vld [vmem:[%s8478_s9 + $0x180] ss:$8 sps:$4 sm:$0xff]   ;;  %v7683_v42 = vld [vmem:[%s8478_s9 + $0x374] ss:$8 sps:$4 sm:$0xff]   ;;  %v7681_v47 = vld [vmem:[%s8478_s9 + $0x370] ss:$8 sps:$4 sm:$0xff]  }
 0x767   : > { %4905 = vmatpush1.bf16.msra.mxu1 %v7617_v52  ;;  %4865 = vmatprep.subr.bf16.mxu0 %v7618_v3  ;;  %v7686_v48 = vld [vmem:[%s8478_s9 + $0x264] ss:$8 sps:$4 sm:$0xff]   ;;  %v7684_v56 = vld [vmem:[%s8478_s9 + $0x260] ss:$8 sps:$4 sm:$0xff]   ;;  %v7692_v16 = vld [vmem:[%s8478_s9 + $0x254] ss:$8 sps:$4 sm:$0xff]  }
 0x768   : > { %4906 = vmatprep.subr.bf16.mxu1 %v7620_v2  ;;  %v7689_v11 = vld [vmem:[%s8478_s9 + $0x364] ss:$8 sps:$4 sm:$0xff]   ;;  %v7687_v58 = vld [vmem:[%s8478_s9 + $0x360] ss:$8 sps:$4 sm:$0xff]   ;;  %v7695_v17 = vld [vmem:[%s8478_s9 + $0x354] ss:$8 sps:$4 sm:$0xff]  }
 0x769   : > { %v9438_v49 = vld [vmem:[#allocation31_spill] sm:$0xff]  ;;  %v9439_v26 = vld [vmem:[#allocation34_spill] sm:$0xff]  ;;  %v7707_v7 = vld [vmem:[%s8478_s9 + $0x334] ss:$8 sps:$4 sm:$0xff]   ;;  %vm5021_vm3 = vcmask 64512   ;;  %p7047_p2 = scmp.eq.s32.totalorder %s8236_s27, 3 }
 0x76a   : > { %4866 = vmatpush1.bf16.msra.mxu0 %v7622_v28  ;;  %v7690_v27 = vld [vmem:[%s8478_s9 + $0x250] ss:$8 sps:$4 sm:$0xff]   ;;  %v7698_v29 = vld [vmem:[%s8478_s9 + $0x244] ss:$8 sps:$4 sm:$0xff]   ;;  %v7696_v53 = vld [vmem:[%s8478_s9 + $0x240] ss:$8 sps:$4 sm:$0xff]  }
 0x76b   : > { %4907 = vmatpush1.bf16.msra.mxu1 %v7623_v5  ;;  %4867 = vmatprep.subr.bf16.mxu0 %v7624_v23  ;;  %v7701_v43 = vld [vmem:[%s8478_s9 + $0x344] ss:$8 sps:$4 sm:$0xff]   ;;  %v7699_v59 = vld [vmem:[%s8478_s9 + $0x340] ss:$8 sps:$4 sm:$0xff]   ;;  %v7702_v4 = vld [vmem:[%s8478_s9 + $0x230] ss:$8 sps:$4 sm:$0xff]  }
 0x76c   : > { %4908 = vmatprep.subr.bf16.mxu1 %v7626_v13  ;;  %v7705_v57 = vld [vmem:[%s8478_s9 + $0x330] ss:$8 sps:$4 sm:$0xff]   ;;  %v7710_v52 = vld [vmem:[%s8478_s9 + $0x224] ss:$8 sps:$4 sm:$0xff]   ;;  %v7708_v2 = vld [vmem:[%s8478_s9 + $0x220] ss:$8 sps:$4 sm:$0xff]  }
 0x76d   : > { %v7713_v3 = vld [vmem:[%s8478_s9 + $0x324] ss:$8 sps:$4 sm:$0xff]   ;;  %v7711_v28 = vld [vmem:[%s8478_s9 + $0x320] ss:$8 sps:$4 sm:$0xff]   ;;  %v7716_v5 = vld [vmem:[%s8478_s9 + $0x214] ss:$8 sps:$4 sm:$0xff]  }
 0x76e   : > { %4868 = vmatpush1.bf16.msra.mxu0 %v7628_v6  ;;  %v7719_v23 = vld [vmem:[%s8478_s9 + $0x314] ss:$8 sps:$4 sm:$0xff]   ;;  %v7714_v13 = vld [vmem:[%s8478_s9 + $0x210] ss:$8 sps:$4 sm:$0xff]  }
 0x76f   : > { %4909 = vmatpush1.bf16.msra.mxu1 %v7629_v51  ;;  %4869 = vmatprep.subr.bf16.mxu0 %v7630_v24  ;;  %v7717_v6 = vld [vmem:[%s8478_s9 + $0x310] ss:$8 sps:$4 sm:$0xff]   ;;  %v7722_v51 = vld [vmem:[%s8478_s9 + $0x204] ss:$8 sps:$4 sm:$0xff]  }
 0x770   : > { %4910 = vmatprep.subr.bf16.mxu1 %v7632_v19  ;;  %v7725_v24 = vld [vmem:[%s8478_s9 + $0x304] ss:$8 sps:$4 sm:$0xff]   ;;  %v7720_v19 = vld [vmem:[%s8478_s9 + $0x200] ss:$8 sps:$4 sm:$0xff]  }
 0x772   : > { %4870 = vmatpush2.bf16.msra.mxu0 %v7634_v62  ;;  %v7723_v62 = vld [vmem:[%s8478_s9 + $0x300] ss:$8 sps:$4 sm:$0xff]  }
 0x773   : > { %4911 = vmatpush2.bf16.msra.mxu1 %v7635_v32  ;;  %4871 = vmatprep.subr.bf16.mxu0 %v7636_v33  ;;  %v7728_v32 = vld [vmem:[%s8478_s9 + $0x2f4] ss:$8 sps:$4 sm:$0xff]  }
 0x774   : > { %4912 = vmatprep.subr.bf16.mxu1 %v7638_v34  ;;  %v7731_v33 = vld [vmem:[%s8478_s9 + $0x3f4] ss:$8 sps:$4 sm:$0xff]   ;;  %v7726_v34 = vld [vmem:[%s8478_s9 + $0x2f0] ss:$8 sps:$4 sm:$0xff]  }
 0x776   : > { %4872 = vmatpush2.bf16.msra.mxu0 %v7640_v38  ;;  %v7729_v38 = vld [vmem:[%s8478_s9 + $0x3f0] ss:$8 sps:$4 sm:$0xff]  }
 0x777   : > { %4913 = vmatpush2.bf16.msra.mxu1 %v7641_v35  ;;  %4873 = vmatprep.subr.bf16.mxu0 %v7642_v44  ;;  %v7734_v35 = vld [vmem:[%s8478_s9 + $0x2e4] ss:$8 sps:$4 sm:$0xff]  }
 0x778   : > { %4914 = vmatprep.subr.bf16.mxu1 %v7644_v45  ;;  %v7737_v44 = vld [vmem:[%s8478_s9 + $0x3e4] ss:$8 sps:$4 sm:$0xff]   ;;  %v7732_v45 = vld [vmem:[%s8478_s9 + $0x2e0] ss:$8 sps:$4 sm:$0xff]  }
 0x77a   : > { %4874 = vmatpush2.bf16.msra.mxu0 %v7646_v54  ;;  %v7735_v54 = vld [vmem:[%s8478_s9 + $0x3e0] ss:$8 sps:$4 sm:$0xff]  }
 0x77b   : > { %4915 = vmatpush2.bf16.msra.mxu1 %v7647_v61  ;;  %4875 = vmatprep.subr.bf16.mxu0 %v7648_v22  ;;  %v7740_v61 = vld [vmem:[%s8478_s9 + $0x2d4] ss:$8 sps:$4 sm:$0xff]  }
 0x77c   : > { %4916 = vmatprep.subr.bf16.mxu1 %v7650_v25  ;;  %v7743_v22 = vld [vmem:[%s8478_s9 + $0x3d4] ss:$8 sps:$4 sm:$0xff]   ;;  %v7738_v25 = vld [vmem:[%s8478_s9 + $0x2d0] ss:$8 sps:$4 sm:$0xff]  }
 0x77e   : > { %4876 = vmatpush2.bf16.msra.mxu0 %v7652_v30  ;;  %v7741_v30 = vld [vmem:[%s8478_s9 + $0x3d0] ss:$8 sps:$4 sm:$0xff]  }
 0x77f   : > { %4917 = vmatpush2.bf16.msra.mxu1 %v7653_v0  ;;  %4877 = vmatprep.subr.bf16.mxu0 %v7654_v9  ;;  %v7746_v0 = vld [vmem:[%s8478_s9 + $0x2c4] ss:$8 sps:$4 sm:$0xff]  }
 0x780   : > { %4918 = vmatprep.subr.bf16.mxu1 %v7656_v10  ;;  %v7749_v9 = vld [vmem:[%s8478_s9 + $0x3c4] ss:$8 sps:$4 sm:$0xff]   ;;  %v7744_v10 = vld [vmem:[%s8478_s9 + $0x2c0] ss:$8 sps:$4 sm:$0xff]  }
 0x782   : > { %4878 = vmatpush2.bf16.msra.mxu0 %v7658_v36  ;;  %v7747_v36 = vld [vmem:[%s8478_s9 + $0x3c0] ss:$8 sps:$4 sm:$0xff]  }
 0x783   : > { %4919 = vmatpush2.bf16.msra.mxu1 %v7659_v37  ;;  %4879 = vmatprep.subr.bf16.mxu0 %v7660_v50  ;;  %v7752_v37 = vld [vmem:[%s8478_s9 + $0x2b4] ss:$8 sps:$4 sm:$0xff]  }
 0x784   : > { %4920 = vmatprep.subr.bf16.mxu1 %v7662_v18  ;;  %v7755_v50 = vld [vmem:[%s8478_s9 + $0x3b4] ss:$8 sps:$4 sm:$0xff]   ;;  %v7750_v18 = vld [vmem:[%s8478_s9 + $0x2b0] ss:$8 sps:$4 sm:$0xff]  }
 0x786   : > { %4880 = vmatpush2.bf16.msra.mxu0 %v7664_v20  ;;  %v7753_v20 = vld [vmem:[%s8478_s9 + $0x3b0] ss:$8 sps:$4 sm:$0xff]  }
 0x787   : > { %4921 = vmatpush2.bf16.msra.mxu1 %v7665_v12  ;;  %4881 = vmatprep.subr.bf16.mxu0 %v7666_v60  ;;  %v7758_v12 = vld [vmem:[%s8478_s9 + $0x2a4] ss:$8 sps:$4 sm:$0xff]  }
 0x788   : > { %4922 = vmatprep.subr.bf16.mxu1 %v7668_v31  ;;  %v7761_v60 = vld [vmem:[%s8478_s9 + $0x3a4] ss:$8 sps:$4 sm:$0xff]   ;;  %v7756_v31 = vld [vmem:[%s8478_s9 + $0x2a0] ss:$8 sps:$4 sm:$0xff]  }
 0x78a   : > { %4882 = vmatpush2.bf16.msra.mxu0 %v7670_v21  ;;  %v7759_v21 = vld [vmem:[%s8478_s9 + $0x3a0] ss:$8 sps:$4 sm:$0xff]  }
 0x78b   : > { %4923 = vmatpush2.bf16.msra.mxu1 %v7671_v63  ;;  %4883 = vmatprep.subr.bf16.mxu0 %v7672_v1  ;;  %v7764_v63 = vld [vmem:[%s8478_s9 + $0x294] ss:$8 sps:$4 sm:$0xff]  }
 0x78c   : > { %4924 = vmatprep.subr.bf16.mxu1 %v7674_v39  ;;  %v7767_v1 = vld [vmem:[%s8478_s9 + $0x394] ss:$8 sps:$4 sm:$0xff]   ;;  %v7762_v39 = vld [vmem:[%s8478_s9 + $0x290] ss:$8 sps:$4 sm:$0xff]  }
 0x78e   : > { %4884 = vmatpush2.bf16.msra.mxu0 %v7676_v55  ;;  %v7765_v55 = vld [vmem:[%s8478_s9 + $0x390] ss:$8 sps:$4 sm:$0xff]  }
 0x78f   : > { %4925 = vmatpush2.bf16.msra.mxu1 %v7677_v40  ;;  %4935 = vmatprep.subr.bf16.mxu0 %v7680_v41  ;;  %v7770_v40 = vld [vmem:[%s8478_s9 + $0x284] ss:$8 sps:$4 sm:$0xff]  }
 0x790   : > { %4976 = vmatprep.subr.bf16.mxu1 %v7683_v42  ;;  %v7773_v41 = vld [vmem:[%s8478_s9 + $0x384] ss:$8 sps:$4 sm:$0xff]   ;;  %v7768_v42 = vld [vmem:[%s8478_s9 + $0x280] ss:$8 sps:$4 sm:$0xff]  }
 0x791   : > { %4886 = vmatmul.mubr.bf16.vlgmr.msra.gmra.mxu0 %v9438_v49  ;;  %v5135_v49 = vld [vmem:[%s8487_s17 + $0x1e0] sm:$0xff] }
 0x792   : > { %4927 = vmatmul.mubr.bf16.vlgmr.msra.gmra.mxu1 %v8527_v8  ;;  %4936 = vmatpush1.bf16.msra.mxu0 %v7678_v46  ;;  %v7693_v8 = vld [vmem:[%s8478_s9 + $0x350] ss:$8 sps:$4 sm:$0xff]   ;;  %v7771_v46 = vld [vmem:[%s8478_s9 + $0x380] ss:$8 sps:$4 sm:$0xff]  }
 0x793   : > { %4977 = vmatpush1.bf16.msra.mxu1 %v7681_v47  ;;  %4937 = vmatprep.subr.bf16.mxu0 %v7686_v48  ;;  %v9440_v47 = vld [vmem:[#allocation33_spill] sm:$0xff]  ;;  %v8148_v48 = vmov 0  }
 0x794   : > { %4978 = vmatprep.subr.bf16.mxu1 %v7689_v11  ;;  %4967 = vmatprep.mubr.bf16.mxu0 %v9439_v26  ;;  %v5131_v11 = vld [vmem:[%s8487_s17 + $0x1c0] sm:$0xff] }
 0x795   : > { %5008 = vmatprep.mubr.bf16.mxu1 %v8551_v15  ;;  %v7704_v15 = vld [vmem:[%s8478_s9 + $0x234] ss:$8 sps:$4 sm:$0xff]   ;;  %s8149_s9 = smov [#allocation20]  }
 0x796   : > { %4938 = vmatpush1.bf16.msra.mxu0 %v7684_v56  ;;  %v6765_v56 = vcombine.low %v5131_v11, %v5135_v49  ;;  %s6038_s18 = sshll.u32 %s8149_s9, 4  ;;  %s6039_s18 = int_to_ptr.vmem [resolvable:$true] %s6038_s18 }
 0x797   : > { %4979 = vmatpush1.bf16.msra.mxu1 %v7687_v58  ;;  %4939 = vmatprep.subr.bf16.mxu0 %v7692_v16  ;;  %v6766_v58 = vcombine.high %v5131_v11, %v5135_v49  ;;  %v5123_v16 = vld [vmem:[%s8487_s17 + $0x180] sm:$0xff]  ;;  %p8047_p8 = scmp.lt.s32.totalorder %s6039_s18, %s6039_s18 }
 0x798   : > { %4980 = vmatprep.subr.bf16.mxu1 %v7695_v17  ;;  %v5127_v17 = vld [vmem:[%s8487_s17 + $0x1a0] sm:$0xff] }
 0x799   : > { %v6758_v26 = vcombine.high %v5123_v16, %v5127_v17 }
 0x79a   : > { %4940 = vmatpush1.bf16.msra.mxu0 %v7690_v27  ;;  %v6757_v27 = vcombine.low %v5123_v16, %v5127_v17  ;;  %v4203_v16 = vlaneseq }
 0x79b   : > { %4981 = vmatpush1.bf16.msra.mxu1 %v7693_v8  ;;  %4941 = vmatprep.subr.bf16.mxu0 %v7698_v29  ;;  %v5115_v8 = vld [vmem:[%s8487_s17 + $0x140] sm:$0xff] }
 0x79c   : > { %4982 = vmatprep.subr.bf16.mxu1 %v7701_v43  ;;  %v5119_v29 = vld [vmem:[%s8487_s17 + $0x160] sm:$0xff]  ;;  %v4204_v17 = vshrl.u32 %v4203_v16, 7  ;;  %v5192_v16 = vld [vmem:[%s8487_s17 + $0x3a8] sm:$0xff] }
 0x79d   : > { %v6749_v43 = vcombine.low %v5115_v8, %v5119_v29 }
 0x79e   : > { %4942 = vmatpush1.bf16.msra.mxu0 %v7696_v53  ;;  %v5107_v53 = vld [vmem:[%s8487_s17 + $0x100] sm:$0xff] }
 0x79f   : > { %4983 = vmatpush1.bf16.msra.mxu1 %v7699_v59  ;;  %4943 = vmatprep.subr.bf16.mxu0 %v7704_v15  ;;  %v5111_v59 = vld [vmem:[%s8487_s17 + $0x120] sm:$0xff] }
 0x7a0   : > { %4984 = vmatprep.subr.bf16.mxu1 %v7707_v7  ;;  %v6742_v15 = vcombine.high %v5107_v53, %v5111_v59  ;;  %v6741_v7 = vcombine.low %v5107_v53, %v5111_v59 }
 0x7a2   : > { %4944 = vmatpush1.bf16.msra.mxu0 %v7702_v4  ;;  %v5099_v4 = vld [vmem:[%s8487_s17 + $0xc0] sm:$0xff] }
 0x7a3   : > { %4985 = vmatpush1.bf16.msra.mxu1 %v7705_v57  ;;  %4945 = vmatprep.subr.bf16.mxu0 %v7710_v52  ;;  %v5103_v57 = vld [vmem:[%s8487_s17 + $0xe0] sm:$0xff] }
 0x7a4   : > { %4986 = vmatprep.subr.bf16.mxu1 %v7713_v3  ;;  %v6734_v52 = vcombine.high %v5099_v4, %v5103_v57  ;;  %v6733_v3 = vcombine.low %v5099_v4, %v5103_v57 }
 0x7a6   : > { %4946 = vmatpush1.bf16.msra.mxu0 %v7708_v2  ;;  %v5091_v2 = vld [vmem:[%s8487_s17 + $0x80] sm:$0xff] }
 0x7a7   : > { %4987 = vmatpush1.bf16.msra.mxu1 %v7711_v28  ;;  %4947 = vmatprep.subr.bf16.mxu0 %v7716_v5  ;;  %v5095_v28 = vld [vmem:[%s8487_s17 + $0xa0] sm:$0xff] }
 0x7a8   : > { %4988 = vmatprep.subr.bf16.mxu1 %v7719_v23  ;;  %v6726_v5 = vcombine.high %v5091_v2, %v5095_v28  ;;  %v6725_v23 = vcombine.low %v5091_v2, %v5095_v28 }
 0x7aa   : > { %4948 = vmatpush1.bf16.msra.mxu0 %v7714_v13  ;;  %v5083_v13 = vld [vmem:[%s8487_s17 + $0x40] sm:$0xff] }
 0x7ab   : > { %4989 = vmatpush1.bf16.msra.mxu1 %v7717_v6  ;;  %4949 = vmatprep.subr.bf16.mxu0 %v7722_v51  ;;  %v5087_v6 = vld [vmem:[%s8487_s17 + $0x60] sm:$0xff] }
 0x7ac   : > { %4990 = vmatprep.subr.bf16.mxu1 %v7725_v24  ;;  %v6718_v51 = vcombine.high %v5083_v13, %v5087_v6  ;;  %v6717_v24 = vcombine.low %v5083_v13, %v5087_v6  ;;  %v5132_v13 = vld [vmem:[%s8487_s17 + $0x1c8] sm:$0xff] }
 0x7ad   : > { %v5136_v6 = vld [vmem:[%s8487_s17 + $0x1e8] sm:$0xff] }
 0x7ae   : > { %4950 = vmatpush1.bf16.msra.mxu0 %v7720_v19  ;;  %v5075_v19 = vld [vmem:[%s8487_s17] sm:$0xff] }
 0x7af   : > { %4991 = vmatpush1.bf16.msra.mxu1 %v7723_v62  ;;  %4951 = vmatprep.subr.bf16.mxu0 %v7728_v32  ;;  %v5079_v62 = vld [vmem:[%s8487_s17 + $0x20] sm:$0xff] }
 0x7b0   : > { %4992 = vmatprep.subr.bf16.mxu1 %v7731_v33  ;;  %v6710_v32 = vcombine.high %v5075_v19, %v5079_v62  ;;  %v6709_v33 = vcombine.low %v5075_v19, %v5079_v62 }
 0x7b2   : > { %4952 = vmatpush2.bf16.msra.mxu0 %v7726_v34  ;;  %v5195_v34 = vld [vmem:[%s8487_s17 + $0x3c0] sm:$0xff] }
 0x7b3   : > { %4993 = vmatpush2.bf16.msra.mxu1 %v7729_v38  ;;  %4953 = vmatprep.subr.bf16.mxu0 %v7734_v35  ;;  %v5199_v38 = vld [vmem:[%s8487_s17 + $0x3e0] sm:$0xff] }
 0x7b4   : > { %4994 = vmatprep.subr.bf16.mxu1 %v7737_v44  ;;  %v6830_v35 = vcombine.high %v5195_v34, %v5199_v38  ;;  %v6829_v44 = vcombine.low %v5195_v34, %v5199_v38  ;;  %v6768_v34 = vcombine.high %v5132_v13, %v5136_v6  ;;  %v5124_v38 = vld [vmem:[%s8487_s17 + $0x188] sm:$0xff] }
 0x7b6   : > { %4954 = vmatpush2.bf16.msra.mxu0 %v7732_v45  ;;  %v5187_v45 = vld [vmem:[%s8487_s17 + $0x380] sm:$0xff] }
 0x7b7   : > { %4995 = vmatpush2.bf16.msra.mxu1 %v7735_v54  ;;  %4955 = vmatprep.subr.bf16.mxu0 %v7740_v61  ;;  %v5191_v54 = vld [vmem:[%s8487_s17 + $0x3a0] sm:$0xff] }
 0x7b8   : > { %4996 = vmatprep.subr.bf16.mxu1 %v7743_v22  ;;  %v6822_v61 = vcombine.high %v5187_v45, %v5191_v54  ;;  %v6821_v22 = vcombine.low %v5187_v45, %v5191_v54  ;;  %v6767_v54 = vcombine.low %v5132_v13, %v5136_v6  ;;  %v5152_v13 = vld [vmem:[%s8487_s17 + $0x268] sm:$0xff] }
 0x7ba   : > { %4956 = vmatpush2.bf16.msra.mxu0 %v7738_v25  ;;  %v5179_v25 = vld [vmem:[%s8487_s17 + $0x340] sm:$0xff] }
 0x7bb   : > { %4997 = vmatpush2.bf16.msra.mxu1 %v7741_v30  ;;  %4957 = vmatprep.subr.bf16.mxu0 %v7746_v0  ;;  %v5183_v30 = vld [vmem:[%s8487_s17 + $0x360] sm:$0xff] }
 0x7bc   : > { %4998 = vmatprep.subr.bf16.mxu1 %v7749_v9  ;;  %v6814_v0 = vcombine.high %v5179_v25, %v5183_v30  ;;  %v6813_v9 = vcombine.low %v5179_v25, %v5183_v30  ;;  %v5120_v25 = vld [vmem:[%s8487_s17 + $0x168] sm:$0xff] }
 0x7be   : > { %4958 = vmatpush2.bf16.msra.mxu0 %v7744_v10  ;;  %v5171_v10 = vld [vmem:[%s8487_s17 + $0x300] sm:$0xff] }
 0x7bf   : > { %4999 = vmatpush2.bf16.msra.mxu1 %v7747_v36  ;;  %4959 = vmatprep.subr.bf16.mxu0 %v7752_v37  ;;  %v5175_v36 = vld [vmem:[%s8487_s17 + $0x320] sm:$0xff] }
 0x7c0   : > { %5000 = vmatprep.subr.bf16.mxu1 %v7755_v50  ;;  %v6806_v37 = vcombine.high %v5171_v10, %v5175_v36  ;;  %v6805_v50 = vcombine.low %v5171_v10, %v5175_v36  ;;  %v5112_v10 = vld [vmem:[%s8487_s17 + $0x128] sm:$0xff] }
 0x7c2   : > { %4960 = vmatpush2.bf16.msra.mxu0 %v7750_v18  ;;  %v5163_v18 = vld [vmem:[%s8487_s17 + $0x2c0] sm:$0xff] }
 0x7c3   : > { %5001 = vmatpush2.bf16.msra.mxu1 %v7753_v20  ;;  %4961 = vmatprep.subr.bf16.mxu0 %v7758_v12  ;;  %v5167_v20 = vld [vmem:[%s8487_s17 + $0x2e0] sm:$0xff] }
 0x7c4   : > { %5002 = vmatprep.subr.bf16.mxu1 %v7761_v60  ;;  %v6798_v12 = vcombine.high %v5163_v18, %v5167_v20  ;;  %v6797_v60 = vcombine.low %v5163_v18, %v5167_v20  ;;  %v5104_v18 = vld [vmem:[%s8487_s17 + $0xe8] sm:$0xff] }
 0x7c6   : > { %4962 = vmatpush2.bf16.msra.mxu0 %v7756_v31  ;;  %v5155_v31 = vld [vmem:[%s8487_s17 + $0x280] sm:$0xff] }
 0x7c7   : > { %5003 = vmatpush2.bf16.msra.mxu1 %v7759_v21  ;;  %4963 = vmatprep.subr.bf16.mxu0 %v7764_v63  ;;  %v5159_v21 = vld [vmem:[%s8487_s17 + $0x2a0] sm:$0xff] }
 0x7c8   : > { %5004 = vmatprep.subr.bf16.mxu1 %v7767_v1  ;;  %v6790_v63 = vcombine.high %v5155_v31, %v5159_v21 }
 0x7ca   : > { %4964 = vmatpush2.bf16.msra.mxu0 %v7762_v39 }
 0x7cb   : > { %5005 = vmatpush2.bf16.msra.mxu1 %v7765_v55  ;;  %4965 = vmatprep.subr.bf16.mxu0 %v7770_v40  ;;  %v6789_v55 = vcombine.low %v5155_v31, %v5159_v21  ;;  %v5096_v31 = vld [vmem:[%s8487_s17 + $0xa8] sm:$0xff] }
 0x7cc   : > { %5006 = vmatprep.subr.bf16.mxu1 %v7773_v41 }
 0x7ce   : > { %4966 = vmatpush2.bf16.msra.mxu0 %v7768_v42  ;;  %v5147_v42 = vld [vmem:[%s8487_s17 + $0x240] sm:$0xff] }
 0x7cf   : > { %5007 = vmatpush2.bf16.msra.mxu1 %v7771_v46  ;;  %v5151_v46 = vld [vmem:[%s8487_s17 + $0x260] sm:$0xff] }
 0x7d0   : > { %5843 = vmatprep.subr.bf16.mxu1 %v6766_v58  ;;  %v6781_v49 = vcombine.low %v5147_v42, %v5151_v46 }
 0x7d1   : > { %4968 = vmatmul.mubr.bf16.vlgmr.msra.gmra.mxu0 %v9440_v47  ;;  %v6782_v47 = vcombine.high %v5147_v42, %v5151_v46  ;;  %v5080_v42 = vld [vmem:[%s8487_s17 + $0x28] sm:$0xff] }
 0x7d2   : > { %5009 = vmatmul.mubr.bf16.vlgmr.msra.gmra.mxu1 %v8547_v14  ;;  %5064 = vmatprep.mubr.bf16.mxu0 %v8148_v48  ;;  %v6750_v14 = vcombine.high %v5115_v8, %v5119_v29  ;;  %v4209_v8 = vsub.s32 1, %v4204_v17 }
 0x7d3   : > { %5844 = vmatpush1.bf16.msra.mxu1 %v6765_v56 }
 0x7d4   : > { %5845 = vmatprep.subr.bf16.mxu1 %v6758_v26  ;;  %v4205_v26 = vsub.s32 0, %v4204_v17 }
 0x7d7   : > { %5846 = vmatpush1.bf16.msra.mxu1 %v6757_v27  ;;  %v4201_v27 = vld [vmem:[%s525_s16] sm:$0x3]  ;;  %s8040_s16 = scalar_lea.vmem %s6039_s18, 1152 }
 0x7d8   : > { %5847 = vmatprep.subr.bf16.mxu1 %v6750_v14  ;;  %v4206_v29 = vrot.slane %v4201_v27, %v4205_v26  ;;  %v4210_v14 = vrot.slane %v4201_v27, %v4209_v8  ;;  %v5180_v27 = vld [vmem:[%s8487_s17 + $0x348] sm:$0xff]  ;;  %p8041_p11 = scmp.ne.s32.totalorder %s6039_s18, %s8040_s16  ;;  %p8048_p10 = scmp.lt.s32.totalorder %s8040_s16, %s8040_s16 }
 0x7d9   : > { %v5184_v8 = vld [vmem:[%s8487_s17 + $0x368] sm:$0xff] }
 0x7da   : > { %p8042_p13 = pnand %p8041_p11, %p7047_p2  ;;  %p8049_p7 = por %p8048_p10, %p8047_p8 }
 0x7db   : > { %5848 = vmatpush1.bf16.msra.mxu1 %v6749_v43 }
 0x7dc   : > { %5849 = vmatprep.subr.bf16.mxu1 %v6742_v15  ;;  %p8043_p0 = pneg %p8042_p13 }
 0x7de   : > { %p8050_p12 = pnand %p8049_p7, %p8043_p0 }
 0x7df   : > { %5850 = vmatpush1.bf16.msra.mxu1 %v6741_v7 }
 0x7e0   : > { %5851 = vmatprep.subr.bf16.mxu1 %v6734_v52 }
 0x7e3   : > { %5852 = vmatpush1.bf16.msra.mxu1 %v6733_v3 }
 0x7e4   : > { %5853 = vmatprep.subr.bf16.mxu1 %v6726_v5 }
 0x7e7   : > { %5854 = vmatpush1.bf16.msra.mxu1 %v6725_v23 }
 0x7e8   : > { %5855 = vmatprep.subr.bf16.mxu1 %v6718_v51 }
 0x7eb   : > { %5856 = vmatpush1.bf16.msra.mxu1 %v6717_v24 }
 0x7ec   : > { %5857 = vmatprep.subr.bf16.mxu1 %v6710_v32  ;;  %v5017_v32 = vld [vmem:[#allocation2] sm:$0xff] }
 0x7ed   : > { %v5018_v45 = vpack.c.bf16 %v5017_v32, %v5017_v32  ;;  %v5140_v32 = vld [vmem:[%s8487_s17 + $0x208] sm:$0xff] }
 0x7ef   : > { %5858 = vmatpush1.bf16.msra.mxu1 %v6709_v33 }
 0x7f0   : > { %5859 = vmatprep.subr.bf16.mxu1 %v6830_v35  ;;  %v5128_v35 = vld [vmem:[%s8487_s17 + $0x1a8] sm:$0xff] }
 0x7f1   : > { %v6759_v30 = vcombine.low %v5124_v38, %v5128_v35 }
 0x7f3   : > { %5860 = vmatpush2.bf16.msra.mxu1 %v6829_v44 }
 0x7f4   : > { %5861 = vmatprep.subr.bf16.mxu1 %v6822_v61  ;;  %v6760_v61 = vcombine.high %v5124_v38, %v5128_v35 }
 0x7f7   : > { %5862 = vmatpush2.bf16.msra.mxu1 %v6821_v22  ;;  %v5116_v22 = vld [vmem:[%s8487_s17 + $0x148] sm:$0xff] }
 0x7f8   : > { %5863 = vmatprep.subr.bf16.mxu1 %v6814_v0  ;;  %v6752_v0 = vcombine.high %v5116_v22, %v5120_v25  ;;  %v6751_v36 = vcombine.low %v5116_v22, %v5120_v25  ;;  %v5138_v25 = vld [vmem:[%s8487_s17 + $0x1f8] sm:$0xff] }
 0x7fb   : > { %5864 = vmatpush2.bf16.msra.mxu1 %v6813_v9  ;;  %v5108_v9 = vld [vmem:[%s8487_s17 + $0x108] sm:$0xff] }
 0x7fc   : > { %5865 = vmatprep.subr.bf16.mxu1 %v6806_v37  ;;  %v6744_v37 = vcombine.high %v5108_v9, %v5112_v10  ;;  %v6743_v20 = vcombine.low %v5108_v9, %v5112_v10 }
 0x7ff   : > { %5866 = vmatpush2.bf16.msra.mxu1 %v6805_v50  ;;  %v5100_v50 = vld [vmem:[%s8487_s17 + $0xc8] sm:$0xff] }
 0x800   : > { %5867 = vmatprep.subr.bf16.mxu1 %v6798_v12  ;;  %v6736_v12 = vcombine.high %v5100_v50, %v5104_v18  ;;  %v6735_v21 = vcombine.low %v5100_v50, %v5104_v18  ;;  %v5129_v50 = vld [vmem:[%s8487_s17 + $0x1b0] sm:$0xff]  ;;  %v5126_v18 = vld [vmem:[%s8487_s17 + $0x198] sm:$0xff] }
 0x803   : > { %5868 = vmatpush2.bf16.msra.mxu1 %v6797_v60  ;;  %v5092_v60 = vld [vmem:[%s8487_s17 + $0x88] sm:$0xff] }
 0x804   : > { %5869 = vmatprep.subr.bf16.mxu1 %v6790_v63  ;;  %v6728_v63 = vcombine.high %v5092_v60, %v5096_v31 }
 0x807   : > { %5870 = vmatpush2.bf16.msra.mxu1 %v6789_v55  ;;  %v6727_v55 = vcombine.low %v5092_v60, %v5096_v31 }
 0x808   : > { %5871 = vmatprep.subr.bf16.mxu1 %v6782_v47 }
 0x80b   : > { %5872 = vmatpush2.bf16.msra.mxu1 %v6781_v49 }
 0x851   : > { %v4887_v1 = vpop.f32.mrf.mxu0 }
 0x852   : > { %v4928_v39 = vpop.f32.mrf.mxu1  ;;  %v4888_v43 = vadd.f32 %v4887_v1, %v4206_v29  ;;  %v5084_v1 = vld [vmem:[%s8487_s17 + $0x48] sm:$0xff] }
 0x853   : > { %v4889_v40 = vpop.f32.mrf.mxu0 }
 0x854   : > { %v4930_v41 = vpop.f32.mrf.mxu1  ;;  %v4890_v53 = vadd.f32 %v4889_v40, %v4210_v14  ;;  %v4929_v59 = vadd.f32 %v4928_v39, %v4888_v43  ;;  %v5088_v39 = vld [vmem:[%s8487_s17 + $0x68] sm:$0xff]  ;;  %v6816_v14 = vcombine.high %v5180_v27, %v5184_v8 }
 0x855   : > { %v4891_v48 = vpop.f32.mrf.mxu0  ;;  %v6720_v40 = vcombine.high %v5084_v1, %v5088_v39  ;;  %v6719_v46 = vcombine.low %v5084_v1, %v5088_v39  ;;  %v5172_v43 = vld [vmem:[%s8487_s17 + $0x308] sm:$0xff]  ;;  %v5121_v39 = vld [vmem:[%s8487_s17 + $0x170] sm:$0xff] }
 0x856   : > { %v4932_v11 = vpop.f32.mrf.mxu1  ;;  %v4931_v4 = vadd.f32 %v4930_v41, %v4890_v53  ;;  %v5076_v41 = vld [vmem:[%s8487_s17 + $0x8] sm:$0xff] }
 0x857   : > { %v4892_v56 = vpop.f32.mrf.mxu0  ;;  %v6712_v47 = vcombine.high %v5076_v41, %v5080_v42  ;;  %v5196_v48 = vld [vmem:[%s8487_s17 + $0x3c8] sm:$0xff]  ;;  %v6711_v49 = vcombine.low %v5076_v41, %v5080_v42 }
 0x858   : > { %v4933_v58 = vpop.f32.mrf.mxu1  ;;  %v5200_v11 = vld [vmem:[%s8487_s17 + $0x3e8] sm:$0xff] }
 0x859   : > { %v6832_v56 = vcombine.high %v5196_v48, %v5200_v11  ;;  %v5188_v58 = vld [vmem:[%s8487_s17 + $0x388] sm:$0xff]  ;;  %v6831_v17 = vcombine.low %v5196_v48, %v5200_v11  ;;  %v5109_v11 = vld [vmem:[%s8487_s17 + $0x110] sm:$0xff] }
 0x85a   : > { %v6824_v26 = vcombine.high %v5188_v58, %v5192_v16  ;;  %v6823_v29 = vcombine.low %v5188_v58, %v5192_v16  ;;  %v5176_v53 = vld [vmem:[%s8487_s17 + $0x328] sm:$0xff]  ;;  %v5114_v58 = vld [vmem:[%s8487_s17 + $0x138] sm:$0xff] }
 0x891   : > { %v4969_v15 = vpop.f32.mrf.mxu0 }
 0x892   : > { %v5010_v7 = vpop.f32.mrf.mxu1  ;;  %v4970_v57 = vadd.f32 %v4969_v15, %v4929_v59  ;;  %v6815_v59 = vcombine.low %v5180_v27, %v5184_v8  ;;  %v6808_v15 = vcombine.high %v5172_v43, %v5176_v53  ;;  %v5101_v8 = vld [vmem:[%s8487_s17 + $0xd0] sm:$0xff] }
 0x893   : > { %v4971_v52 = vpop.f32.mrf.mxu0 }
 0x894   : > { %v5012_v3 = vpop.f32.mrf.mxu1  ;;  %v5011_v2 = vadd.f32 %v5010_v7, %v4970_v57  ;;  %v4972_v28 = vadd.f32 %v4971_v52, %v4931_v4  ;;  %v5164_v7 = vld [vmem:[%s8487_s17 + $0x2c8] sm:$0xff]  ;;  %v6807_v57 = vcombine.low %v5172_v43, %v5176_v53  ;;  %v5106_v43 = vld [vmem:[%s8487_s17 + $0xf8] sm:$0xff] }
 0x895   : > { %v4973_v5 = vpop.f32.mrf.mxu0  ;;  %v5168_v4 = vld [vmem:[%s8487_s17 + $0x2e8] sm:$0xff] }
 0x896   : > { %v5014_v23 = vpop.f32.mrf.mxu1  ;;  %v5019_v51 = vpack.c.bf16 %v5011_v2, %v5011_v2  ;;  %v5013_v24 = vadd.f32 %v5012_v3, %v4972_v28  ;;  %v6800_v52 = vcombine.high %v5164_v7, %v5168_v4  ;;  %v5156_v3 = vld [vmem:[%s8487_s17 + $0x288] sm:$0xff]  ;;  %v6799_v28 = vcombine.low %v5164_v7, %v5168_v4  ;;  %v5093_v4 = vld [vmem:[%s8487_s17 + $0x90] sm:$0xff] }
 0x897   : > { %v4974_v19 = vpop.f32.mrf.mxu0  ;;  %v5160_v2 = vld [vmem:[%s8487_s17 + $0x2a8] sm:$0xff] }
 0x898   : > { %v5015_v62 = vpop.f32.mrf.mxu1  ;;  %v5020_v33 = vpack.c.bf16 %v5013_v24, %v5013_v24  ;;  %v5027_v44 = vsel %vm5025_vm2, %v5019_v51, 0  ;;  %v6792_v5 = vcombine.high %v5156_v3, %v5160_v2  ;;  %v5148_v23 = vld [vmem:[%s8487_s17 + $0x248] sm:$0xff]  ;;  %v6791_v6 = vcombine.low %v5156_v3, %v5160_v2  ;;  %v5139_v19 = vld [vmem:[%s8487_s17 + $0x200] sm:$0xff]  ;;  %v5098_v3 = vld [vmem:[%s8487_s17 + $0xb8] sm:$0xff] }
 0x899   : > { %v6784_v51 = vcombine.high %v5148_v23, %v5152_v13  ;;  %v6783_v24 = vcombine.low %v5148_v23, %v5152_v13  ;;  %v5143_v62 = vld [vmem:[%s8487_s17 + $0x220] sm:$0xff]  ;;  %v5085_v13 = vld [vmem:[%s8487_s17 + $0x50] sm:$0xff] }
 0x89a   : > { %6707 = vmatprep.subr.msk.bf16.mxu0 %vm5025_vm2, %v5020_v33  ;;  %v6774_v33 = vcombine.high %v5139_v19, %v5143_v62  ;;  %v6773_v38 = vcombine.low %v5139_v19, %v5143_v62 }
 0x89b   : > { %5047 = vmatpush1.bf16.msra.mxu0 %v5027_v44 }
 0x89c   : > { %5884 = vmatprep.subr.bf16.mxu0 %v6768_v34  ;;  %v5144_v34 = vld [vmem:[%s8487_s17 + $0x228] sm:$0xff]  ;;  %5873 = vmatprep.subr.bf16.mxu1 %v6774_v33 }
 0x89d   : > { %v6775_v35 = vcombine.low %v5140_v32, %v5144_v34  ;;  %v6776_v44 = vcombine.high %v5140_v32, %v5144_v34  ;;  %5874 = vmatpush2.bf16.msra.mxu1 %v6773_v38  ;;  %v5077_v34 = vld [vmem:[%s8487_s17 + $0x10] sm:$0xff] }
 0x89e   : > { %6708 = vmatmul.mubr.msk.bf16.vlgmr.msra.gmra.mxu0 %vm5021_vm3, %v5018_v45  ;;  %v5133_v45 = vld [vmem:[%s8487_s17 + $0x1d0] sm:$0xff] }
 0x89f   : > { %5885 = vmatpush1.bf16.msra.mxu0 %v6767_v54  ;;  %v5137_v54 = vld [vmem:[%s8487_s17 + $0x1f0] sm:$0xff] }
 0x8a0   : > { %5886 = vmatprep.subr.bf16.mxu0 %v6760_v61  ;;  %v5134_v61 = vld [vmem:[%s8487_s17 + $0x1d8] sm:$0xff]  ;;  %v6770_v22 = vcombine.high %v5133_v45, %v5137_v54  ;;  %v5081_v38 = vld [vmem:[%s8487_s17 + $0x30] sm:$0xff] }
 0x8a1   : > { %v6772_v9 = vcombine.high %v5134_v61, %v5138_v25 }
 0x8a2   : > { %5925 = vmatprep.subr.bf16.mxu1 %v6770_v22 }
 0x8a3   : > { %5887 = vmatpush1.bf16.msra.mxu0 %v6759_v30  ;;  %v6769_v30 = vcombine.low %v5133_v45, %v5137_v54 }
 0x8a4   : > { %5888 = vmatprep.subr.bf16.mxu0 %v6752_v0  ;;  %v6771_v0 = vcombine.low %v5134_v61, %v5138_v25  ;;  %v6714_v61 = vcombine.high %v5077_v34, %v5081_v38  ;;  %v5197_v25 = vld [vmem:[%s8487_s17 + $0x3d0] sm:$0xff] }
 0x8a7   : > { %5889 = vmatpush1.bf16.msra.mxu0 %v6751_v36  ;;  %v5125_v36 = vld [vmem:[%s8487_s17 + $0x190] sm:$0xff] }
 0x8a8   : > { %5890 = vmatprep.subr.bf16.mxu0 %v6744_v37  ;;  %v6761_v42 = vcombine.low %v5125_v36, %v5129_v50 }
 0x8ab   : > { %5891 = vmatpush1.bf16.msra.mxu0 %v6743_v20  ;;  %v5130_v20 = vld [vmem:[%s8487_s17 + $0x1b8] sm:$0xff] }
 0x8ac   : > { %5892 = vmatprep.subr.bf16.mxu0 %v6736_v12  ;;  %v6764_v1 = vcombine.high %v5126_v18, %v5130_v20 }
 0x8af   : > { %5893 = vmatpush1.bf16.msra.mxu0 %v6735_v21  ;;  %v5117_v21 = vld [vmem:[%s8487_s17 + $0x150] sm:$0xff] }
 0x8b0   : > { %5894 = vmatprep.subr.bf16.mxu0 %v6728_v63  ;;  %v6762_v63 = vcombine.high %v5125_v36, %v5129_v50  ;;  %v6753_v16 = vcombine.low %v5117_v21, %v5121_v39 }
 0x8b3   : > { %5895 = vmatpush1.bf16.msra.mxu0 %v6727_v55  ;;  %v5118_v55 = vld [vmem:[%s8487_s17 + $0x158] sm:$0xff] }
 0x8b4   : > { %5896 = vmatprep.subr.bf16.mxu0 %v6720_v40  ;;  %v5122_v40 = vld [vmem:[%s8487_s17 + $0x178] sm:$0xff] }
 0x8b5   : > { %v6756_v48 = vcombine.high %v5118_v55, %v5122_v40 }
 0x8b7   : > { %5897 = vmatpush1.bf16.msra.mxu0 %v6719_v46  ;;  %v6763_v46 = vcombine.low %v5126_v18, %v5130_v20  ;;  %v5189_v18 = vld [vmem:[%s8487_s17 + $0x390] sm:$0xff] }
 0x8b8   : > { %5898 = vmatprep.subr.bf16.mxu0 %v6712_v47  ;;  %v6754_v47 = vcombine.high %v5117_v21, %v5121_v39  ;;  %v5193_v20 = vld [vmem:[%s8487_s17 + $0x3b0] sm:$0xff] }
 0x8bb   : > { %5899 = vmatpush1.bf16.msra.mxu0 %v6711_v49  ;;  %v5113_v49 = vld [vmem:[%s8487_s17 + $0x130] sm:$0xff] }
 0x8bc   : > { %5900 = vmatprep.subr.bf16.mxu0 %v6832_v56  ;;  %v5110_v56 = vld [vmem:[%s8487_s17 + $0x118] sm:$0xff]  ;;  %v6745_v53 = vcombine.low %v5109_v11, %v5113_v49 }
 0x8bd   : > { %v6748_v27 = vcombine.high %v5110_v56, %v5114_v58 }
 0x8bf   : > { %5901 = vmatpush2.bf16.msra.mxu0 %v6831_v17  ;;  %v6755_v17 = vcombine.low %v5118_v55, %v5122_v40  ;;  %v5181_v55 = vld [vmem:[%s8487_s17 + $0x350] sm:$0xff] }
 0x8c0   : > { %5902 = vmatprep.subr.bf16.mxu0 %v6824_v26  ;;  %v6746_v26 = vcombine.high %v5109_v11, %v5113_v49  ;;  %v5185_v40 = vld [vmem:[%s8487_s17 + $0x370] sm:$0xff] }
 0x8c1   : > { %v5173_v49 = vld [vmem:[%s8487_s17 + $0x310] sm:$0xff] }
 0x8c3   : > { %5903 = vmatpush2.bf16.msra.mxu0 %v6823_v29  ;;  %v5105_v29 = vld [vmem:[%s8487_s17 + $0xf0] sm:$0xff] }
 0x8c4   : > { %5904 = vmatprep.subr.bf16.mxu0 %v6816_v14  ;;  %v5102_v14 = vld [vmem:[%s8487_s17 + $0xd8] sm:$0xff]  ;;  %v6737_v2 = vcombine.low %v5101_v8, %v5105_v29 }
 0x8c5   : > { %v6740_v7 = vcombine.high %v5102_v14, %v5106_v43 }
 0x8c7   : > { %5905 = vmatpush2.bf16.msra.mxu0 %v6815_v59  ;;  %v6747_v59 = vcombine.low %v5110_v56, %v5114_v58  ;;  %v5177_v56 = vld [vmem:[%s8487_s17 + $0x330] sm:$0xff]  ;;  %v5174_v58 = vld [vmem:[%s8487_s17 + $0x318] sm:$0xff] }
 0x8c8   : > { %5906 = vmatprep.subr.bf16.mxu0 %v6808_v15  ;;  %v6738_v15 = vcombine.high %v5101_v8, %v5105_v29  ;;  %v5165_v29 = vld [vmem:[%s8487_s17 + $0x2d0] sm:$0xff] }
 0x8cb   : > { %5907 = vmatpush2.bf16.msra.mxu0 %v6807_v57  ;;  %v5097_v57 = vld [vmem:[%s8487_s17 + $0xb0] sm:$0xff] }
 0x8cc   : > { %5908 = vmatprep.subr.bf16.mxu0 %v6800_v52  ;;  %v5094_v52 = vld [vmem:[%s8487_s17 + $0x98] sm:$0xff]  ;;  %v6729_v19 = vcombine.low %v5093_v4, %v5097_v57 }
 0x8cd   : > { %v6732_v23 = vcombine.high %v5094_v52, %v5098_v3  ;;  %v6731_v62 = vcombine.low %v5094_v52, %v5098_v3  ;;  %v5161_v52 = vld [vmem:[%s8487_s17 + $0x2b0] sm:$0xff]  ;;  %v5158_v3 = vld [vmem:[%s8487_s17 + $0x298] sm:$0xff] }
 0x8cf   : > { %5909 = vmatpush2.bf16.msra.mxu0 %v6799_v28  ;;  %v6739_v28 = vcombine.low %v5102_v14, %v5106_v43  ;;  %v5169_v14 = vld [vmem:[%s8487_s17 + $0x2f0] sm:$0xff]  ;;  %v5166_v43 = vld [vmem:[%s8487_s17 + $0x2d8] sm:$0xff] }
 0x8d0   : > { %5910 = vmatprep.subr.bf16.mxu0 %v6792_v5  ;;  %v6730_v5 = vcombine.high %v5093_v4, %v5097_v57  ;;  %v5157_v57 = vld [vmem:[%s8487_s17 + $0x290] sm:$0xff] }
 0x8d3   : > { %5911 = vmatpush2.bf16.msra.mxu0 %v6791_v6  ;;  %v5089_v6 = vld [vmem:[%s8487_s17 + $0x70] sm:$0xff] }
 0x8d4   : > { %5912 = vmatprep.subr.bf16.mxu0 %v6784_v51  ;;  %v5086_v51 = vld [vmem:[%s8487_s17 + $0x58] sm:$0xff]  ;;  %v6722_v32 = vcombine.high %v5085_v13, %v5089_v6  ;;  %v6721_v45 = vcombine.low %v5085_v13, %v5089_v6  ;;  %v5149_v6 = vld [vmem:[%s8487_s17 + $0x250] sm:$0xff] }
 0x8d7   : > { %5913 = vmatpush2.bf16.msra.mxu0 %v6783_v24  ;;  %v5090_v24 = vld [vmem:[%s8487_s17 + $0x78] sm:$0xff] }
 0x8d8   : > { %5914 = vmatprep.subr.bf16.mxu0 %v6776_v44  ;;  %v6724_v33 = vcombine.high %v5086_v51, %v5090_v24  ;;  %v5082_v44 = vld [vmem:[%s8487_s17 + $0x38] sm:$0xff]  ;;  %v6723_v54 = vcombine.low %v5086_v51, %v5090_v24  ;;  %v5153_v51 = vld [vmem:[%s8487_s17 + $0x270] sm:$0xff] }
 0x8d9   : > { %v5150_v24 = vld [vmem:[%s8487_s17 + $0x258] sm:$0xff] }
 0x8db   : > { %5915 = vmatpush2.bf16.msra.mxu0 %v6775_v35  ;;  %v5078_v35 = vld [vmem:[%s8487_s17 + $0x18] sm:$0xff] }
 0x8dc   : > { %5966 = vmatprep.subr.bf16.mxu0 %v6772_v9  ;;  %v6716_v22 = vcombine.high %v5078_v35, %v5082_v44  ;;  %v5202_v9 = vld [vmem:[%s8487_s17 + $0x3f8] sm:$0xff]  ;;  %v6715_v36 = vcombine.low %v5078_v35, %v5082_v44  ;;  %v5145_v35 = vld [vmem:[%s8487_s17 + $0x230] sm:$0xff] }
 0x8dd   : > { %v5142_v44 = vld [vmem:[%s8487_s17 + $0x218] sm:$0xff] }
 0x95e   : > { %v5066_v10 = vpop.f32.mrf.mxu0 }
 0x95f   : > { %v9209_v60 = vpack.c.bf16 %v5066_v10, %v5066_v10  ;;  %v6713_v10 = vcombine.low %v5077_v34, %v5081_v38  ;;  %v5141_v38 = vld [vmem:[%s8487_s17 + $0x210] sm:$0xff] }
 0x960   : > { %v5068_v37 = vpop.f32.mrf.mxu0 }
 0x961   : > { %v5074_v12 = vpack.c.bf16 %v5068_v37, %v5068_v37 }
 0x962   : > { %v5070_v31 = vpop.f32.mrf.mxu0 }
 0x963   : > { %5875 = vmatprep.mubr.bf16.mxu1 %v5074_v12  ;;  %5916 = vmatprep.mubr.bf16.mxu0 %v5074_v12  ;;  %v5194_v31 = vld [vmem:[%s8487_s17 + $0x3b8] sm:$0xff] }
 0x964   : > { %v5071_v41 = vpop.f32.mrf.mxu0  ;;  %5876 = vmatmul.mubr.bf16.vlgmr.msra.gmra.mxu1 %v9209_v60  ;;  %5917 = vmatmul.mubr.bf16.vlgmr.msra.gmra.mxu0 %v9209_v60 }
 0x965   : > { %5926 = vmatpush1.bf16.msra.mxu1 %v6769_v30  ;;  %5967 = vmatpush1.bf16.msra.mxu0 %v6771_v0  ;;  %v5201_v30 = vld [vmem:[%s8487_s17 + $0x3f0] sm:$0xff]  ;;  %v5198_v0 = vld [vmem:[%s8487_s17 + $0x3d8] sm:$0xff] }
 0x966   : > { %5957 = vmatprep.mubr.bf16.mxu1 %v5074_v12  ;;  %5998 = vmatprep.mubr.bf16.mxu0 %v5074_v12  ;;  %v6834_v37 = vcombine.high %v5197_v25, %v5201_v30  ;;  %v6836_v50 = vcombine.high %v5198_v0, %v5202_v9  ;;  %v5190_v12 = vld [vmem:[%s8487_s17 + $0x398] sm:$0xff]  ;;  %v6833_v21 = vcombine.low %v5197_v25, %v5201_v30 }
 0x967   : > { %5927 = vmatprep.subr.bf16.mxu1 %v6762_v63  ;;  %5968 = vmatprep.subr.bf16.mxu0 %v6764_v1  ;;  %v6835_v63 = vcombine.low %v5198_v0, %v5202_v9  ;;  %v6826_v1 = vcombine.high %v5189_v18, %v5193_v20  ;;  %v6828_v39 = vcombine.high %v5190_v12, %v5194_v31  ;;  %v5182_v41 = vld [vmem:[%s8487_s17 + $0x358] sm:$0xff]  ;;  %v6007_v9 = vld [vmem:[#allocation20] sm:$0xff] }
 0x968   : > { %v6777_v30 = vcombine.low %v5141_v38, %v5145_v35 }
 0x969   : > { %5928 = vmatpush1.bf16.msra.mxu1 %v6761_v42  ;;  %5969 = vmatpush1.bf16.msra.mxu0 %v6763_v46  ;;  %v5186_v42 = vld [vmem:[%s8487_s17 + $0x378] sm:$0xff]  ;;  %v6825_v46 = vcombine.low %v5189_v18, %v5193_v20 }
 0x96a   : > { %5929 = vmatprep.subr.bf16.mxu1 %v6754_v47  ;;  %5970 = vmatprep.subr.bf16.mxu0 %v6756_v48  ;;  %v6827_v47 = vcombine.low %v5190_v12, %v5194_v31  ;;  %v6818_v48 = vcombine.high %v5181_v55, %v5185_v40  ;;  %v6820_v11 = vcombine.high %v5182_v41, %v5186_v42  ;;  %v6010_v18 = vld [vmem:[#allocation20 + $0x18] sm:$0xff] }
 0x96d   : > { %5930 = vmatpush1.bf16.msra.mxu1 %v6753_v16  ;;  %5971 = vmatpush1.bf16.msra.mxu0 %v6755_v17  ;;  %v5178_v16 = vld [vmem:[%s8487_s17 + $0x338] sm:$0xff]  ;;  %v6817_v17 = vcombine.low %v5181_v55, %v5185_v40 }
 0x96e   : > { %5931 = vmatprep.subr.bf16.mxu1 %v6746_v26  ;;  %5972 = vmatprep.subr.bf16.mxu0 %v6748_v27  ;;  %v6819_v26 = vcombine.low %v5182_v41, %v5186_v42  ;;  %v6810_v27 = vcombine.high %v5173_v49, %v5177_v56  ;;  %v6812_v8 = vcombine.high %v5174_v58, %v5178_v16  ;;  %v6011_v41 = vld [vmem:[#allocation20 + $0x20] sm:$0xff]  ;;  %v6013_v42 = vld [vmem:[#allocation20 + $0x30] sm:$0xff] }
 0x971   : > { %5932 = vmatpush1.bf16.msra.mxu1 %v6745_v53  ;;  %5973 = vmatpush1.bf16.msra.mxu0 %v6747_v59  ;;  %v5170_v53 = vld [vmem:[%s8487_s17 + $0x2f8] sm:$0xff]  ;;  %v6809_v59 = vcombine.low %v5173_v49, %v5177_v56 }
 0x972   : > { %5933 = vmatprep.subr.bf16.mxu1 %v6738_v15  ;;  %5974 = vmatprep.subr.bf16.mxu0 %v6740_v7  ;;  %v6811_v15 = vcombine.low %v5174_v58, %v5178_v16  ;;  %v6802_v7 = vcombine.high %v5165_v29, %v5169_v14  ;;  %v6804_v4 = vcombine.high %v5166_v43, %v5170_v53 }
 0x975   : > { %5934 = vmatpush1.bf16.msra.mxu1 %v6737_v2  ;;  %5975 = vmatpush1.bf16.msra.mxu0 %v6739_v28  ;;  %v5162_v2 = vld [vmem:[%s8487_s17 + $0x2b8] sm:$0xff]  ;;  %v6801_v28 = vcombine.low %v5165_v29, %v5169_v14 }
 0x976   : > { %5935 = vmatprep.subr.bf16.mxu1 %v6730_v5  ;;  %5976 = vmatprep.subr.bf16.mxu0 %v6732_v23  ;;  %v6803_v5 = vcombine.low %v5166_v43, %v5170_v53  ;;  %v6794_v23 = vcombine.high %v5157_v57, %v5161_v52  ;;  %v6796_v13 = vcombine.high %v5158_v3, %v5162_v2 }
 0x979   : > { %5936 = vmatpush1.bf16.msra.mxu1 %v6729_v19  ;;  %5977 = vmatpush1.bf16.msra.mxu0 %v6731_v62  ;;  %v5154_v19 = vld [vmem:[%s8487_s17 + $0x278] sm:$0xff]  ;;  %v6793_v62 = vcombine.low %v5157_v57, %v5161_v52 }
 0x97a   : > { %5937 = vmatprep.subr.bf16.mxu1 %v6722_v32  ;;  %5978 = vmatprep.subr.bf16.mxu0 %v6724_v33  ;;  %v6795_v32 = vcombine.low %v5158_v3, %v5162_v2  ;;  %v6786_v33 = vcombine.high %v5149_v6, %v5153_v51  ;;  %v6788_v34 = vcombine.high %v5150_v24, %v5154_v19 }
 0x97d   : > { %5938 = vmatpush1.bf16.msra.mxu1 %v6721_v45  ;;  %5979 = vmatpush1.bf16.msra.mxu0 %v6723_v54  ;;  %v5146_v45 = vld [vmem:[%s8487_s17 + $0x238] sm:$0xff]  ;;  %v6785_v54 = vcombine.low %v5149_v6, %v5153_v51 }
 0x97e   : > { %5939 = vmatprep.subr.bf16.mxu1 %v6714_v61  ;;  %5980 = vmatprep.subr.bf16.mxu0 %v6716_v22  ;;  %v6787_v61 = vcombine.low %v5150_v24, %v5154_v19  ;;  %v6778_v22 = vcombine.high %v5141_v38, %v5145_v35  ;;  %v6780_v25 = vcombine.high %v5142_v44, %v5146_v45 }
 0x97f   : > { %v6779_v0 = vcombine.low %v5142_v44, %v5146_v45 }
 0x981   : > { %5940 = vmatpush1.bf16.msra.mxu1 %v6713_v10  ;;  %5981 = vmatpush1.bf16.msra.mxu0 %v6715_v36  ;;  %v6009_v10 = vld [vmem:[#allocation20 + $0x10] sm:$0xff] }
 0x982   : > { %5941 = vmatprep.subr.bf16.mxu1 %v6834_v37  ;;  %5982 = vmatprep.subr.bf16.mxu0 %v6836_v50  ;;  %v6008_v50 = vld [vmem:[#allocation20 + $0x8] sm:$0xff] }
 0x985   : > { %5942 = vmatpush2.bf16.msra.mxu1 %v6833_v21  ;;  %5983 = vmatpush2.bf16.msra.mxu0 %v6835_v63 }
 0x986   : > { %5943 = vmatprep.subr.bf16.mxu1 %v6826_v1  ;;  %5984 = vmatprep.subr.bf16.mxu0 %v6828_v39 }
 0x989   : > { %5944 = vmatpush2.bf16.msra.mxu1 %v6825_v46  ;;  %5985 = vmatpush2.bf16.msra.mxu0 %v6827_v47 }
 0x98a   : > { %5945 = vmatprep.subr.bf16.mxu1 %v6818_v48  ;;  %5986 = vmatprep.subr.bf16.mxu0 %v6820_v11  ;;  %v6012_v48 = vld [vmem:[#allocation20 + $0x28] sm:$0xff]  ;;  %v6014_v11 = vld [vmem:[#allocation20 + $0x38] sm:$0xff] }
 0x98d   : > { %5946 = vmatpush2.bf16.msra.mxu1 %v6817_v17  ;;  %5987 = vmatpush2.bf16.msra.mxu0 %v6819_v26 }
 0x98e   : > { %5947 = vmatprep.subr.bf16.mxu1 %v6810_v27  ;;  %5988 = vmatprep.subr.bf16.mxu0 %v6812_v8 }
 0x991   : > { %5948 = vmatpush2.bf16.msra.mxu1 %v6809_v59  ;;  %5989 = vmatpush2.bf16.msra.mxu0 %v6811_v15 }
 0x992   : > { %5949 = vmatprep.subr.bf16.mxu1 %v6802_v7  ;;  %5990 = vmatprep.subr.bf16.mxu0 %v6804_v4 }
 0x995   : > { %5950 = vmatpush2.bf16.msra.mxu1 %v6801_v28  ;;  %5991 = vmatpush2.bf16.msra.mxu0 %v6803_v5 }
 0x996   : > { %5951 = vmatprep.subr.bf16.mxu1 %v6794_v23  ;;  %5992 = vmatprep.subr.bf16.mxu0 %v6796_v13 }
 0x999   : > { %5952 = vmatpush2.bf16.msra.mxu1 %v6793_v62  ;;  %5993 = vmatpush2.bf16.msra.mxu0 %v6795_v32 }
 0x99a   : > { %5953 = vmatprep.subr.bf16.mxu1 %v6786_v33  ;;  %5994 = vmatprep.subr.bf16.mxu0 %v6788_v34 }
 0x99d   : > { %5954 = vmatpush2.bf16.msra.mxu1 %v6785_v54  ;;  %5995 = vmatpush2.bf16.msra.mxu0 %v6787_v61 }
 0x99e   : > { %5955 = vmatprep.subr.bf16.mxu1 %v6778_v22  ;;  %5996 = vmatprep.subr.bf16.mxu0 %v6780_v25 }
 0x9a1   : > { %5956 = vmatpush2.bf16.msra.mxu1 %v6777_v30  ;;  %5997 = vmatpush2.bf16.msra.mxu0 %v6779_v0 }
 0x9a4   : > { %5958 = vmatmul.mubr.bf16.vlgmr.msra.gmra.mxu1 %v9209_v60  ;;  %5999 = vmatmul.mubr.bf16.vlgmr.msra.gmra.mxu0 %v9209_v60 }
 0xa24   : > { %v5877_v36 = vpop.f32.mrf.mxu1  ;;  %v5918_v37 = vpop.f32.mrf.mxu0 }
 0xa25   : > { %v6015_v20 = vadd.f32 %v6007_v9, %v5877_v36  ;;  %v6017_v12 = vadd.f32 %v6009_v10, %v5918_v37 }
 0xa26   : > { %v5879_v31 = vpop.f32.mrf.mxu1  ;;  %v5920_v21 = vpop.f32.mrf.mxu0 }
 0xa27   : > { %6023 = vst [vmem:[#allocation20] sm:$0xff] %v6015_v20  ;;  %6025 = vst [vmem:[#allocation20 + $0x10] sm:$0xff] %v6017_v12  ;;  %v6016_v63 = vadd.f32 %v6008_v50, %v5879_v31  ;;  %v6018_v1 = vadd.f32 %v6010_v18, %v5920_v21 }
 0xa28   : > { %v5881_v39 = vpop.f32.mrf.mxu1  ;;  %v5922_v55 = vpop.f32.mrf.mxu0 }
 0xa29   : > { %6024 = vst [vmem:[#allocation20 + $0x8] sm:$0xff] %v6016_v63  ;;  %6026 = vst [vmem:[#allocation20 + $0x18] sm:$0xff] %v6018_v1 }
 0xa2a   : > { %v5882_v60 = vpop.f32.mrf.mxu1  ;;  %v5923_v40 = vpop.f32.mrf.mxu0 }
 0xa64   : > { %v5959_v46 = vpop.f32.mrf.mxu1  ;;  %v6000_v47 = vpop.f32.mrf.mxu0 }
 0xa65   : > { %v6019_v49 = vadd.f32 %v6011_v41, %v5959_v46  ;;  %v6021_v56 = vadd.f32 %v6013_v42, %v6000_v47 }
 0xa66   : > { %v5961_v58 = vpop.f32.mrf.mxu1  ;;  %v6002_v16 = vpop.f32.mrf.mxu0 }
 0xa67   : > { %6027 = vst [vmem:[#allocation20 + $0x20] sm:$0xff] %v6019_v49  ;;  %6029 = vst [vmem:[#allocation20 + $0x30] sm:$0xff] %v6021_v56  ;;  %v6020_v17 = vadd.f32 %v6012_v48, %v5961_v58  ;;  %v6022_v26 = vadd.f32 %v6014_v11, %v6002_v16 }
 0xa68   : > { %v5963_v27 = vpop.f32.mrf.mxu1  ;;  %v6004_v8 = vpop.f32.mrf.mxu0 }
 0xa69   : > { %6028 = vst [vmem:[#allocation20 + $0x28] sm:$0xff] %v6020_v17  ;;  %6030 = vst [vmem:[#allocation20 + $0x38] sm:$0xff] %v6022_v26 }
 0xa6a   : > { %v5964_v29 = vpop.f32.mrf.mxu1  ;;  %v6005_v14 = vpop.f32.mrf.mxu0 }
 0xa6b   : > { %8053 = shalt.err (!%p8050_p12)
}
 0xa6c   : > { %s9441_s21 = sld [smem:[#allocation57_spill]] }
 0xa72   : > { %6997 = dma.vmem_to_hbm [thread:$0]  (%p7047_p2), %s6039_s18, 1152, %s9441_s21, [#allocation5]  }
 0xa73   : > { %8109 = dma.done.wait (%p7047_p2), [#allocation5], 1152  }
 0xa74   : > { %8111 = vsyncadd (%p7047_p2), [#allocation5], 4294966144 }
 0xa75 PF: > { %s9442_s24 = sld [smem:[#allocation29_spill]]  ;;  %s9444_s21 = smov %s8118_s22 }
 0xa76   : > { %s9443_s15 = sld [smem:[#allocation30_spill]]  ;;  %s9445_s22 = smov %s8122_s23 }
 0xa7b   : > { %p30_p1 = scmp.ge.s32.totalorder %s9442_s24, 6  }
 0xa7c   : > { %s9446_s23 = smov %s9443_s15 }
 0xa7d   :  { %32 = sbr.rel (!%p30_p1) target bundleno = 19 (0x13), region = 162 }
 0xa82   :  { %6051 = vsyncpa [#allocation4], 1 }
 0xa83   :  { %6053 = vsyncpa [#allocation4 + $0x1], 1 }
 0xa84   :  { %6054 = vsyncpa [#allocation7], 1 }
 0xa85   :  { %6055 = vsyncpa [#allocation10], 1 }
 0xa86   :  { %6057 = vsyncpa [#allocation10 + $0x1], 1 }
 0xa87   :  { %6058 = vsyncpa [#allocation13], 1 }
 0xa88   :  { %6060 = vsyncpa [#allocation13 + $0x1], 1 }
 0xa89   :  { %6061 = vsyncpa [#allocation16], 1 }
 0xa8a   :  { %6062 = vsyncpa [#allocation19], 1 }
 0xa8b   :  { %6063 = vsyncpa [#allocation5], 1 }
 0xa8c   :  { %6065 = vsyncpa [#allocation5 + $0x1], 1 }

</bundles_post_ra>
